<compile_context>
chip_gen: v7x
topology: tpu7x:2x2x1
jax: 0.10.0
libtpu: 0.0.40
codegen_flags: <defaults>
</compile_context>

<pallas_src>
import functools

import jax
import jax.numpy as jnp
from jax import lax
from jax.experimental import pallas as pl
from jax.experimental.pallas import tpu as pltpu

_VMEM_LIMIT = 32 * 1024 * 1024        # safe scoped-VMEM limit on v5e/v6e/v7x


# ----------------------------------------------------------------------------
# small helpers
# ----------------------------------------------------------------------------
def _softplus(x):
    return jnp.maximum(x, 0.0) + jnp.log1p(jnp.exp(-jnp.abs(x)))


def _row_tile(M, cap=512):
    # keep >= 2 grid steps when possible (v7x megacore + pipelining on v5e/v6e)
    cap = min(cap, max(8, M // 2))
    for t in (512, 256, 128, 64, 32, 16, 8):
        if t <= cap and M % t == 0:
            return t
    return M


# ----------------------------------------------------------------------------
# Kernel 1: fused toMask(+SiLU) + in_proj.  One matmul against the concatenated
# weight [c | in_proj_x | in_proj_z]; SiLU applied only to the first c lanes.
# Single lane-dense (tm, c+2d) output slab (split later inside kernel 3).
# ----------------------------------------------------------------------------
def _inproj_kernel(c, x_ref, w_ref, o_ref):
    xb = x_ref[...].astype(jnp.bfloat16)
    m = jnp.dot(xb, w_ref[...], preferred_element_type=jnp.float32)
    cols = lax.broadcasted_iota(jnp.int32, m.shape, 1)
    o_ref[...] = jnp.where(cols < c, m * jax.nn.sigmoid(m), m)


def fused_input_proj(x_flat, w_cat, c):
    M, cin = x_flat.shape
    N = w_cat.shape[1]
    tm = _row_tile(M)
    return pl.pallas_call(
        functools.partial(_inproj_kernel, c),
        out_shape=jax.ShapeDtypeStruct((M, N), jnp.float32),
        grid=(M // tm,),
        in_specs=[pl.BlockSpec((tm, cin), lambda i: (i, 0)),
                  pl.BlockSpec((cin, N), lambda i: (0, 0))],
        out_specs=pl.BlockSpec((tm, N), lambda i: (i, 0)),
        compiler_params=pltpu.CompilerParams(
            dimension_semantics=("parallel",),
            vmem_limit_bytes=_VMEM_LIMIT),
    )(x_flat, w_cat)


# ----------------------------------------------------------------------------
# Kernel 2: MaskGuidedMechanism, fully fused per batch.
#   Layout is [h, w*c] (pixels-of-a-row folded onto lanes).  The two 1x1 convs
#   are block-diagonal matmuls in that layout, the 5x5 depthwise conv reads a
#   zero-padded VMEM scratch (aligned interior store), sigmoid + gate + residual
#   are applied in place.  m1 / y2 never hit HBM.
# ----------------------------------------------------------------------------
def _mgm_kernel(h, w, c, top, left, m_ref, w1_ref, b1_ref, w2_ref, b2_ref,
                wdw_ref, bdw_ref, o_ref, pad_ref):
    wc = w * c
    m = m_ref[...]                                                  # [h, w*c]
    mb = m.astype(jnp.bfloat16)
    m1 = jnp.dot(mb, w1_ref[...], preferred_element_type=jnp.float32) + b1_ref[...]
    y2 = jnp.dot(m1.astype(jnp.bfloat16), w2_ref[...],
                 preferred_element_type=jnp.float32) + b2_ref[...]

    # zero-padded 5x5 depthwise conv, padding done entirely in VMEM
    pad_ref[...] = jnp.zeros(pad_ref.shape, jnp.float32)
    pad_ref[top:top + h, left:left + wc] = y2       # sublane/lane aligned store

    wdw = wdw_ref[...]                                              # [25, w*c]
    acc = jnp.zeros((h, wc), jnp.float32) + bdw_ref[...]
    for dj in range(5):                      # hoist lane extraction: 5 not 25
        lo = left + (dj - 2) * c
        col = pad_ref[:, lo:lo + wc]                        # [top+h+2+, w*c]
        for di in range(5):
            r0 = top + (di - 2)
            acc = acc + col[r0:r0 + h, :] * wdw[di * 5 + dj:di * 5 + dj + 1, :]
    attn = jax.nn.sigmoid(acc)
    o_ref[...] = m1 * attn + m1


def mgm_fused(mask_rows, w1_bd, b1_t, w2_bd, b2_t, dw_w_t, dw_b_t, h, w, c):
    b = mask_rows.shape[0]
    wc = w * c
    top = 8                                    # >= 2 rows of zeros, sublane aligned
    left = -(-2 * c // 128) * 128              # >= 2*c lanes of zeros, lane aligned
    prows = top + h + 8
    pcols = left + (w + 2) * c
    return pl.pallas_call(
        functools.partial(_mgm_kernel, h, w, c, top, left),
        out_shape=jax.ShapeDtypeStruct((b, h, wc), jnp.float32),
        grid=(b,),
        in_specs=[
            pl.BlockSpec((None, h, wc), lambda i: (i, 0, 0)),    # mask rows
            pl.BlockSpec((wc, wc), lambda i: (0, 0)),            # conv1 (block-diag)
            pl.BlockSpec((1, wc), lambda i: (0, 0)),             # conv1 bias
            pl.BlockSpec((wc, wc), lambda i: (0, 0)),            # conv2 (block-diag)
            pl.BlockSpec((1, wc), lambda i: (0, 0)),             # conv2 bias
            pl.BlockSpec((25, wc), lambda i: (0, 0)),            # depthwise w (tiled)
            pl.BlockSpec((1, wc), lambda i: (0, 0)),             # depthwise bias
        ],
        out_specs=pl.BlockSpec((None, h, wc), lambda i: (i, 0, 0)),
        scratch_shapes=[pltpu.VMEM((prows, pcols), jnp.float32)],
        compiler_params=pltpu.CompilerParams(
            dimension_semantics=("parallel",),
            vmem_limit_bytes=_VMEM_LIMIT),
    )(mask_rows, w1_bd, b1_t, w2_bd, b2_t, dw_w_t, dw_b_t)


# ----------------------------------------------------------------------------
# Kernel 3: the whole Mamba path per batch.
#   Lane-dense SSM layout: the (d_state, d_inner) state is folded onto the lane
#   axis (index j = s*d_inner + i, 8*16 = 128 lanes).  The serial recurrence
#   h_t = dA_t*h_{t-1} + dBu_t is run 8 timesteps per vreg with a 3-step
#   Hillis-Steele scan built from sublane concatenates (no per-step masked
#   single-sublane loads/stores).
# ----------------------------------------------------------------------------
def _mamba_kernel(L, d, c, S, K, eps, xz_ref, attn_ref, convw_ref, convb_ref,
                  wdt_ref, bdt_ref, wb_ref, wc_ref, a_ref, r_ref, dD_ref,
                  g_ref, wo_ref, wt_ref, o_ref, xpad_ref, H_ref):
    SD = S * d
    P = 8                                       # left-pad rows for causal conv

    xz = xz_ref[...]                                            # [L, c + 2d]
    x_mask = xz[:, :c]
    x_in = xz[:, c:c + d]
    z = xz[:, c + d:c + 2 * d]

    # ---- causal depthwise conv1d (kernel K) + SiLU; zero padding in VMEM ----
    xpad_ref[0:P, :] = jnp.zeros((P, d), jnp.float32)
    xpad_ref[P:P + L, :] = x_in
    convw = convw_ref[...]
    acc = jnp.zeros((L, d), jnp.float32) + convb_ref[...]
    for k in range(K):
        s0 = P - (K - 1) + k
        acc = acc + xpad_ref[s0:s0 + L, :] * convw[k:k + 1, :]
    u = acc * jax.nn.sigmoid(acc)                               # [L, d]

    # ---- input-dependent SSM params (bf16 MXU operands, f32 accumulate) ----
    ub = u.astype(jnp.bfloat16)
    dt = _softplus(jnp.dot(ub, wdt_ref[...], preferred_element_type=jnp.float32)
                   + bdt_ref[...])                              # [L, S*d]
    B_r = jnp.dot(ub, wb_ref[...], preferred_element_type=jnp.float32)
    C_r = jnp.dot(ub, wc_ref[...], preferred_element_type=jnp.float32)
    u_t = jnp.concatenate([u] * S, axis=1)                      # lane replicate
    dA = jnp.exp(dt * a_ref[...])
    dBu = dt * u_t * B_r

    # ---- block-of-8 scan of h_t = dA_t * h_{t-1} + dBu_t ----
    h_prev = jnp.zeros((1, SD), jnp.float32)
    for bi in range(L // 8):
        r0 = bi * 8
        A = dA[r0:r0 + 8, :]
        Bv = dBu[r0:r0 + 8, :]
        for s in (1, 2, 4):                     # Hillis-Steele within the vreg
            A_sh = jnp.concatenate(
                [jnp.ones((s, SD), jnp.float32), A[:8 - s, :]], axis=0)
            B_sh = jnp.concatenate(
                [jnp.zeros((s, SD), jnp.float32), Bv[:8 - s, :]], axis=0)
            Bv = A * B_sh + Bv
            A = A * A_sh
        Hblk = A * h_prev + Bv
        H_ref[r0:r0 + 8, :] = Hblk              # aligned 8-row store
        h_prev = Hblk[7:8, :]

    # ---- y = sum_s C*H + D*u, gated by SiLU(z) ----
    y = jnp.dot((H_ref[...] * C_r).astype(jnp.bfloat16), r_ref[...],
                preferred_element_type=jnp.float32)             # [L, d]
    y = (y + u * dD_ref[...]) * (z * jax.nn.sigmoid(z))

    # ---- RMSNorm + out_proj + combine with mask attention + toOut ----
    var = jnp.mean(y * y, axis=1, keepdims=True)
    yn = y * lax.rsqrt(var + eps) * g_ref[...]
    x_mamba = jnp.dot(yn.astype(jnp.bfloat16), wo_ref[...],
                      preferred_element_type=jnp.float32)
    mixed = x_mamba + x_mask * attn_ref[...]
    o_ref[...] = jnp.dot(mixed.astype(jnp.bfloat16), wt_ref[...],
                         preferred_element_type=jnp.float32)


def mamba_fused(xz, attn, dp):
    b, L, W = xz.shape
    c = attn.shape[2]
    d = (W - c) // 2
    SD = dp["a_flat"].shape[1]
    S = SD // d
    K = dp["conv_w"].shape[0]
    assert L % 8 == 0, "sequence length (h*w) must be a multiple of 8"
    assert K <= 9
    return pl.pallas_call(
        functools.partial(_mamba_kernel, L, d, c, S, K, 1e-5),
        out_shape=jax.ShapeDtypeStruct((b, L, c), jnp.float32),
        grid=(b,),
        in_specs=[
            pl.BlockSpec((None, L, W), lambda i: (i, 0, 0)),    # xz slab
            pl.BlockSpec((None, L, c), lambda i: (i, 0, 0)),    # mask attention
            pl.BlockSpec((K, d), lambda i: (0, 0)),             # conv1d weight
            pl.BlockSpec((1, d), lambda i: (0, 0)),             # conv1d bias
            pl.BlockSpec((d, SD), lambda i: (0, 0)),            # W_dt tiled (bf16)
            pl.BlockSpec((1, SD), lambda i: (0, 0)),            # dt bias tiled
            pl.BlockSpec((d, SD), lambda i: (0, 0)),            # W_B repeated (bf16)
            pl.BlockSpec((d, SD), lambda i: (0, 0)),            # W_C repeated (bf16)
            pl.BlockSpec((1, SD), lambda i: (0, 0)),            # A flat
            pl.BlockSpec((SD, d), lambda i: (0, 0)),            # state-sum (bf16)
            pl.BlockSpec((1, d), lambda i: (0, 0)),             # D
            pl.BlockSpec((1, d), lambda i: (0, 0)),             # RMSNorm gamma
            pl.BlockSpec((d, c), lambda i: (0, 0)),             # out_proj (bf16)
            pl.BlockSpec((c, c), lambda i: (0, 0)),             # toOut (bf16)
        ],
        out_specs=pl.BlockSpec((None, L, c), lambda i: (i, 0, 0)),
        scratch_shapes=[pltpu.VMEM((L + 8, d), jnp.float32),     # conv pad buffer
                        pltpu.VMEM((L, SD), jnp.float32)],       # scan states H
        compiler_params=pltpu.CompilerParams(
            dimension_semantics=("parallel",),
            vmem_limit_bytes=_VMEM_LIMIT),
    )(xz, attn, dp["conv_w"], dp["conv_b"], dp["wdt_tiled"], dp["bdt_tiled"],
      dp["wb_rep"], dp["wc_rep"], dp["a_flat"], dp["r_sum"], dp["d_row"],
      dp["norm_g"], dp["out_proj_w"], dp["toOut_w"])


# ----------------------------------------------------------------------------
# shift_back (static indexing -> plain JAX glue).  Operates on NHWC.
# At row=8 all per-channel offsets round to 0, so this is an identity (matches
# the PyTorch semantics, which are designed for 256-wide feature maps).
# ----------------------------------------------------------------------------
def shift_back_nhwc(x_nhwc, step=2):
    b, row, col, nC = x_nhwc.shape
    down_sample = 256 // row
    stepf = float(step) / float(down_sample * down_sample)
    out_col = row
    offs = [int(stepf * i) for i in range(nC)]
    if all(o == 0 for o in offs) and out_col == col:
        return x_nhwc
    chans = [x_nhwc[:, :, offs[i]:offs[i] + out_col, i] for i in range(nC)]
    return jnp.stack(chans, axis=-1)


# ----------------------------------------------------------------------------
# Parameter init (deterministic, synthetic weights)
# ----------------------------------------------------------------------------
def init_params(key, c, d_state=8, d_conv=4):
    d_inner = c                       # expand = 1
    dt_rank = max(1, c // 16)
    ks = jax.random.split(key, 16)
    s = 0.1

    def nrm(k, shape):
        return (s * jax.random.normal(k, shape)).astype(jnp.float32)

    return {
        "toMask_w": nrm(ks[0], (c, c)),
        "toOut_w": nrm(ks[1], (c, c)),
        "in_proj_w": nrm(ks[2], (c, 2 * d_inner)),
        "conv1d_w": nrm(ks[3], (d_conv, d_inner)),
        "conv1d_b": nrm(ks[4], (d_inner,)),
        "x_proj_w": nrm(ks[5], (d_inner, dt_rank + 2 * d_state)),
        "dt_proj_w": nrm(ks[6], (dt_rank, d_inner)),
        "dt_proj_b": nrm(ks[7], (d_inner,)),
        "A_log": jnp.log(
            jnp.broadcast_to(jnp.arange(1, d_state + 1, dtype=jnp.float32),
                             (d_inner, d_state))),
        "D": jnp.ones((d_inner,), jnp.float32),
        "norm_g": jnp.ones((d_inner,), jnp.float32),
        "out_proj_w": nrm(ks[8], (d_inner, c)),
        "mm_conv1_w": nrm(ks[9], (c, c)),
        "mm_conv1_b": nrm(ks[10], (c,)),
        "mm_conv2_w": nrm(ks[11], (c, c)),
        "mm_conv2_b": nrm(ks[12], (c,)),
        "mm_dw_w": nrm(ks[13], (25, c)),
        "mm_dw_b": nrm(ks[14], (c,)),
        "dt_rank": dt_rank,
        "d_state": d_state,
        "d_conv": d_conv,
    }


def prepare_derived(p, c, h, w):
    """Fold / tile weights ONCE (outside the jitted hot path) so every kernel
    is lane-dense.  Folded-lane SSM layout: lane index j = s*d_inner + i."""
    d = c
    S = p["d_state"]
    dt_rank = p["dt_rank"]
    xw = p["x_proj_w"].astype(jnp.float32)
    # dt = softplus(u @ x_proj[:, :dt_rank] @ dt_proj + b): fold both linears.
    W_dt = xw[:, :dt_rank] @ p["dt_proj_w"].astype(jnp.float32)        # [d, d]
    A = -jnp.exp(p["A_log"].astype(jnp.float32))                       # [d, S]
    eye_d = jnp.eye(d, dtype=jnp.float32)
    eye_w = jnp.eye(w, dtype=jnp.float32)
    w_cat = jnp.concatenate([p["toMask_w"], p["in_proj_w"]], axis=1)   # [c, c+2d]
    return {
        # K1
        "w_cat": w_cat.astype(jnp.bfloat16),
        # K3
        "conv_w": p["conv1d_w"].astype(jnp.float32),
        "conv_b": p["conv1d_b"].reshape(1, d).astype(jnp.float32),
        "wdt_tiled": jnp.tile(W_dt, (1, S)).astype(jnp.bfloat16),      # [d, S*d]
        "bdt_tiled": jnp.tile(p["dt_proj_b"].reshape(1, d), (1, S)),
        "wb_rep": jnp.repeat(xw[:, dt_rank:dt_rank + S], d, axis=1).astype(jnp.bfloat16),
        "wc_rep": jnp.repeat(xw[:, dt_rank + S:dt_rank + 2 * S], d, axis=1).astype(jnp.bfloat16),
        "a_flat": A.T.reshape(1, S * d),
        "r_sum": jnp.tile(eye_d, (S, 1)).astype(jnp.bfloat16),         # [S*d, d]
        "d_row": p["D"].reshape(1, d).astype(jnp.float32),
        "norm_g": p["norm_g"].reshape(1, d).astype(jnp.float32),
        "out_proj_w": p["out_proj_w"].astype(jnp.bfloat16),
        "toOut_w": p["toOut_w"].astype(jnp.bfloat16),
        # K2: 1x1 convs as block-diag matmuls in [h, w*c] layout, depthwise
        # weights / biases tiled across the w pixels on the lane axis
        "mm_w1_bd": jnp.kron(eye_w, p["mm_conv1_w"]).astype(jnp.bfloat16),
        "mm_b1_t": jnp.tile(p["mm_conv1_b"].reshape(1, c), (1, w)).astype(jnp.float32),
        "mm_w2_bd": jnp.kron(eye_w, p["mm_conv2_w"]).astype(jnp.bfloat16),
        "mm_b2_t": jnp.tile(p["mm_conv2_b"].reshape(1, c), (1, w)).astype(jnp.float32),
        "dw_w_t": jnp.tile(p["mm_dw_w"], (1, w)).astype(jnp.float32),
        "dw_b_t": jnp.tile(p["mm_dw_b"].reshape(1, c), (1, w)).astype(jnp.float32),
    }


# ----------------------------------------------------------------------------
# Full forward
# ----------------------------------------------------------------------------
def _forward_impl(x, mask, dp):
    b, h, w, c = x.shape
    assert h == w, "patch_size is square (h == w) as in the PyTorch module"
    L = h * w
    d = c                                     # d_inner (expand = 1)

    # K1: toMask(+SiLU) + in_proj, one matmul, one lane-dense output slab
    x_flat = x.reshape(b * L, c).astype(jnp.float32)
    xz = fused_input_proj(x_flat, dp["w_cat"], c).reshape(b, L, c + 2 * d)

    # K2: MaskGuidedMechanism (1x1 convs + depthwise 5x5 + sigmoid gate)
    mask_rows = jnp.transpose(mask, (0, 2, 3, 1)).astype(jnp.float32)
    mask_rows = mask_rows.reshape(b, h, w * c)
    mgm = mgm_fused(mask_rows, dp["mm_w1_bd"], dp["mm_b1_t"], dp["mm_w2_bd"],
                    dp["mm_b2_t"], dp["dw_w_t"], dp["dw_b_t"], h, w, c)
    attn = shift_back_nhwc(mgm.reshape(b, h, w, c)).reshape(b, L, c)

    # K3: conv1d + selective scan + gate + RMSNorm + out_proj + combine + toOut
    # TODO(synk): bimamba_type='v6' multi-directional scan and if_devide_out of
    # the custom Mamba variant are not reproducible without its source; a single
    # forward selective scan (standard Mamba) is implemented here.
    out = mamba_fused(xz, attn, dp)                                 # [b, L, c]
    return out.reshape(b, h, w, c)


if __name__ == "__main__":
    b, hh, ww, c = 2, 8, 8, 16          # batch, patch_size, patch_size, dim
    key = jax.random.PRNGKey(0)
    kx, km, kp = jax.random.split(key, 3)
    x = jax.random.normal(kx, (b, hh, ww, c), jnp.float32)           # NHWC
    mask = jax.random.normal(km, (b, c, hh, ww), jnp.float32)        # NCHW
    params = init_params(kp, c)

    dp = prepare_derived(params, c, hh, ww)     # derived weights built ONCE
    fwd = jax.jit(_forward_impl)
    out = jax.block_until_ready(fwd(x, mask, dp))

    assert out.shape == (b, hh, ww, c)
    assert bool(jnp.all(jnp.isfinite(out)))
    print("KERNEL_OK")
</pallas_src>

<mosaic_0001>
module attributes {stable_mosaic.version = 11 : i64} {
  func.func @_mgm_kernel(%arg0: i32, %arg1: memref<1x8x128xf32, #tpu.memory_space<vmem>>, %arg2: memref<128x128xbf16, #tpu.memory_space<vmem>>, %arg3: memref<1x128xf32, #tpu.memory_space<vmem>>, %arg4: memref<128x128xbf16, #tpu.memory_space<vmem>>, %arg5: memref<1x128xf32, #tpu.memory_space<vmem>>, %arg6: memref<25x128xf32, #tpu.memory_space<vmem>>, %arg7: memref<1x128xf32, #tpu.memory_space<vmem>>, %arg8: memref<1x8x128xf32, #tpu.memory_space<vmem>>, %arg9: memref<24x288xf32, #tpu.memory_space<vmem>>) attributes {dimension_semantics = [#tpu.dimension_semantics<parallel>], iteration_bounds = array<i64: 2>, scalar_prefetch = 0 : i64, scratch_operands = 1 : i64, tpu.core_type = #tpu.core_type<tc>, window_params = [{transform_indices = @transform_0, window_bounds = array<i64: 1, 8, 128>}, {pipeline_mode = #tpu.pipeline_mode<synchronous>, transform_indices = @transform_1, window_bounds = array<i64: 128, 128>}, {pipeline_mode = #tpu.pipeline_mode<synchronous>, transform_indices = @transform_2, window_bounds = array<i64: 1, 128>}, {pipeline_mode = #tpu.pipeline_mode<synchronous>, transform_indices = @transform_3, window_bounds = array<i64: 128, 128>}, {pipeline_mode = #tpu.pipeline_mode<synchronous>, transform_indices = @transform_4, window_bounds = array<i64: 1, 128>}, {pipeline_mode = #tpu.pipeline_mode<synchronous>, transform_indices = @transform_5, window_bounds = array<i64: 25, 128>}, {pipeline_mode = #tpu.pipeline_mode<synchronous>, transform_indices = @transform_6, window_bounds = array<i64: 1, 128>}, {transform_indices = @transform_7, window_bounds = array<i64: 1, 8, 128>}]} {
    %c0 = arith.constant 0 : index
    %c0_0 = arith.constant 0 : index
    %c0_1 = arith.constant 0 : index
    %0 = vector.load %arg1[%c0, %c0_0, %c0_1] : memref<1x8x128xf32, #tpu.memory_space<vmem>>, vector<1x8x128xf32>
    %1 = vector.shape_cast %0 : vector<1x8x128xf32> to vector<8x128xf32>
    %2 = arith.truncf %1 : vector<8x128xf32> to vector<8x128xbf16>
    %c0_2 = arith.constant 0 : index
    %c0_3 = arith.constant 0 : index
    %3 = vector.load %arg2[%c0_2, %c0_3] : memref<128x128xbf16, #tpu.memory_space<vmem>>, vector<128x128xbf16>
    %cst = arith.constant dense<0.000000e+00> : vector<8x128xf32>
    %4 = tpu.matmul %2, %3, %cst {dimension_numbers = #tpu.dot_dimension_numbers<[1], [0], [0], [1], [0, 0, 1, 1], [], []>} : vector<8x128xbf16>, vector<128x128xbf16>, vector<8x128xf32> -> vector<8x128xf32>
    %c0_4 = arith.constant 0 : index
    %c0_5 = arith.constant 0 : index
    %5 = vector.load %arg3[%c0_4, %c0_5] : memref<1x128xf32, #tpu.memory_space<vmem>>, vector<1x128xf32>
    %6 = vector.broadcast %5 : vector<1x128xf32> to vector<8x128xf32>
    %7 = arith.addf %4, %6 : vector<8x128xf32>
    %8 = arith.truncf %7 : vector<8x128xf32> to vector<8x128xbf16>
    %c0_6 = arith.constant 0 : index
    %c0_7 = arith.constant 0 : index
    %9 = vector.load %arg4[%c0_6, %c0_7] : memref<128x128xbf16, #tpu.memory_space<vmem>>, vector<128x128xbf16>
    %cst_8 = arith.constant dense<0.000000e+00> : vector<8x128xf32>
    %10 = tpu.matmul %8, %9, %cst_8 {dimension_numbers = #tpu.dot_dimension_numbers<[1], [0], [0], [1], [0, 0, 1, 1], [], []>} : vector<8x128xbf16>, vector<128x128xbf16>, vector<8x128xf32> -> vector<8x128xf32>
    %c0_9 = arith.constant 0 : index
    %c0_10 = arith.constant 0 : index
    %11 = vector.load %arg5[%c0_9, %c0_10] : memref<1x128xf32, #tpu.memory_space<vmem>>, vector<1x128xf32>
    %12 = vector.broadcast %11 : vector<1x128xf32> to vector<8x128xf32>
    %13 = arith.addf %10, %12 : vector<8x128xf32>
    %cst_11 = arith.constant 0.000000e+00 : f32
    %14 = vector.broadcast %cst_11 : f32 to vector<24x288xf32>
    %c0_12 = arith.constant 0 : index
    %c0_13 = arith.constant 0 : index
    %15 = vector.load %arg9[%c0_12, %c0_13] : memref<24x288xf32, #tpu.memory_space<vmem>>, vector<24x288xf32>
    tpu.vector_store %arg9[%c0_12, %c0_13], %14 {strides = array<i32>} : memref<24x288xf32, #tpu.memory_space<vmem>>, vector<24x288xf32>,
    %c8 = arith.constant 8 : index
    %c128 = arith.constant 128 : index
    %16 = vector.load %arg9[%c8, %c128] : memref<24x288xf32, #tpu.memory_space<vmem>>, vector<8x128xf32>
    tpu.vector_store %arg9[%c8, %c128], %13 {strides = array<i32>} : memref<24x288xf32, #tpu.memory_space<vmem>>, vector<8x128xf32>,
    %c0_14 = arith.constant 0 : index
    %c0_15 = arith.constant 0 : index
    %17 = vector.load %arg6[%c0_14, %c0_15] : memref<25x128xf32, #tpu.memory_space<vmem>>, vector<25x128xf32>
    %cst_16 = arith.constant 0.000000e+00 : f32
    %18 = vector.broadcast %cst_16 : f32 to vector<8x128xf32>
    %c0_17 = arith.constant 0 : index
    %c0_18 = arith.constant 0 : index
    %19 = vector.load %arg7[%c0_17, %c0_18] : memref<1x128xf32, #tpu.memory_space<vmem>>, vector<1x128xf32>
    %20 = vector.broadcast %19 : vector<1x128xf32> to vector<8x128xf32>
    %21 = arith.addf %18, %20 : vector<8x128xf32>
    %c0_19 = arith.constant 0 : index
    %c96 = arith.constant 96 : index
    %22 = vector.load %arg9[%c0_19, %c96] : memref<24x288xf32, #tpu.memory_space<vmem>>, vector<24x128xf32>
    %23 = vector.extract_strided_slice %22 {offsets = [6, 0], sizes = [8, 128], strides = [1, 1]} : vector<24x128xf32> to vector<8x128xf32>
    %24 = vector.extract_strided_slice %17 {offsets = [0, 0], sizes = [1, 128], strides = [1, 1]} : vector<25x128xf32> to vector<1x128xf32>
    %25 = vector.broadcast %24 : vector<1x128xf32> to vector<8x128xf32>
    %26 = arith.mulf %23, %25 : vector<8x128xf32>
    %27 = arith.addf %21, %26 : vector<8x128xf32>
    %28 = vector.extract_strided_slice %22 {offsets = [7, 0], sizes = [8, 128], strides = [1, 1]} : vector<24x128xf32> to vector<8x128xf32>
    %29 = vector.extract_strided_slice %17 {offsets = [5, 0], sizes = [1, 128], strides = [1, 1]} : vector<25x128xf32> to vector<1x128xf32>
    %30 = vector.broadcast %29 : vector<1x128xf32> to vector<8x128xf32>
    %31 = arith.mulf %28, %30 : vector<8x128xf32>
    %32 = arith.addf %27, %31 : vector<8x128xf32>
    %33 = vector.extract_strided_slice %22 {offsets = [8, 0], sizes = [8, 128], strides = [1, 1]} : vector<24x128xf32> to vector<8x128xf32>
    %34 = vector.extract_strided_slice %17 {offsets = [10, 0], sizes = [1, 128], strides = [1, 1]} : vector<25x128xf32> to vector<1x128xf32>
    %35 = vector.broadcast %34 : vector<1x128xf32> to vector<8x128xf32>
    %36 = arith.mulf %33, %35 : vector<8x128xf32>
    %37 = arith.addf %32, %36 : vector<8x128xf32>
    %38 = vector.extract_strided_slice %22 {offsets = [9, 0], sizes = [8, 128], strides = [1, 1]} : vector<24x128xf32> to vector<8x128xf32>
    %39 = vector.extract_strided_slice %17 {offsets = [15, 0], sizes = [1, 128], strides = [1, 1]} : vector<25x128xf32> to vector<1x128xf32>
    %40 = vector.broadcast %39 : vector<1x128xf32> to vector<8x128xf32>
    %41 = arith.mulf %38, %40 : vector<8x128xf32>
    %42 = arith.addf %37, %41 : vector<8x128xf32>
    %43 = vector.extract_strided_slice %22 {offsets = [10, 0], sizes = [8, 128], strides = [1, 1]} : vector<24x128xf32> to vector<8x128xf32>
    %44 = vector.extract_strided_slice %17 {offsets = [20, 0], sizes = [1, 128], strides = [1, 1]} : vector<25x128xf32> to vector<1x128xf32>
    %45 = vector.broadcast %44 : vector<1x128xf32> to vector<8x128xf32>
    %46 = arith.mulf %43, %45 : vector<8x128xf32>
    %47 = arith.addf %42, %46 : vector<8x128xf32>
    %c0_20 = arith.constant 0 : index
    %c112 = arith.constant 112 : index
    %48 = vector.load %arg9[%c0_20, %c112] : memref<24x288xf32, #tpu.memory_space<vmem>>, vector<24x128xf32>
    %49 = vector.extract_strided_slice %48 {offsets = [6, 0], sizes = [8, 128], strides = [1, 1]} : vector<24x128xf32> to vector<8x128xf32>
    %50 = vector.extract_strided_slice %17 {offsets = [1, 0], sizes = [1, 128], strides = [1, 1]} : vector<25x128xf32> to vector<1x128xf32>
    %51 = vector.broadcast %50 : vector<1x128xf32> to vector<8x128xf32>
    %52 = arith.mulf %49, %51 : vector<8x128xf32>
    %53 = arith.addf %47, %52 : vector<8x128xf32>
    %54 = vector.extract_strided_slice %48 {offsets = [7, 0], sizes = [8, 128], strides = [1, 1]} : vector<24x128xf32> to vector<8x128xf32>
    %55 = vector.extract_strided_slice %17 {offsets = [6, 0], sizes = [1, 128], strides = [1, 1]} : vector<25x128xf32> to vector<1x128xf32>
    %56 = vector.broadcast %55 : vector<1x128xf32> to vector<8x128xf32>
    %57 = arith.mulf %54, %56 : vector<8x128xf32>
    %58 = arith.addf %53, %57 : vector<8x128xf32>
    %59 = vector.extract_strided_slice %48 {offsets = [8, 0], sizes = [8, 128], strides = [1, 1]} : vector<24x128xf32> to vector<8x128xf32>
    %60 = vector.extract_strided_slice %17 {offsets = [11, 0], sizes = [1, 128], strides = [1, 1]} : vector<25x128xf32> to vector<1x128xf32>
    %61 = vector.broadcast %60 : vector<1x128xf32> to vector<8x128xf32>
    %62 = arith.mulf %59, %61 : vector<8x128xf32>
    %63 = arith.addf %58, %62 : vector<8x128xf32>
    %64 = vector.extract_strided_slice %48 {offsets = [9, 0], sizes = [8, 128], strides = [1, 1]} : vector<24x128xf32> to vector<8x128xf32>
    %65 = vector.extract_strided_slice %17 {offsets = [16, 0], sizes = [1, 128], strides = [1, 1]} : vector<25x128xf32> to vector<1x128xf32>
    %66 = vector.broadcast %65 : vector<1x128xf32> to vector<8x128xf32>
    %67 = arith.mulf %64, %66 : vector<8x128xf32>
    %68 = arith.addf %63, %67 : vector<8x128xf32>
    %69 = vector.extract_strided_slice %48 {offsets = [10, 0], sizes = [8, 128], strides = [1, 1]} : vector<24x128xf32> to vector<8x128xf32>
    %70 = vector.extract_strided_slice %17 {offsets = [21, 0], sizes = [1, 128], strides = [1, 1]} : vector<25x128xf32> to vector<1x128xf32>
    %71 = vector.broadcast %70 : vector<1x128xf32> to vector<8x128xf32>
    %72 = arith.mulf %69, %71 : vector<8x128xf32>
    %73 = arith.addf %68, %72 : vector<8x128xf32>
    %c0_21 = arith.constant 0 : index
    %c128_22 = arith.constant 128 : index
    %74 = vector.load %arg9[%c0_21, %c128_22] : memref<24x288xf32, #tpu.memory_space<vmem>>, vector<24x128xf32>
    %75 = vector.extract_strided_slice %74 {offsets = [6, 0], sizes = [8, 128], strides = [1, 1]} : vector<24x128xf32> to vector<8x128xf32>
    %76 = vector.extract_strided_slice %17 {offsets = [2, 0], sizes = [1, 128], strides = [1, 1]} : vector<25x128xf32> to vector<1x128xf32>
    %77 = vector.broadcast %76 : vector<1x128xf32> to vector<8x128xf32>
    %78 = arith.mulf %75, %77 : vector<8x128xf32>
    %79 = arith.addf %73, %78 : vector<8x128xf32>
    %80 = vector.extract_strided_slice %74 {offsets = [7, 0], sizes = [8, 128], strides = [1, 1]} : vector<24x128xf32> to vector<8x128xf32>
    %81 = vector.extract_strided_slice %17 {offsets = [7, 0], sizes = [1, 128], strides = [1, 1]} : vector<25x128xf32> to vector<1x128xf32>
    %82 = vector.broadcast %81 : vector<1x128xf32> to vector<8x128xf32>
    %83 = arith.mulf %80, %82 : vector<8x128xf32>
    %84 = arith.addf %79, %83 : vector<8x128xf32>
    %85 = vector.extract_strided_slice %74 {offsets = [8, 0], sizes = [8, 128], strides = [1, 1]} : vector<24x128xf32> to vector<8x128xf32>
    %86 = vector.extract_strided_slice %17 {offsets = [12, 0], sizes = [1, 128], strides = [1, 1]} : vector<25x128xf32> to vector<1x128xf32>
    %87 = vector.broadcast %86 : vector<1x128xf32> to vector<8x128xf32>
    %88 = arith.mulf %85, %87 : vector<8x128xf32>
    %89 = arith.addf %84, %88 : vector<8x128xf32>
    %90 = vector.extract_strided_slice %74 {offsets = [9, 0], sizes = [8, 128], strides = [1, 1]} : vector<24x128xf32> to vector<8x128xf32>
    %91 = vector.extract_strided_slice %17 {offsets = [17, 0], sizes = [1, 128], strides = [1, 1]} : vector<25x128xf32> to vector<1x128xf32>
    %92 = vector.broadcast %91 : vector<1x128xf32> to vector<8x128xf32>
    %93 = arith.mulf %90, %92 : vector<8x128xf32>
    %94 = arith.addf %89, %93 : vector<8x128xf32>
    %95 = vector.extract_strided_slice %74 {offsets = [10, 0], sizes = [8, 128], strides = [1, 1]} : vector<24x128xf32> to vector<8x128xf32>
    %96 = vector.extract_strided_slice %17 {offsets = [22, 0], sizes = [1, 128], strides = [1, 1]} : vector<25x128xf32> to vector<1x128xf32>
    %97 = vector.broadcast %96 : vector<1x128xf32> to vector<8x128xf32>
    %98 = arith.mulf %95, %97 : vector<8x128xf32>
    %99 = arith.addf %94, %98 : vector<8x128xf32>
    %c0_23 = arith.constant 0 : index
    %c144 = arith.constant 144 : index
    %100 = vector.load %arg9[%c0_23, %c144] : memref<24x288xf32, #tpu.memory_space<vmem>>, vector<24x128xf32>
    %101 = vector.extract_strided_slice %100 {offsets = [6, 0], sizes = [8, 128], strides = [1, 1]} : vector<24x128xf32> to vector<8x128xf32>
    %102 = vector.extract_strided_slice %17 {offsets = [3, 0], sizes = [1, 128], strides = [1, 1]} : vector<25x128xf32> to vector<1x128xf32>
    %103 = vector.broadcast %102 : vector<1x128xf32> to vector<8x128xf32>
    %104 = arith.mulf %101, %103 : vector<8x128xf32>
    %105 = arith.addf %99, %104 : vector<8x128xf32>
    %106 = vector.extract_strided_slice %100 {offsets = [7, 0], sizes = [8, 128], strides = [1, 1]} : vector<24x128xf32> to vector<8x128xf32>
    %107 = vector.extract_strided_slice %17 {offsets = [8, 0], sizes = [1, 128], strides = [1, 1]} : vector<25x128xf32> to vector<1x128xf32>
    %108 = vector.broadcast %107 : vector<1x128xf32> to vector<8x128xf32>
    %109 = arith.mulf %106, %108 : vector<8x128xf32>
    %110 = arith.addf %105, %109 : vector<8x128xf32>
    %111 = vector.extract_strided_slice %100 {offsets = [8, 0], sizes = [8, 128], strides = [1, 1]} : vector<24x128xf32> to vector<8x128xf32>
    %112 = vector.extract_strided_slice %17 {offsets = [13, 0], sizes = [1, 128], strides = [1, 1]} : vector<25x128xf32> to vector<1x128xf32>
    %113 = vector.broadcast %112 : vector<1x128xf32> to vector<8x128xf32>
    %114 = arith.mulf %111, %113 : vector<8x128xf32>
    %115 = arith.addf %110, %114 : vector<8x128xf32>
    %116 = vector.extract_strided_slice %100 {offsets = [9, 0], sizes = [8, 128], strides = [1, 1]} : vector<24x128xf32> to vector<8x128xf32>
    %117 = vector.extract_strided_slice %17 {offsets = [18, 0], sizes = [1, 128], strides = [1, 1]} : vector<25x128xf32> to vector<1x128xf32>
    %118 = vector.broadcast %117 : vector<1x128xf32> to vector<8x128xf32>
    %119 = arith.mulf %116, %118 : vector<8x128xf32>
    %120 = arith.addf %115, %119 : vector<8x128xf32>
    %121 = vector.extract_strided_slice %100 {offsets = [10, 0], sizes = [8, 128], strides = [1, 1]} : vector<24x128xf32> to vector<8x128xf32>
    %122 = vector.extract_strided_slice %17 {offsets = [23, 0], sizes = [1, 128], strides = [1, 1]} : vector<25x128xf32> to vector<1x128xf32>
    %123 = vector.broadcast %122 : vector<1x128xf32> to vector<8x128xf32>
    %124 = arith.mulf %121, %123 : vector<8x128xf32>
    %125 = arith.addf %120, %124 : vector<8x128xf32>
    %c0_24 = arith.constant 0 : index
    %c160 = arith.constant 160 : index
    %126 = vector.load %arg9[%c0_24, %c160] : memref<24x288xf32, #tpu.memory_space<vmem>>, vector<24x128xf32>
    %127 = vector.extract_strided_slice %126 {offsets = [6, 0], sizes = [8, 128], strides = [1, 1]} : vector<24x128xf32> to vector<8x128xf32>
    %128 = vector.extract_strided_slice %17 {offsets = [4, 0], sizes = [1, 128], strides = [1, 1]} : vector<25x128xf32> to vector<1x128xf32>
    %129 = vector.broadcast %128 : vector<1x128xf32> to vector<8x128xf32>
    %130 = arith.mulf %127, %129 : vector<8x128xf32>
    %131 = arith.addf %125, %130 : vector<8x128xf32>
    %132 = vector.extract_strided_slice %126 {offsets = [7, 0], sizes = [8, 128], strides = [1, 1]} : vector<24x128xf32> to vector<8x128xf32>
    %133 = vector.extract_strided_slice %17 {offsets = [9, 0], sizes = [1, 128], strides = [1, 1]} : vector<25x128xf32> to vector<1x128xf32>
    %134 = vector.broadcast %133 : vector<1x128xf32> to vector<8x128xf32>
    %135 = arith.mulf %132, %134 : vector<8x128xf32>
    %136 = arith.addf %131, %135 : vector<8x128xf32>
    %137 = vector.extract_strided_slice %126 {offsets = [8, 0], sizes = [8, 128], strides = [1, 1]} : vector<24x128xf32> to vector<8x128xf32>
    %138 = vector.extract_strided_slice %17 {offsets = [14, 0], sizes = [1, 128], strides = [1, 1]} : vector<25x128xf32> to vector<1x128xf32>
    %139 = vector.broadcast %138 : vector<1x128xf32> to vector<8x128xf32>
    %140 = arith.mulf %137, %139 : vector<8x128xf32>
    %141 = arith.addf %136, %140 : vector<8x128xf32>
    %142 = vector.extract_strided_slice %126 {offsets = [9, 0], sizes = [8, 128], strides = [1, 1]} : vector<24x128xf32> to vector<8x128xf32>
    %143 = vector.extract_strided_slice %17 {offsets = [19, 0], sizes = [1, 128], strides = [1, 1]} : vector<25x128xf32> to vector<1x128xf32>
    %144 = vector.broadcast %143 : vector<1x128xf32> to vector<8x128xf32>
    %145 = arith.mulf %142, %144 : vector<8x128xf32>
    %146 = arith.addf %141, %145 : vector<8x128xf32>
    %147 = vector.extract_strided_slice %126 {offsets = [10, 0], sizes = [8, 128], strides = [1, 1]} : vector<24x128xf32> to vector<8x128xf32>
    %148 = vector.extract_strided_slice %17 {offsets = [24, 0], sizes = [1, 128], strides = [1, 1]} : vector<25x128xf32> to vector<1x128xf32>
    %149 = vector.broadcast %148 : vector<1x128xf32> to vector<8x128xf32>
    %150 = arith.mulf %147, %149 : vector<8x128xf32>
    %151 = arith.addf %146, %150 : vector<8x128xf32>
    %152 = arith.negf %151 : vector<8x128xf32>
    %153 = math.exp %152 : vector<8x128xf32>
    %cst_25 = arith.constant 1.000000e+00 : f32
    %154 = vector.broadcast %cst_25 : f32 to vector<8x128xf32>
    %155 = arith.addf %154, %153 : vector<8x128xf32>
    %156 = arith.divf %154, %155 : vector<8x128xf32>
    %157 = arith.mulf %7, %156 : vector<8x128xf32>
    %158 = arith.addf %157, %7 : vector<8x128xf32>
    %c0_26 = arith.constant 0 : index
    %c0_27 = arith.constant 0 : index
    %c0_28 = arith.constant 0 : index
    %159 = vector.load %arg8[%c0_26, %c0_27, %c0_28] : memref<1x8x128xf32, #tpu.memory_space<vmem>>, vector<1x8x128xf32>
    %160 = vector.shape_cast %159 : vector<1x8x128xf32> to vector<8x128xf32>
    %161 = vector.shape_cast %158 : vector<8x128xf32> to vector<1x8x128xf32>
    tpu.vector_store %arg8[%c0_26, %c0_27, %c0_28], %161 {strides = array<i32>} : memref<1x8x128xf32, #tpu.memory_space<vmem>>, vector<1x8x128xf32>,
    return
  }
  func.func @transform_0(%arg0: i32) -> (i32, i32, i32) {
    %c0_i32 = arith.constant 0 : i32
    %c0_i32_0 = arith.constant 0 : i32
    %c0_i32_1 = arith.constant 0 : i32
    return %arg0, %c0_i32, %c0_i32_0 : i32, i32, i32
  }
  func.func @transform_1(%arg0: i32) -> (i32, i32) {
    %c0_i32 = arith.constant 0 : i32
    %c0_i32_0 = arith.constant 0 : i32
    %c0_i32_1 = arith.constant 0 : i32
    return %c0_i32, %c0_i32_0 : i32, i32
  }
  func.func @transform_2(%arg0: i32) -> (i32, i32) {
    %c0_i32 = arith.constant 0 : i32
    %c0_i32_0 = arith.constant 0 : i32
    %c0_i32_1 = arith.constant 0 : i32
    return %c0_i32, %c0_i32_0 : i32, i32
  }
  func.func @transform_3(%arg0: i32) -> (i32, i32) {
    %c0_i32 = arith.constant 0 : i32
    %c0_i32_0 = arith.constant 0 : i32
    %c0_i32_1 = arith.constant 0 : i32
    return %c0_i32, %c0_i32_0 : i32, i32
  }
  func.func @transform_4(%arg0: i32) -> (i32, i32) {
    %c0_i32 = arith.constant 0 : i32
    %c0_i32_0 = arith.constant 0 : i32
    %c0_i32_1 = arith.constant 0 : i32
    return %c0_i32, %c0_i32_0 : i32, i32
  }
  func.func @transform_5(%arg0: i32) -> (i32, i32) {
    %c0_i32 = arith.constant 0 : i32
    %c0_i32_0 = arith.constant 0 : i32
    %c0_i32_1 = arith.constant 0 : i32
    return %c0_i32, %c0_i32_0 : i32, i32
  }
  func.func @transform_6(%arg0: i32) -> (i32, i32) {
    %c0_i32 = arith.constant 0 : i32
    %c0_i32_0 = arith.constant 0 : i32
    %c0_i32_1 = arith.constant 0 : i32
    return %c0_i32, %c0_i32_0 : i32, i32
  }
  func.func @transform_7(%arg0: i32) -> (i32, i32, i32) {
    %c0_i32 = arith.constant 0 : i32
    %c0_i32_0 = arith.constant 0 : i32
    %c0_i32_1 = arith.constant 0 : i32
    return %arg0, %c0_i32, %c0_i32_0 : i32, i32, i32
  }
}

module attributes {stable_mosaic.version = 11 : i64} {
  func.func @_inproj_kernel(%arg0: i32, %arg1: memref<64x16xf32, #tpu.memory_space<vmem>>, %arg2: memref<16x48xbf16, #tpu.memory_space<vmem>>, %arg3: memref<64x48xf32, #tpu.memory_space<vmem>>) attributes {dimension_semantics = [#tpu.dimension_semantics<parallel>], iteration_bounds = array<i64: 2>, scalar_prefetch = 0 : i64, scratch_operands = 0 : i64, tpu.core_type = #tpu.core_type<tc>, window_params = [{transform_indices = @transform_0, window_bounds = array<i64: 64, 16>}, {pipeline_mode = #tpu.pipeline_mode<synchronous>, transform_indices = @transform_1, window_bounds = array<i64: 16, 48>}, {transform_indices = @transform_2, window_bounds = array<i64: 64, 48>}]} {
    %c0 = arith.constant 0 : index
    %c0_0 = arith.constant 0 : index
    %0 = vector.load %arg1[%c0, %c0_0] : memref<64x16xf32, #tpu.memory_space<vmem>>, vector<64x16xf32>
    %1 = arith.truncf %0 : vector<64x16xf32> to vector<64x16xbf16>
    %c0_1 = arith.constant 0 : index
    %c0_2 = arith.constant 0 : index
    %2 = vector.load %arg2[%c0_1, %c0_2] : memref<16x48xbf16, #tpu.memory_space<vmem>>, vector<16x48xbf16>
    %cst = arith.constant dense<0.000000e+00> : vector<64x48xf32>
    %3 = tpu.matmul %1, %2, %cst {dimension_numbers = #tpu.dot_dimension_numbers<[1], [0], [0], [1], [0, 0, 1, 1], [], []>} : vector<64x16xbf16>, vector<16x48xbf16>, vector<64x48xf32> -> vector<64x48xf32>
    %4 = tpu.iota {dimensions = array<i32: 1>} : vector<64x48xi32>
    %c16_i32 = arith.constant 16 : i32
    %5 = vector.broadcast %c16_i32 : i32 to vector<64x48xi32>
    %6 = arith.cmpi slt, %4, %5 : vector<64x48xi32>
    %7 = arith.negf %3 : vector<64x48xf32>
    %8 = math.exp %7 : vector<64x48xf32>
    %cst_3 = arith.constant 1.000000e+00 : f32
    %9 = vector.broadcast %cst_3 : f32 to vector<64x48xf32>
    %10 = arith.addf %9, %8 : vector<64x48xf32>
    %11 = arith.divf %9, %10 : vector<64x48xf32>
    %12 = arith.mulf %3, %11 : vector<64x48xf32>
    %13 = arith.select %6, %12, %3 : vector<64x48xi1>, vector<64x48xf32>
    %c0_4 = arith.constant 0 : index
    %c0_5 = arith.constant 0 : index
    %14 = vector.load %arg3[%c0_4, %c0_5] : memref<64x48xf32, #tpu.memory_space<vmem>>, vector<64x48xf32>
    tpu.vector_store %arg3[%c0_4, %c0_5], %13 {strides = array<i32>} : memref<64x48xf32, #tpu.memory_space<vmem>>, vector<64x48xf32>,
    return
  }
  func.func @transform_0(%arg0: i32) -> (i32, i32) {
    %c0_i32 = arith.constant 0 : i32
    %c0_i32_0 = arith.constant 0 : i32
    return %arg0, %c0_i32 : i32, i32
  }
  func.func @transform_1(%arg0: i32) -> (i32, i32) {
    %c0_i32 = arith.constant 0 : i32
    %c0_i32_0 = arith.constant 0 : i32
    %c0_i32_1 = arith.constant 0 : i32
    return %c0_i32, %c0_i32_0 : i32, i32
  }
  func.func @transform_2(%arg0: i32) -> (i32, i32) {
    %c0_i32 = arith.constant 0 : i32
    %c0_i32_0 = arith.constant 0 : i32
    return %arg0, %c0_i32 : i32, i32
  }
}

module attributes {stable_mosaic.version = 11 : i64} {
  func.func @_mamba_kernel(%arg0: i32, %arg1: memref<1x64x48xf32, #tpu.memory_space<vmem>>, %arg2: memref<1x64x16xf32, #tpu.memory_space<vmem>>, %arg3: memref<4x16xf32, #tpu.memory_space<vmem>>, %arg4: memref<1x16xf32, #tpu.memory_space<vmem>>, %arg5: memref<16x128xbf16, #tpu.memory_space<vmem>>, %arg6: memref<1x128xf32, #tpu.memory_space<vmem>>, %arg7: memref<16x128xbf16, #tpu.memory_space<vmem>>, %arg8: memref<16x128xbf16, #tpu.memory_space<vmem>>, %arg9: memref<1x128xf32, #tpu.memory_space<vmem>>, %arg10: memref<128x16xbf16, #tpu.memory_space<vmem>>, %arg11: memref<1x16xf32, #tpu.memory_space<vmem>>, %arg12: memref<1x16xf32, #tpu.memory_space<vmem>>, %arg13: memref<16x16xbf16, #tpu.memory_space<vmem>>, %arg14: memref<16x16xbf16, #tpu.memory_space<vmem>>, %arg15: memref<1x64x16xf32, #tpu.memory_space<vmem>>, %arg16: memref<72x16xf32, #tpu.memory_space<vmem>>, %arg17: memref<64x128xf32, #tpu.memory_space<vmem>>) attributes {dimension_semantics = [#tpu.dimension_semantics<parallel>], iteration_bounds = array<i64: 2>, scalar_prefetch = 0 : i64, scratch_operands = 2 : i64, tpu.core_type = #tpu.core_type<tc>, window_params = [{transform_indices = @transform_0, window_bounds = array<i64: 1, 64, 48>}, {transform_indices = @transform_1, window_bounds = array<i64: 1, 64, 16>}, {pipeline_mode = #tpu.pipeline_mode<synchronous>, transform_indices = @transform_2, window_bounds = array<i64: 4, 16>}, {pipeline_mode = #tpu.pipeline_mode<synchronous>, transform_indices = @transform_3, window_bounds = array<i64: 1, 16>}, {pipeline_mode = #tpu.pipeline_mode<synchronous>, transform_indices = @transform_4, window_bounds = array<i64: 16, 128>}, {pipeline_mode = #tpu.pipeline_mode<synchronous>, transform_indices = @transform_5, window_bounds = array<i64: 1, 128>}, {pipeline_mode = #tpu.pipeline_mode<synchronous>, transform_indices = @transform_6, window_bounds = array<i64: 16, 128>}, {pipeline_mode = #tpu.pipeline_mode<synchronous>, transform_indices = @transform_7, window_bounds = array<i64: 16, 128>}, {pipeline_mode = #tpu.pipeline_mode<synchronous>, transform_indices = @transform_8, window_bounds = array<i64: 1, 128>}, {pipeline_mode = #tpu.pipeline_mode<synchronous>, transform_indices = @transform_9, window_bounds = array<i64: 128, 16>}, {pipeline_mode = #tpu.pipeline_mode<synchronous>, transform_indices = @transform_10, window_bounds = array<i64: 1, 16>}, {pipeline_mode = #tpu.pipeline_mode<synchronous>, transform_indices = @transform_11, window_bounds = array<i64: 1, 16>}, {pipeline_mode = #tpu.pipeline_mode<synchronous>, transform_indices = @transform_12, window_bounds = array<i64: 16, 16>}, {pipeline_mode = #tpu.pipeline_mode<synchronous>, transform_indices = @transform_13, window_bounds = array<i64: 16, 16>}, {transform_indices = @transform_14, window_bounds = array<i64: 1, 64, 16>}]} {
    %c0 = arith.constant 0 : index
    %c0_0 = arith.constant 0 : index
    %c0_1 = arith.constant 0 : index
    %0 = vector.load %arg1[%c0, %c0_0, %c0_1] : memref<1x64x48xf32, #tpu.memory_space<vmem>>, vector<1x64x48xf32>
    %1 = vector.shape_cast %0 : vector<1x64x48xf32> to vector<64x48xf32>
    %2 = vector.extract_strided_slice %1 {offsets = [0, 0], sizes = [64, 16], strides = [1, 1]} : vector<64x48xf32> to vector<64x16xf32>
    %3 = vector.extract_strided_slice %1 {offsets = [0, 16], sizes = [64, 16], strides = [1, 1]} : vector<64x48xf32> to vector<64x16xf32>
    %4 = vector.extract_strided_slice %1 {offsets = [0, 32], sizes = [64, 16], strides = [1, 1]} : vector<64x48xf32> to vector<64x16xf32>
    %cst = arith.constant 0.000000e+00 : f32
    %5 = vector.broadcast %cst : f32 to vector<8x16xf32>
    %c0_2 = arith.constant 0 : index
    %c0_3 = arith.constant 0 : index
    %6 = vector.load %arg16[%c0_2, %c0_3] : memref<72x16xf32, #tpu.memory_space<vmem>>, vector<8x16xf32>
    tpu.vector_store %arg16[%c0_2, %c0_3], %5 {strides = array<i32>} : memref<72x16xf32, #tpu.memory_space<vmem>>, vector<8x16xf32>,
    %c8 = arith.constant 8 : index
    %c0_4 = arith.constant 0 : index
    %7 = vector.load %arg16[%c8, %c0_4] : memref<72x16xf32, #tpu.memory_space<vmem>>, vector<64x16xf32>
    tpu.vector_store %arg16[%c8, %c0_4], %3 {strides = array<i32>} : memref<72x16xf32, #tpu.memory_space<vmem>>, vector<64x16xf32>,
    %c0_5 = arith.constant 0 : index
    %c0_6 = arith.constant 0 : index
    %8 = vector.load %arg3[%c0_5, %c0_6] : memref<4x16xf32, #tpu.memory_space<vmem>>, vector<4x16xf32>
    %cst_7 = arith.constant 0.000000e+00 : f32
    %9 = vector.broadcast %cst_7 : f32 to vector<64x16xf32>
    %c0_8 = arith.constant 0 : index
    %c0_9 = arith.constant 0 : index
    %10 = vector.load %arg4[%c0_8, %c0_9] : memref<1x16xf32, #tpu.memory_space<vmem>>, vector<1x16xf32>
    %11 = vector.broadcast %10 : vector<1x16xf32> to vector<64x16xf32>
    %12 = arith.addf %9, %11 : vector<64x16xf32>
    %c5 = arith.constant 5 : index
    %c0_10 = arith.constant 0 : index
    %13 = vector.load %arg16[%c5, %c0_10] : memref<72x16xf32, #tpu.memory_space<vmem>>, vector<64x16xf32>
    %14 = vector.extract_strided_slice %8 {offsets = [0, 0], sizes = [1, 16], strides = [1, 1]} : vector<4x16xf32> to vector<1x16xf32>
    %15 = vector.broadcast %14 : vector<1x16xf32> to vector<64x16xf32>
    %16 = arith.mulf %13, %15 : vector<64x16xf32>
    %17 = arith.addf %12, %16 : vector<64x16xf32>
    %c6 = arith.constant 6 : index
    %c0_11 = arith.constant 0 : index
    %18 = vector.load %arg16[%c6, %c0_11] : memref<72x16xf32, #tpu.memory_space<vmem>>, vector<64x16xf32>
    %19 = vector.extract_strided_slice %8 {offsets = [1, 0], sizes = [1, 16], strides = [1, 1]} : vector<4x16xf32> to vector<1x16xf32>
    %20 = vector.broadcast %19 : vector<1x16xf32> to vector<64x16xf32>
    %21 = arith.mulf %18, %20 : vector<64x16xf32>
    %22 = arith.addf %17, %21 : vector<64x16xf32>
    %c7 = arith.constant 7 : index
    %c0_12 = arith.constant 0 : index
    %23 = vector.load %arg16[%c7, %c0_12] : memref<72x16xf32, #tpu.memory_space<vmem>>, vector<64x16xf32>
    %24 = vector.extract_strided_slice %8 {offsets = [2, 0], sizes = [1, 16], strides = [1, 1]} : vector<4x16xf32> to vector<1x16xf32>
    %25 = vector.broadcast %24 : vector<1x16xf32> to vector<64x16xf32>
    %26 = arith.mulf %23, %25 : vector<64x16xf32>
    %27 = arith.addf %22, %26 : vector<64x16xf32>
    %c8_13 = arith.constant 8 : index
    %c0_14 = arith.constant 0 : index
    %28 = vector.load %arg16[%c8_13, %c0_14] : memref<72x16xf32, #tpu.memory_space<vmem>>, vector<64x16xf32>
    %29 = vector.extract_strided_slice %8 {offsets = [3, 0], sizes = [1, 16], strides = [1, 1]} : vector<4x16xf32> to vector<1x16xf32>
    %30 = vector.broadcast %29 : vector<1x16xf32> to vector<64x16xf32>
    %31 = arith.mulf %28, %30 : vector<64x16xf32>
    %32 = arith.addf %27, %31 : vector<64x16xf32>
    %33 = arith.negf %32 : vector<64x16xf32>
    %34 = math.exp %33 : vector<64x16xf32>
    %cst_15 = arith.constant 1.000000e+00 : f32
    %35 = vector.broadcast %cst_15 : f32 to vector<64x16xf32>
    %36 = arith.addf %35, %34 : vector<64x16xf32>
    %37 = arith.divf %35, %36 : vector<64x16xf32>
    %38 = arith.mulf %32, %37 : vector<64x16xf32>
    %39 = arith.truncf %38 : vector<64x16xf32> to vector<64x16xbf16>
    %c0_16 = arith.constant 0 : index
    %c0_17 = arith.constant 0 : index
    %40 = vector.load %arg5[%c0_16, %c0_17] : memref<16x128xbf16, #tpu.memory_space<vmem>>, vector<16x128xbf16>
    %cst_18 = arith.constant dense<0.000000e+00> : vector<64x128xf32>
    %41 = tpu.matmul %39, %40, %cst_18 {dimension_numbers = #tpu.dot_dimension_numbers<[1], [0], [0], [1], [0, 0, 1, 1], [], []>} : vector<64x16xbf16>, vector<16x128xbf16>, vector<64x128xf32> -> vector<64x128xf32>
    %c0_19 = arith.constant 0 : index
    %c0_20 = arith.constant 0 : index
    %42 = vector.load %arg6[%c0_19, %c0_20] : memref<1x128xf32, #tpu.memory_space<vmem>>, vector<1x128xf32>
    %43 = vector.broadcast %42 : vector<1x128xf32> to vector<64x128xf32>
    %44 = arith.addf %41, %43 : vector<64x128xf32>
    %cst_21 = arith.constant 0.000000e+00 : f32
    %45 = vector.broadcast %cst_21 : f32 to vector<64x128xf32>
    %46 = arith.maximumf %44, %45 : vector<64x128xf32>
    %47 = math.absf %44 : vector<64x128xf32>
    %cst_22 = arith.constant 0.000000e+00 : f32
    %48 = vector.broadcast %cst_22 : f32 to vector<64x128xf32>
    %49 = arith.subf %48, %47 : vector<64x128xf32>
    %50 = math.exp %49 : vector<64x128xf32>
    %51 = math.log1p %50 : vector<64x128xf32>
    %52 = arith.addf %46, %51 : vector<64x128xf32>
    %c0_23 = arith.constant 0 : index
    %c0_24 = arith.constant 0 : index
    %53 = vector.load %arg7[%c0_23, %c0_24] : memref<16x128xbf16, #tpu.memory_space<vmem>>, vector<16x128xbf16>
    %cst_25 = arith.constant dense<0.000000e+00> : vector<64x128xf32>
    %54 = tpu.matmul %39, %53, %cst_25 {dimension_numbers = #tpu.dot_dimension_numbers<[1], [0], [0], [1], [0, 0, 1, 1], [], []>} : vector<64x16xbf16>, vector<16x128xbf16>, vector<64x128xf32> -> vector<64x128xf32>
    %c0_26 = arith.constant 0 : index
    %c0_27 = arith.constant 0 : index
    %55 = vector.load %arg8[%c0_26, %c0_27] : memref<16x128xbf16, #tpu.memory_space<vmem>>, vector<16x128xbf16>
    %cst_28 = arith.constant dense<0.000000e+00> : vector<64x128xf32>
    %56 = tpu.matmul %39, %55, %cst_28 {dimension_numbers = #tpu.dot_dimension_numbers<[1], [0], [0], [1], [0, 0, 1, 1], [], []>} : vector<64x16xbf16>, vector<16x128xbf16>, vector<64x128xf32> -> vector<64x128xf32>
    %57 = tpu.concatenate %38, %38, %38, %38, %38, %38, %38, %38 in 1 : vector<64x16xf32>, vector<64x16xf32>, vector<64x16xf32>, vector<64x16xf32>, vector<64x16xf32>, vector<64x16xf32>, vector<64x16xf32>, vector<64x16xf32> -> vector<64x128xf32>
    %c0_29 = arith.constant 0 : index
    %c0_30 = arith.constant 0 : index
    %58 = vector.load %arg9[%c0_29, %c0_30] : memref<1x128xf32, #tpu.memory_space<vmem>>, vector<1x128xf32>
    %59 = vector.broadcast %58 : vector<1x128xf32> to vector<64x128xf32>
    %60 = arith.mulf %52, %59 : vector<64x128xf32>
    %61 = math.exp %60 : vector<64x128xf32>
    %62 = arith.mulf %52, %57 : vector<64x128xf32>
    %63 = arith.mulf %62, %54 : vector<64x128xf32>
    %cst_31 = arith.constant 0.000000e+00 : f32
    %64 = vector.broadcast %cst_31 : f32 to vector<1x128xf32>
    %65 = vector.extract_strided_slice %61 {offsets = [0, 0], sizes = [8, 128], strides = [1, 1]} : vector<64x128xf32> to vector<8x128xf32>
    %66 = vector.extract_strided_slice %63 {offsets = [0, 0], sizes = [8, 128], strides = [1, 1]} : vector<64x128xf32> to vector<8x128xf32>
    %cst_32 = arith.constant 1.000000e+00 : f32
    %67 = vector.broadcast %cst_32 : f32 to vector<1x128xf32>
    %68 = vector.extract_strided_slice %65 {offsets = [0, 0], sizes = [7, 128], strides = [1, 1]} : vector<8x128xf32> to vector<7x128xf32>
    %69 = tpu.concatenate %67, %68 in 0 : vector<1x128xf32>, vector<7x128xf32> -> vector<8x128xf32>
    %cst_33 = arith.constant 0.000000e+00 : f32
    %70 = vector.broadcast %cst_33 : f32 to vector<1x128xf32>
    %71 = vector.extract_strided_slice %66 {offsets = [0, 0], sizes = [7, 128], strides = [1, 1]} : vector<8x128xf32> to vector<7x128xf32>
    %72 = tpu.concatenate %70, %71 in 0 : vector<1x128xf32>, vector<7x128xf32> -> vector<8x128xf32>
    %73 = arith.mulf %65, %72 : vector<8x128xf32>
    %74 = arith.addf %73, %66 : vector<8x128xf32>
    %75 = arith.mulf %65, %69 : vector<8x128xf32>
    %cst_34 = arith.constant 1.000000e+00 : f32
    %76 = vector.broadcast %cst_34 : f32 to vector<2x128xf32>
    %77 = vector.extract_strided_slice %75 {offsets = [0, 0], sizes = [6, 128], strides = [1, 1]} : vector<8x128xf32> to vector<6x128xf32>
    %78 = tpu.concatenate %76, %77 in 0 : vector<2x128xf32>, vector<6x128xf32> -> vector<8x128xf32>
    %cst_35 = arith.constant 0.000000e+00 : f32
    %79 = vector.broadcast %cst_35 : f32 to vector<2x128xf32>
    %80 = vector.extract_strided_slice %74 {offsets = [0, 0], sizes = [6, 128], strides = [1, 1]} : vector<8x128xf32> to vector<6x128xf32>
    %81 = tpu.concatenate %79, %80 in 0 : vector<2x128xf32>, vector<6x128xf32> -> vector<8x128xf32>
    %82 = arith.mulf %75, %81 : vector<8x128xf32>
    %83 = arith.addf %82, %74 : vector<8x128xf32>
    %84 = arith.mulf %75, %78 : vector<8x128xf32>
    %cst_36 = arith.constant 1.000000e+00 : f32
    %85 = vector.broadcast %cst_36 : f32 to vector<4x128xf32>
    %86 = vector.extract_strided_slice %84 {offsets = [0, 0], sizes = [4, 128], strides = [1, 1]} : vector<8x128xf32> to vector<4x128xf32>
    %87 = tpu.concatenate %85, %86 in 0 : vector<4x128xf32>, vector<4x128xf32> -> vector<8x128xf32>
    %cst_37 = arith.constant 0.000000e+00 : f32
    %88 = vector.broadcast %cst_37 : f32 to vector<4x128xf32>
    %89 = vector.extract_strided_slice %83 {offsets = [0, 0], sizes = [4, 128], strides = [1, 1]} : vector<8x128xf32> to vector<4x128xf32>
    %90 = tpu.concatenate %88, %89 in 0 : vector<4x128xf32>, vector<4x128xf32> -> vector<8x128xf32>
    %91 = arith.mulf %84, %90 : vector<8x128xf32>
    %92 = arith.addf %91, %83 : vector<8x128xf32>
    %93 = arith.mulf %84, %87 : vector<8x128xf32>
    %94 = vector.broadcast %64 : vector<1x128xf32> to vector<8x128xf32>
    %95 = arith.mulf %93, %94 : vector<8x128xf32>
    %96 = arith.addf %95, %92 : vector<8x128xf32>
    %c0_38 = arith.constant 0 : index
    %c0_39 = arith.constant 0 : index
    %97 = vector.load %arg17[%c0_38, %c0_39] : memref<64x128xf32, #tpu.memory_space<vmem>>, vector<8x128xf32>
    tpu.vector_store %arg17[%c0_38, %c0_39], %96 {strides = array<i32>} : memref<64x128xf32, #tpu.memory_space<vmem>>, vector<8x128xf32>,
    %98 = vector.extract_strided_slice %96 {offsets = [7, 0], sizes = [1, 128], strides = [1, 1]} : vector<8x128xf32> to vector<1x128xf32>
    %99 = vector.extract_strided_slice %61 {offsets = [8, 0], sizes = [8, 128], strides = [1, 1]} : vector<64x128xf32> to vector<8x128xf32>
    %100 = vector.extract_strided_slice %63 {offsets = [8, 0], sizes = [8, 128], strides = [1, 1]} : vector<64x128xf32> to vector<8x128xf32>
    %cst_40 = arith.constant 1.000000e+00 : f32
    %101 = vector.broadcast %cst_40 : f32 to vector<1x128xf32>
    %102 = vector.extract_strided_slice %99 {offsets = [0, 0], sizes = [7, 128], strides = [1, 1]} : vector<8x128xf32> to vector<7x128xf32>
    %103 = tpu.concatenate %101, %102 in 0 : vector<1x128xf32>, vector<7x128xf32> -> vector<8x128xf32>
    %cst_41 = arith.constant 0.000000e+00 : f32
    %104 = vector.broadcast %cst_41 : f32 to vector<1x128xf32>
    %105 = vector.extract_strided_slice %100 {offsets = [0, 0], sizes = [7, 128], strides = [1, 1]} : vector<8x128xf32> to vector<7x128xf32>
    %106 = tpu.concatenate %104, %105 in 0 : vector<1x128xf32>, vector<7x128xf32> -> vector<8x128xf32>
    %107 = arith.mulf %99, %106 : vector<8x128xf32>
    %108 = arith.addf %107, %100 : vector<8x128xf32>
    %109 = arith.mulf %99, %103 : vector<8x128xf32>
    %cst_42 = arith.constant 1.000000e+00 : f32
    %110 = vector.broadcast %cst_42 : f32 to vector<2x128xf32>
    %111 = vector.extract_strided_slice %109 {offsets = [0, 0], sizes = [6, 128], strides = [1, 1]} : vector<8x128xf32> to vector<6x128xf32>
    %112 = tpu.concatenate %110, %111 in 0 : vector<2x128xf32>, vector<6x128xf32> -> vector<8x128xf32>
    %cst_43 = arith.constant 0.000000e+00 : f32
    %113 = vector.broadcast %cst_43 : f32 to vector<2x128xf32>
    %114 = vector.extract_strided_slice %108 {offsets = [0, 0], sizes = [6, 128], strides = [1, 1]} : vector<8x128xf32> to vector<6x128xf32>
    %115 = tpu.concatenate %113, %114 in 0 : vector<2x128xf32>, vector<6x128xf32> -> vector<8x128xf32>
    %116 = arith.mulf %109, %115 : vector<8x128xf32>
    %117 = arith.addf %116, %108 : vector<8x128xf32>
    %118 = arith.mulf %109, %112 : vector<8x128xf32>
    %cst_44 = arith.constant 1.000000e+00 : f32
    %119 = vector.broadcast %cst_44 : f32 to vector<4x128xf32>
    %120 = vector.extract_strided_slice %118 {offsets = [0, 0], sizes = [4, 128], strides = [1, 1]} : vector<8x128xf32> to vector<4x128xf32>
    %121 = tpu.concatenate %119, %120 in 0 : vector<4x128xf32>, vector<4x128xf32> -> vector<8x128xf32>
    %cst_45 = arith.constant 0.000000e+00 : f32
    %122 = vector.broadcast %cst_45 : f32 to vector<4x128xf32>
    %123 = vector.extract_strided_slice %117 {offsets = [0, 0], sizes = [4, 128], strides = [1, 1]} : vector<8x128xf32> to vector<4x128xf32>
    %124 = tpu.concatenate %122, %123 in 0 : vector<4x128xf32>, vector<4x128xf32> -> vector<8x128xf32>
    %125 = arith.mulf %118, %124 : vector<8x128xf32>
    %126 = arith.addf %125, %117 : vector<8x128xf32>
    %127 = arith.mulf %118, %121 : vector<8x128xf32>
    %128 = vector.broadcast %98 : vector<1x128xf32> to vector<8x128xf32>
    %129 = arith.mulf %127, %128 : vector<8x128xf32>
    %130 = arith.addf %129, %126 : vector<8x128xf32>
    %c8_46 = arith.constant 8 : index
    %c0_47 = arith.constant 0 : index
    %131 = vector.load %arg17[%c8_46, %c0_47] : memref<64x128xf32, #tpu.memory_space<vmem>>, vector<8x128xf32>
    tpu.vector_store %arg17[%c8_46, %c0_47], %130 {strides = array<i32>} : memref<64x128xf32, #tpu.memory_space<vmem>>, vector<8x128xf32>,
    %132 = vector.extract_strided_slice %130 {offsets = [7, 0], sizes = [1, 128], strides = [1, 1]} : vector<8x128xf32> to vector<1x128xf32>
    %133 = vector.extract_strided_slice %61 {offsets = [16, 0], sizes = [8, 128], strides = [1, 1]} : vector<64x128xf32> to vector<8x128xf32>
    %134 = vector.extract_strided_slice %63 {offsets = [16, 0], sizes = [8, 128], strides = [1, 1]} : vector<64x128xf32> to vector<8x128xf32>
    %cst_48 = arith.constant 1.000000e+00 : f32
    %135 = vector.broadcast %cst_48 : f32 to vector<1x128xf32>
    %136 = vector.extract_strided_slice %133 {offsets = [0, 0], sizes = [7, 128], strides = [1, 1]} : vector<8x128xf32> to vector<7x128xf32>
    %137 = tpu.concatenate %135, %136 in 0 : vector<1x128xf32>, vector<7x128xf32> -> vector<8x128xf32>
    %cst_49 = arith.constant 0.000000e+00 : f32
    %138 = vector.broadcast %cst_49 : f32 to vector<1x128xf32>
    %139 = vector.extract_strided_slice %134 {offsets = [0, 0], sizes = [7, 128], strides = [1, 1]} : vector<8x128xf32> to vector<7x128xf32>
    %140 = tpu.concatenate %138, %139 in 0 : vector<1x128xf32>, vector<7x128xf32> -> vector<8x128xf32>
    %141 = arith.mulf %133, %140 : vector<8x128xf32>
    %142 = arith.addf %141, %134 : vector<8x128xf32>
    %143 = arith.mulf %133, %137 : vector<8x128xf32>
    %cst_50 = arith.constant 1.000000e+00 : f32
    %144 = vector.broadcast %cst_50 : f32 to vector<2x128xf32>
    %145 = vector.extract_strided_slice %143 {offsets = [0, 0], sizes = [6, 128], strides = [1, 1]} : vector<8x128xf32> to vector<6x128xf32>
    %146 = tpu.concatenate %144, %145 in 0 : vector<2x128xf32>, vector<6x128xf32> -> vector<8x128xf32>
    %cst_51 = arith.constant 0.000000e+00 : f32
    %147 = vector.broadcast %cst_51 : f32 to vector<2x128xf32>
    %148 = vector.extract_strided_slice %142 {offsets = [0, 0], sizes = [6, 128], strides = [1, 1]} : vector<8x128xf32> to vector<6x128xf32>
    %149 = tpu.concatenate %147, %148 in 0 : vector<2x128xf32>, vector<6x128xf32> -> vector<8x128xf32>
    %150 = arith.mulf %143, %149 : vector<8x128xf32>
    %151 = arith.addf %150, %142 : vector<8x128xf32>
    %152 = arith.mulf %143, %146 : vector<8x128xf32>
    %cst_52 = arith.constant 1.000000e+00 : f32
    %153 = vector.broadcast %cst_52 : f32 to vector<4x128xf32>
    %154 = vector.extract_strided_slice %152 {offsets = [0, 0], sizes = [4, 128], strides = [1, 1]} : vector<8x128xf32> to vector<4x128xf32>
    %155 = tpu.concatenate %153, %154 in 0 : vector<4x128xf32>, vector<4x128xf32> -> vector<8x128xf32>
    %cst_53 = arith.constant 0.000000e+00 : f32
    %156 = vector.broadcast %cst_53 : f32 to vector<4x128xf32>
    %157 = vector.extract_strided_slice %151 {offsets = [0, 0], sizes = [4, 128], strides = [1, 1]} : vector<8x128xf32> to vector<4x128xf32>
    %158 = tpu.concatenate %156, %157 in 0 : vector<4x128xf32>, vector<4x128xf32> -> vector<8x128xf32>
    %159 = arith.mulf %152, %158 : vector<8x128xf32>
    %160 = arith.addf %159, %151 : vector<8x128xf32>
    %161 = arith.mulf %152, %155 : vector<8x128xf32>
    %162 = vector.broadcast %132 : vector<1x128xf32> to vector<8x128xf32>
    %163 = arith.mulf %161, %162 : vector<8x128xf32>
    %164 = arith.addf %163, %160 : vector<8x128xf32>
    %c16 = arith.constant 16 : index
    %c0_54 = arith.constant 0 : index
    %165 = vector.load %arg17[%c16, %c0_54] : memref<64x128xf32, #tpu.memory_space<vmem>>, vector<8x128xf32>
    tpu.vector_store %arg17[%c16, %c0_54], %164 {strides = array<i32>} : memref<64x128xf32, #tpu.memory_space<vmem>>, vector<8x128xf32>,
    %166 = vector.extract_strided_slice %164 {offsets = [7, 0], sizes = [1, 128], strides = [1, 1]} : vector<8x128xf32> to vector<1x128xf32>
    %167 = vector.extract_strided_slice %61 {offsets = [24, 0], sizes = [8, 128], strides = [1, 1]} : vector<64x128xf32> to vector<8x128xf32>
    %168 = vector.extract_strided_slice %63 {offsets = [24, 0], sizes = [8, 128], strides = [1, 1]} : vector<64x128xf32> to vector<8x128xf32>
    %cst_55 = arith.constant 1.000000e+00 : f32
    %169 = vector.broadcast %cst_55 : f32 to vector<1x128xf32>
    %170 = vector.extract_strided_slice %167 {offsets = [0, 0], sizes = [7, 128], strides = [1, 1]} : vector<8x128xf32> to vector<7x128xf32>
    %171 = tpu.concatenate %169, %170 in 0 : vector<1x128xf32>, vector<7x128xf32> -> vector<8x128xf32>
    %cst_56 = arith.constant 0.000000e+00 : f32
    %172 = vector.broadcast %cst_56 : f32 to vector<1x128xf32>
    %173 = vector.extract_strided_slice %168 {offsets = [0, 0], sizes = [7, 128], strides = [1, 1]} : vector<8x128xf32> to vector<7x128xf32>
    %174 = tpu.concatenate %172, %173 in 0 : vector<1x128xf32>, vector<7x128xf32> -> vector<8x128xf32>
    %175 = arith.mulf %167, %174 : vector<8x128xf32>
    %176 = arith.addf %175, %168 : vector<8x128xf32>
    %177 = arith.mulf %167, %171 : vector<8x128xf32>
    %cst_57 = arith.constant 1.000000e+00 : f32
    %178 = vector.broadcast %cst_57 : f32 to vector<2x128xf32>
    %179 = vector.extract_strided_slice %177 {offsets = [0, 0], sizes = [6, 128], strides = [1, 1]} : vector<8x128xf32> to vector<6x128xf32>
    %180 = tpu.concatenate %178, %179 in 0 : vector<2x128xf32>, vector<6x128xf32> -> vector<8x128xf32>
    %cst_58 = arith.constant 0.000000e+00 : f32
    %181 = vector.broadcast %cst_58 : f32 to vector<2x128xf32>
    %182 = vector.extract_strided_slice %176 {offsets = [0, 0], sizes = [6, 128], strides = [1, 1]} : vector<8x128xf32> to vector<6x128xf32>
    %183 = tpu.concatenate %181, %182 in 0 : vector<2x128xf32>, vector<6x128xf32> -> vector<8x128xf32>
    %184 = arith.mulf %177, %183 : vector<8x128xf32>
    %185 = arith.addf %184, %176 : vector<8x128xf32>
    %186 = arith.mulf %177, %180 : vector<8x128xf32>
    %cst_59 = arith.constant 1.000000e+00 : f32
    %187 = vector.broadcast %cst_59 : f32 to vector<4x128xf32>
    %188 = vector.extract_strided_slice %186 {offsets = [0, 0], sizes = [4, 128], strides = [1, 1]} : vector<8x128xf32> to vector<4x128xf32>
    %189 = tpu.concatenate %187, %188 in 0 : vector<4x128xf32>, vector<4x128xf32> -> vector<8x128xf32>
    %cst_60 = arith.constant 0.000000e+00 : f32
    %190 = vector.broadcast %cst_60 : f32 to vector<4x128xf32>
    %191 = vector.extract_strided_slice %185 {offsets = [0, 0], sizes = [4, 128], strides = [1, 1]} : vector<8x128xf32> to vector<4x128xf32>
    %192 = tpu.concatenate %190, %191 in 0 : vector<4x128xf32>, vector<4x128xf32> -> vector<8x128xf32>
    %193 = arith.mulf %186, %192 : vector<8x128xf32>
    %194 = arith.addf %193, %185 : vector<8x128xf32>
    %195 = arith.mulf %186, %189 : vector<8x128xf32>
    %196 = vector.broadcast %166 : vector<1x128xf32> to vector<8x128xf32>
    %197 = arith.mulf %195, %196 : vector<8x128xf32>
    %198 = arith.addf %197, %194 : vector<8x128xf32>
    %c24 = arith.constant 24 : index
    %c0_61 = arith.constant 0 : index
    %199 = vector.load %arg17[%c24, %c0_61] : memref<64x128xf32, #tpu.memory_space<vmem>>, vector<8x128xf32>
    tpu.vector_store %arg17[%c24, %c0_61], %198 {strides = array<i32>} : memref<64x128xf32, #tpu.memory_space<vmem>>, vector<8x128xf32>,
    %200 = vector.extract_strided_slice %198 {offsets = [7, 0], sizes = [1, 128], strides = [1, 1]} : vector<8x128xf32> to vector<1x128xf32>
    %201 = vector.extract_strided_slice %61 {offsets = [32, 0], sizes = [8, 128], strides = [1, 1]} : vector<64x128xf32> to vector<8x128xf32>
    %202 = vector.extract_strided_slice %63 {offsets = [32, 0], sizes = [8, 128], strides = [1, 1]} : vector<64x128xf32> to vector<8x128xf32>
    %cst_62 = arith.constant 1.000000e+00 : f32
    %203 = vector.broadcast %cst_62 : f32 to vector<1x128xf32>
    %204 = vector.extract_strided_slice %201 {offsets = [0, 0], sizes = [7, 128], strides = [1, 1]} : vector<8x128xf32> to vector<7x128xf32>
    %205 = tpu.concatenate %203, %204 in 0 : vector<1x128xf32>, vector<7x128xf32> -> vector<8x128xf32>
    %cst_63 = arith.constant 0.000000e+00 : f32
    %206 = vector.broadcast %cst_63 : f32 to vector<1x128xf32>
    %207 = vector.extract_strided_slice %202 {offsets = [0, 0], sizes = [7, 128], strides = [1, 1]} : vector<8x128xf32> to vector<7x128xf32>
    %208 = tpu.concatenate %206, %207 in 0 : vector<1x128xf32>, vector<7x128xf32> -> vector<8x128xf32>
    %209 = arith.mulf %201, %208 : vector<8x128xf32>
    %210 = arith.addf %209, %202 : vector<8x128xf32>
    %211 = arith.mulf %201, %205 : vector<8x128xf32>
    %cst_64 = arith.constant 1.000000e+00 : f32
    %212 = vector.broadcast %cst_64 : f32 to vector<2x128xf32>
    %213 = vector.extract_strided_slice %211 {offsets = [0, 0], sizes = [6, 128], strides = [1, 1]} : vector<8x128xf32> to vector<6x128xf32>
    %214 = tpu.concatenate %212, %213 in 0 : vector<2x128xf32>, vector<6x128xf32> -> vector<8x128xf32>
    %cst_65 = arith.constant 0.000000e+00 : f32
    %215 = vector.broadcast %cst_65 : f32 to vector<2x128xf32>
    %216 = vector.extract_strided_slice %210 {offsets = [0, 0], sizes = [6, 128], strides = [1, 1]} : vector<8x128xf32> to vector<6x128xf32>
    %217 = tpu.concatenate %215, %216 in 0 : vector<2x128xf32>, vector<6x128xf32> -> vector<8x128xf32>
    %218 = arith.mulf %211, %217 : vector<8x128xf32>
    %219 = arith.addf %218, %210 : vector<8x128xf32>
    %220 = arith.mulf %211, %214 : vector<8x128xf32>
    %cst_66 = arith.constant 1.000000e+00 : f32
    %221 = vector.broadcast %cst_66 : f32 to vector<4x128xf32>
    %222 = vector.extract_strided_slice %220 {offsets = [0, 0], sizes = [4, 128], strides = [1, 1]} : vector<8x128xf32> to vector<4x128xf32>
    %223 = tpu.concatenate %221, %222 in 0 : vector<4x128xf32>, vector<4x128xf32> -> vector<8x128xf32>
    %cst_67 = arith.constant 0.000000e+00 : f32
    %224 = vector.broadcast %cst_67 : f32 to vector<4x128xf32>
    %225 = vector.extract_strided_slice %219 {offsets = [0, 0], sizes = [4, 128], strides = [1, 1]} : vector<8x128xf32> to vector<4x128xf32>
    %226 = tpu.concatenate %224, %225 in 0 : vector<4x128xf32>, vector<4x128xf32> -> vector<8x128xf32>
    %227 = arith.mulf %220, %226 : vector<8x128xf32>
    %228 = arith.addf %227, %219 : vector<8x128xf32>
    %229 = arith.mulf %220, %223 : vector<8x128xf32>
    %230 = vector.broadcast %200 : vector<1x128xf32> to vector<8x128xf32>
    %231 = arith.mulf %229, %230 : vector<8x128xf32>
    %232 = arith.addf %231, %228 : vector<8x128xf32>
    %c32 = arith.constant 32 : index
    %c0_68 = arith.constant 0 : index
    %233 = vector.load %arg17[%c32, %c0_68] : memref<64x128xf32, #tpu.memory_space<vmem>>, vector<8x128xf32>
    tpu.vector_store %arg17[%c32, %c0_68], %232 {strides = array<i32>} : memref<64x128xf32, #tpu.memory_space<vmem>>, vector<8x128xf32>,
    %234 = vector.extract_strided_slice %232 {offsets = [7, 0], sizes = [1, 128], strides = [1, 1]} : vector<8x128xf32> to vector<1x128xf32>
    %235 = vector.extract_strided_slice %61 {offsets = [40, 0], sizes = [8, 128], strides = [1, 1]} : vector<64x128xf32> to vector<8x128xf32>
    %236 = vector.extract_strided_slice %63 {offsets = [40, 0], sizes = [8, 128], strides = [1, 1]} : vector<64x128xf32> to vector<8x128xf32>
    %cst_69 = arith.constant 1.000000e+00 : f32
    %237 = vector.broadcast %cst_69 : f32 to vector<1x128xf32>
    %238 = vector.extract_strided_slice %235 {offsets = [0, 0], sizes = [7, 128], strides = [1, 1]} : vector<8x128xf32> to vector<7x128xf32>
    %239 = tpu.concatenate %237, %238 in 0 : vector<1x128xf32>, vector<7x128xf32> -> vector<8x128xf32>
    %cst_70 = arith.constant 0.000000e+00 : f32
    %240 = vector.broadcast %cst_70 : f32 to vector<1x128xf32>
    %241 = vector.extract_strided_slice %236 {offsets = [0, 0], sizes = [7, 128], strides = [1, 1]} : vector<8x128xf32> to vector<7x128xf32>
    %242 = tpu.concatenate %240, %241 in 0 : vector<1x128xf32>, vector<7x128xf32> -> vector<8x128xf32>
    %243 = arith.mulf %235, %242 : vector<8x128xf32>
    %244 = arith.addf %243, %236 : vector<8x128xf32>
    %245 = arith.mulf %235, %239 : vector<8x128xf32>
    %cst_71 = arith.constant 1.000000e+00 : f32
    %246 = vector.broadcast %cst_71 : f32 to vector<2x128xf32>
    %247 = vector.extract_strided_slice %245 {offsets = [0, 0], sizes = [6, 128], strides = [1, 1]} : vector<8x128xf32> to vector<6x128xf32>
    %248 = tpu.concatenate %246, %247 in 0 : vector<2x128xf32>, vector<6x128xf32> -> vector<8x128xf32>
    %cst_72 = arith.constant 0.000000e+00 : f32
    %249 = vector.broadcast %cst_72 : f32 to vector<2x128xf32>
    %250 = vector.extract_strided_slice %244 {offsets = [0, 0], sizes = [6, 128], strides = [1, 1]} : vector<8x128xf32> to vector<6x128xf32>
    %251 = tpu.concatenate %249, %250 in 0 : vector<2x128xf32>, vector<6x128xf32> -> vector<8x128xf32>
    %252 = arith.mulf %245, %251 : vector<8x128xf32>
    %253 = arith.addf %252, %244 : vector<8x128xf32>
    %254 = arith.mulf %245, %248 : vector<8x128xf32>
    %cst_73 = arith.constant 1.000000e+00 : f32
    %255 = vector.broadcast %cst_73 : f32 to vector<4x128xf32>
    %256 = vector.extract_strided_slice %254 {offsets = [0, 0], sizes = [4, 128], strides = [1, 1]} : vector<8x128xf32> to vector<4x128xf32>
    %257 = tpu.concatenate %255, %256 in 0 : vector<4x128xf32>, vector<4x128xf32> -> vector<8x128xf32>
    %cst_74 = arith.constant 0.000000e+00 : f32
    %258 = vector.broadcast %cst_74 : f32 to vector<4x128xf32>
    %259 = vector.extract_strided_slice %253 {offsets = [0, 0], sizes = [4, 128], strides = [1, 1]} : vector<8x128xf32> to vector<4x128xf32>
    %260 = tpu.concatenate %258, %259 in 0 : vector<4x128xf32>, vector<4x128xf32> -> vector<8x128xf32>
    %261 = arith.mulf %254, %260 : vector<8x128xf32>
    %262 = arith.addf %261, %253 : vector<8x128xf32>
    %263 = arith.mulf %254, %257 : vector<8x128xf32>
    %264 = vector.broadcast %234 : vector<1x128xf32> to vector<8x128xf32>
    %265 = arith.mulf %263, %264 : vector<8x128xf32>
    %266 = arith.addf %265, %262 : vector<8x128xf32>
    %c40 = arith.constant 40 : index
    %c0_75 = arith.constant 0 : index
    %267 = vector.load %arg17[%c40, %c0_75] : memref<64x128xf32, #tpu.memory_space<vmem>>, vector<8x128xf32>
    tpu.vector_store %arg17[%c40, %c0_75], %266 {strides = array<i32>} : memref<64x128xf32, #tpu.memory_space<vmem>>, vector<8x128xf32>,
    %268 = vector.extract_strided_slice %266 {offsets = [7, 0], sizes = [1, 128], strides = [1, 1]} : vector<8x128xf32> to vector<1x128xf32>
    %269 = vector.extract_strided_slice %61 {offsets = [48, 0], sizes = [8, 128], strides = [1, 1]} : vector<64x128xf32> to vector<8x128xf32>
    %270 = vector.extract_strided_slice %63 {offsets = [48, 0], sizes = [8, 128], strides = [1, 1]} : vector<64x128xf32> to vector<8x128xf32>
    %cst_76 = arith.constant 1.000000e+00 : f32
    %271 = vector.broadcast %cst_76 : f32 to vector<1x128xf32>
    %272 = vector.extract_strided_slice %269 {offsets = [0, 0], sizes = [7, 128], strides = [1, 1]} : vector<8x128xf32> to vector<7x128xf32>
    %273 = tpu.concatenate %271, %272 in 0 : vector<1x128xf32>, vector<7x128xf32> -> vector<8x128xf32>
    %cst_77 = arith.constant 0.000000e+00 : f32
    %274 = vector.broadcast %cst_77 : f32 to vector<1x128xf32>
    %275 = vector.extract_strided_slice %270 {offsets = [0, 0], sizes = [7, 128], strides = [1, 1]} : vector<8x128xf32> to vector<7x128xf32>
    %276 = tpu.concatenate %274, %275 in 0 : vector<1x128xf32>, vector<7x128xf32> -> vector<8x128xf32>
    %277 = arith.mulf %269, %276 : vector<8x128xf32>
    %278 = arith.addf %277, %270 : vector<8x128xf32>
    %279 = arith.mulf %269, %273 : vector<8x128xf32>
    %cst_78 = arith.constant 1.000000e+00 : f32
    %280 = vector.broadcast %cst_78 : f32 to vector<2x128xf32>
    %281 = vector.extract_strided_slice %279 {offsets = [0, 0], sizes = [6, 128], strides = [1, 1]} : vector<8x128xf32> to vector<6x128xf32>
    %282 = tpu.concatenate %280, %281 in 0 : vector<2x128xf32>, vector<6x128xf32> -> vector<8x128xf32>
    %cst_79 = arith.constant 0.000000e+00 : f32
    %283 = vector.broadcast %cst_79 : f32 to vector<2x128xf32>
    %284 = vector.extract_strided_slice %278 {offsets = [0, 0], sizes = [6, 128], strides = [1, 1]} : vector<8x128xf32> to vector<6x128xf32>
    %285 = tpu.concatenate %283, %284 in 0 : vector<2x128xf32>, vector<6x128xf32> -> vector<8x128xf32>
    %286 = arith.mulf %279, %285 : vector<8x128xf32>
    %287 = arith.addf %286, %278 : vector<8x128xf32>
    %288 = arith.mulf %279, %282 : vector<8x128xf32>
    %cst_80 = arith.constant 1.000000e+00 : f32
    %289 = vector.broadcast %cst_80 : f32 to vector<4x128xf32>
    %290 = vector.extract_strided_slice %288 {offsets = [0, 0], sizes = [4, 128], strides = [1, 1]} : vector<8x128xf32> to vector<4x128xf32>
    %291 = tpu.concatenate %289, %290 in 0 : vector<4x128xf32>, vector<4x128xf32> -> vector<8x128xf32>
    %cst_81 = arith.constant 0.000000e+00 : f32
    %292 = vector.broadcast %cst_81 : f32 to vector<4x128xf32>
    %293 = vector.extract_strided_slice %287 {offsets = [0, 0], sizes = [4, 128], strides = [1, 1]} : vector<8x128xf32> to vector<4x128xf32>
    %294 = tpu.concatenate %292, %293 in 0 : vector<4x128xf32>, vector<4x128xf32> -> vector<8x128xf32>
    %295 = arith.mulf %288, %294 : vector<8x128xf32>
    %296 = arith.addf %295, %287 : vector<8x128xf32>
    %297 = arith.mulf %288, %291 : vector<8x128xf32>
    %298 = vector.broadcast %268 : vector<1x128xf32> to vector<8x128xf32>
    %299 = arith.mulf %297, %298 : vector<8x128xf32>
    %300 = arith.addf %299, %296 : vector<8x128xf32>
    %c48 = arith.constant 48 : index
    %c0_82 = arith.constant 0 : index
    %301 = vector.load %arg17[%c48, %c0_82] : memref<64x128xf32, #tpu.memory_space<vmem>>, vector<8x128xf32>
    tpu.vector_store %arg17[%c48, %c0_82], %300 {strides = array<i32>} : memref<64x128xf32, #tpu.memory_space<vmem>>, vector<8x128xf32>,
    %302 = vector.extract_strided_slice %300 {offsets = [7, 0], sizes = [1, 128], strides = [1, 1]} : vector<8x128xf32> to vector<1x128xf32>
    %303 = vector.extract_strided_slice %61 {offsets = [56, 0], sizes = [8, 128], strides = [1, 1]} : vector<64x128xf32> to vector<8x128xf32>
    %304 = vector.extract_strided_slice %63 {offsets = [56, 0], sizes = [8, 128], strides = [1, 1]} : vector<64x128xf32> to vector<8x128xf32>
    %cst_83 = arith.constant 1.000000e+00 : f32
    %305 = vector.broadcast %cst_83 : f32 to vector<1x128xf32>
    %306 = vector.extract_strided_slice %303 {offsets = [0, 0], sizes = [7, 128], strides = [1, 1]} : vector<8x128xf32> to vector<7x128xf32>
    %307 = tpu.concatenate %305, %306 in 0 : vector<1x128xf32>, vector<7x128xf32> -> vector<8x128xf32>
    %cst_84 = arith.constant 0.000000e+00 : f32
    %308 = vector.broadcast %cst_84 : f32 to vector<1x128xf32>
    %309 = vector.extract_strided_slice %304 {offsets = [0, 0], sizes = [7, 128], strides = [1, 1]} : vector<8x128xf32> to vector<7x128xf32>
    %310 = tpu.concatenate %308, %309 in 0 : vector<1x128xf32>, vector<7x128xf32> -> vector<8x128xf32>
    %311 = arith.mulf %303, %310 : vector<8x128xf32>
    %312 = arith.addf %311, %304 : vector<8x128xf32>
    %313 = arith.mulf %303, %307 : vector<8x128xf32>
    %cst_85 = arith.constant 1.000000e+00 : f32
    %314 = vector.broadcast %cst_85 : f32 to vector<2x128xf32>
    %315 = vector.extract_strided_slice %313 {offsets = [0, 0], sizes = [6, 128], strides = [1, 1]} : vector<8x128xf32> to vector<6x128xf32>
    %316 = tpu.concatenate %314, %315 in 0 : vector<2x128xf32>, vector<6x128xf32> -> vector<8x128xf32>
    %cst_86 = arith.constant 0.000000e+00 : f32
    %317 = vector.broadcast %cst_86 : f32 to vector<2x128xf32>
    %318 = vector.extract_strided_slice %312 {offsets = [0, 0], sizes = [6, 128], strides = [1, 1]} : vector<8x128xf32> to vector<6x128xf32>
    %319 = tpu.concatenate %317, %318 in 0 : vector<2x128xf32>, vector<6x128xf32> -> vector<8x128xf32>
    %320 = arith.mulf %313, %319 : vector<8x128xf32>
    %321 = arith.addf %320, %312 : vector<8x128xf32>
    %322 = arith.mulf %313, %316 : vector<8x128xf32>
    %cst_87 = arith.constant 1.000000e+00 : f32
    %323 = vector.broadcast %cst_87 : f32 to vector<4x128xf32>
    %324 = vector.extract_strided_slice %322 {offsets = [0, 0], sizes = [4, 128], strides = [1, 1]} : vector<8x128xf32> to vector<4x128xf32>
    %325 = tpu.concatenate %323, %324 in 0 : vector<4x128xf32>, vector<4x128xf32> -> vector<8x128xf32>
    %cst_88 = arith.constant 0.000000e+00 : f32
    %326 = vector.broadcast %cst_88 : f32 to vector<4x128xf32>
    %327 = vector.extract_strided_slice %321 {offsets = [0, 0], sizes = [4, 128], strides = [1, 1]} : vector<8x128xf32> to vector<4x128xf32>
    %328 = tpu.concatenate %326, %327 in 0 : vector<4x128xf32>, vector<4x128xf32> -> vector<8x128xf32>
    %329 = arith.mulf %322, %328 : vector<8x128xf32>
    %330 = arith.addf %329, %321 : vector<8x128xf32>
    %331 = arith.mulf %322, %325 : vector<8x128xf32>
    %332 = vector.broadcast %302 : vector<1x128xf32> to vector<8x128xf32>
    %333 = arith.mulf %331, %332 : vector<8x128xf32>
    %334 = arith.addf %333, %330 : vector<8x128xf32>
    %c56 = arith.constant 56 : index
    %c0_89 = arith.constant 0 : index
    %335 = vector.load %arg17[%c56, %c0_89] : memref<64x128xf32, #tpu.memory_space<vmem>>, vector<8x128xf32>
    tpu.vector_store %arg17[%c56, %c0_89], %334 {strides = array<i32>} : memref<64x128xf32, #tpu.memory_space<vmem>>, vector<8x128xf32>,
    %c0_90 = arith.constant 0 : index
    %c0_91 = arith.constant 0 : index
    %336 = vector.load %arg17[%c0_90, %c0_91] : memref<64x128xf32, #tpu.memory_space<vmem>>, vector<64x128xf32>
    %337 = arith.mulf %336, %56 : vector<64x128xf32>
    %338 = arith.truncf %337 : vector<64x128xf32> to vector<64x128xbf16>
    %c0_92 = arith.constant 0 : index
    %c0_93 = arith.constant 0 : index
    %339 = vector.load %arg10[%c0_92, %c0_93] : memref<128x16xbf16, #tpu.memory_space<vmem>>, vector<128x16xbf16>
    %cst_94 = arith.constant dense<0.000000e+00> : vector<64x16xf32>
    %340 = tpu.matmul %338, %339, %cst_94 {dimension_numbers = #tpu.dot_dimension_numbers<[1], [0], [0], [1], [0, 0, 1, 1], [], []>} : vector<64x128xbf16>, vector<128x16xbf16>, vector<64x16xf32> -> vector<64x16xf32>
    %c0_95 = arith.constant 0 : index
    %c0_96 = arith.constant 0 : index
    %341 = vector.load %arg11[%c0_95, %c0_96] : memref<1x16xf32, #tpu.memory_space<vmem>>, vector<1x16xf32>
    %342 = vector.broadcast %341 : vector<1x16xf32> to vector<64x16xf32>
    %343 = arith.mulf %38, %342 : vector<64x16xf32>
    %344 = arith.addf %340, %343 : vector<64x16xf32>
    %345 = arith.negf %4 : vector<64x16xf32>
    %346 = math.exp %345 : vector<64x16xf32>
    %cst_97 = arith.constant 1.000000e+00 : f32
    %347 = vector.broadcast %cst_97 : f32 to vector<64x16xf32>
    %348 = arith.addf %347, %346 : vector<64x16xf32>
    %349 = arith.divf %347, %348 : vector<64x16xf32>
    %350 = arith.mulf %4, %349 : vector<64x16xf32>
    %351 = arith.mulf %344, %350 : vector<64x16xf32>
    %352 = arith.mulf %351, %351 : vector<64x16xf32>
    %cst_98 = arith.constant dense<0.000000e+00> : vector<64xf32>
    %353 = vector.multi_reduction <add>, %352, %cst_98 [1] : vector<64x16xf32> to vector<64xf32>
    %354 = vector.shape_cast %353 : vector<64xf32> to vector<64x1xf32>
    %cst_99 = arith.constant 1.600000e+01 : f32
    %355 = vector.broadcast %cst_99 : f32 to vector<64x1xf32>
    %356 = arith.divf %354, %355 : vector<64x1xf32>
    %cst_100 = arith.constant 9.99999974E-6 : f32
    %357 = vector.broadcast %cst_100 : f32 to vector<64x1xf32>
    %358 = arith.addf %356, %357 : vector<64x1xf32>
    %359 = math.rsqrt %358 : vector<64x1xf32>
    %360 = vector.broadcast %359 : vector<64x1xf32> to vector<64x16xf32>
    %361 = arith.mulf %351, %360 : vector<64x16xf32>
    %c0_101 = arith.constant 0 : index
    %c0_102 = arith.constant 0 : index
    %362 = vector.load %arg12[%c0_101, %c0_102] : memref<1x16xf32, #tpu.memory_space<vmem>>, vector<1x16xf32>
    %363 = vector.broadcast %362 : vector<1x16xf32> to vector<64x16xf32>
    %364 = arith.mulf %361, %363 : vector<64x16xf32>
    %365 = arith.truncf %364 : vector<64x16xf32> to vector<64x16xbf16>
    %c0_103 = arith.constant 0 : index
    %c0_104 = arith.constant 0 : index
    %366 = vector.load %arg13[%c0_103, %c0_104] : memref<16x16xbf16, #tpu.memory_space<vmem>>, vector<16x16xbf16>
    %cst_105 = arith.constant dense<0.000000e+00> : vector<64x16xf32>
    %367 = tpu.matmul %365, %366, %cst_105 {dimension_numbers = #tpu.dot_dimension_numbers<[1], [0], [0], [1], [0, 0, 1, 1], [], []>} : vector<64x16xbf16>, vector<16x16xbf16>, vector<64x16xf32> -> vector<64x16xf32>
    %c0_106 = arith.constant 0 : index
    %c0_107 = arith.constant 0 : index
    %c0_108 = arith.constant 0 : index
    %368 = vector.load %arg2[%c0_106, %c0_107, %c0_108] : memref<1x64x16xf32, #tpu.memory_space<vmem>>, vector<1x64x16xf32>
    %369 = vector.shape_cast %368 : vector<1x64x16xf32> to vector<64x16xf32>
    %370 = arith.mulf %2, %369 : vector<64x16xf32>
    %371 = arith.addf %367, %370 : vector<64x16xf32>
    %372 = arith.truncf %371 : vector<64x16xf32> to vector<64x16xbf16>
    %c0_109 = arith.constant 0 : index
    %c0_110 = arith.constant 0 : index
    %373 = vector.load %arg14[%c0_109, %c0_110] : memref<16x16xbf16, #tpu.memory_space<vmem>>, vector<16x16xbf16>
    %cst_111 = arith.constant dense<0.000000e+00> : vector<64x16xf32>
    %374 = tpu.matmul %372, %373, %cst_111 {dimension_numbers = #tpu.dot_dimension_numbers<[1], [0], [0], [1], [0, 0, 1, 1], [], []>} : vector<64x16xbf16>, vector<16x16xbf16>, vector<64x16xf32> -> vector<64x16xf32>
    %c0_112 = arith.constant 0 : index
    %c0_113 = arith.constant 0 : index
    %c0_114 = arith.constant 0 : index
    %375 = vector.load %arg15[%c0_112, %c0_113, %c0_114] : memref<1x64x16xf32, #tpu.memory_space<vmem>>, vector<1x64x16xf32>
    %376 = vector.shape_cast %375 : vector<1x64x16xf32> to vector<64x16xf32>
    %377 = vector.shape_cast %374 : vector<64x16xf32> to vector<1x64x16xf32>
    tpu.vector_store %arg15[%c0_112, %c0_113, %c0_114], %377 {strides = array<i32>} : memref<1x64x16xf32, #tpu.memory_space<vmem>>, vector<1x64x16xf32>,
    return
  }
  func.func @transform_0(%arg0: i32) -> (i32, i32, i32) {
    %c0_i32 = arith.constant 0 : i32
    %c0_i32_0 = arith.constant 0 : i32
    %c0_i32_1 = arith.constant 0 : i32
    return %arg0, %c0_i32, %c0_i32_0 : i32, i32, i32
  }
  func.func @transform_1(%arg0: i32) -> (i32, i32, i32) {
    %c0_i32 = arith.constant 0 : i32
    %c0_i32_0 = arith.constant 0 : i32
    %c0_i32_1 = arith.constant 0 : i32
    return %arg0, %c0_i32, %c0_i32_0 : i32, i32, i32
  }
  func.func @transform_2(%arg0: i32) -> (i32, i32) {
    %c0_i32 = arith.constant 0 : i32
    %c0_i32_0 = arith.constant 0 : i32
    %c0_i32_1 = arith.constant 0 : i32
    return %c0_i32, %c0_i32_0 : i32, i32
  }
  func.func @transform_3(%arg0: i32) -> (i32, i32) {
    %c0_i32 = arith.constant 0 : i32
    %c0_i32_0 = arith.constant 0 : i32
    %c0_i32_1 = arith.constant 0 : i32
    return %c0_i32, %c0_i32_0 : i32, i32
  }
  func.func @transform_4(%arg0: i32) -> (i32, i32) {
    %c0_i32 = arith.constant 0 : i32
    %c0_i32_0 = arith.constant 0 : i32
    %c0_i32_1 = arith.constant 0 : i32
    return %c0_i32, %c0_i32_0 : i32, i32
  }
  func.func @transform_5(%arg0: i32) -> (i32, i32) {
    %c0_i32 = arith.constant 0 : i32
    %c0_i32_0 = arith.constant 0 : i32
    %c0_i32_1 = arith.constant 0 : i32
    return %c0_i32, %c0_i32_0 : i32, i32
  }
  func.func @transform_6(%arg0: i32) -> (i32, i32) {
    %c0_i32 = arith.constant 0 : i32
    %c0_i32_0 = arith.constant 0 : i32
    %c0_i32_1 = arith.constant 0 : i32
    return %c0_i32, %c0_i32_0 : i32, i32
  }
  func.func @transform_7(%arg0: i32) -> (i32, i32) {
    %c0_i32 = arith.constant 0 : i32
    %c0_i32_0 = arith.constant 0 : i32
    %c0_i32_1 = arith.constant 0 : i32
    return %c0_i32, %c0_i32_0 : i32, i32
  }
  func.func @transform_8(%arg0: i32) -> (i32, i32) {
    %c0_i32 = arith.constant 0 : i32
    %c0_i32_0 = arith.constant 0 : i32
    %c0_i32_1 = arith.constant 0 : i32
    return %c0_i32, %c0_i32_0 : i32, i32
  }
  func.func @transform_9(%arg0: i32) -> (i32, i32) {
    %c0_i32 = arith.constant 0 : i32
    %c0_i32_0 = arith.constant 0 : i32
    %c0_i32_1 = arith.constant 0 : i32
    return %c0_i32, %c0_i32_0 : i32, i32
  }
  func.func @transform_10(%arg0: i32) -> (i32, i32) {
    %c0_i32 = arith.constant 0 : i32
    %c0_i32_0 = arith.constant 0 : i32
    %c0_i32_1 = arith.constant 0 : i32
    return %c0_i32, %c0_i32_0 : i32, i32
  }
  func.func @transform_11(%arg0: i32) -> (i32, i32) {
    %c0_i32 = arith.constant 0 : i32
    %c0_i32_0 = arith.constant 0 : i32
    %c0_i32_1 = arith.constant 0 : i32
    return %c0_i32, %c0_i32_0 : i32, i32
  }
  func.func @transform_12(%arg0: i32) -> (i32, i32) {
    %c0_i32 = arith.constant 0 : i32
    %c0_i32_0 = arith.constant 0 : i32
    %c0_i32_1 = arith.constant 0 : i32
    return %c0_i32, %c0_i32_0 : i32, i32
  }
  func.func @transform_13(%arg0: i32) -> (i32, i32) {
    %c0_i32 = arith.constant 0 : i32
    %c0_i32_0 = arith.constant 0 : i32
    %c0_i32_1 = arith.constant 0 : i32
    return %c0_i32, %c0_i32_0 : i32, i32
  }
  func.func @transform_14(%arg0: i32) -> (i32, i32, i32) {
    %c0_i32 = arith.constant 0 : i32
    %c0_i32_0 = arith.constant 0 : i32
    %c0_i32_1 = arith.constant 0 : i32
    return %arg0, %c0_i32, %c0_i32_0 : i32, i32, i32
  }
}

</mosaic_0001>

<bundles_post_ra>
// kernel: _forward_impl.3
= control target key start
LH: loop header
LB: loop body
LE: loop exit
PB: predicated region body
PF: predicated region fallthrough
CT: control target
= control target key end

     0   :  { %s483_s9 = smov 0   ;;  %s566_s0 = inlined_call_operand.vmem [shape: f32[128,16], index: 0, kind: input, shape index: {}]   ;;  %s567_s1 = inlined_call_operand.vmem [shape: bf16[16,48], index: 1, kind: input, shape index: {}]   ;;  %s568_s2 = inlined_call_operand.vmem [shape: f32[128,48], index: 2, kind: output, shape index: {}]  }
   0x1 LB: > { %s378_s10 = sadd.s32 4294967295, %s466_s9   ;;  %p382_p0 = scmp.ge.s32.totalorder %s466_s9, 1  ;;  %s466_s9 = sphi %s483_s9, %s12_s9  }
   0x2   : > { %p113_p1 = scmp.lt.s32.totalorder %s466_s9, 3 }
   0x4   : > { %p114_p2 = pnand %p382_p0, %p113_p1 }
   0x5   : > { %v427_v0 = vld [vmem:[%s567_s1] sm:$0xff] (!%p114_p2)   ;;  %s383_s13 = sshll.u32 (!%p114_p2), %s378_s10, 3  ;;  %vm168_vm0 = vcmask (!%p114_p2), 130048   ;;  %v246_v39 = vlaneseq (!%p114_p2)  ;;  %vm313_vm2 = vcmask (!%p114_p2), 392192  }
   0x6   : > { %117 = sbr.rel (%p114_p2) target bundleno = 269 (0x10d), region = 28  ;;  %p136_p3 = scmp.lt.s32.totalorder (!%p114_p2), %s383_s13, 15  ;;  %407 = vmatprep.subr.bf16.mxu0 (!%p114_p2), %v427_v0  ;;  %417 = vmatprep.subr.bf16.mxu1 (!%p114_p2), %v427_v0 }
   0x7   : > { %408 = vmatpush3.bf16.msra.mxu0 (!%p114_p2), %v427_v0  ;;  %418 = vmatpush3.bf16.msra.mxu1 (!%p114_p2), %v427_v0  ;;  %v247_v46 = vand.u32 (!%p114_p2), 127, %v246_v39 }
   0x9   : > { %vm248_vm1 = vcmp.lt.s32.totalorder (!%p114_p2), %v247_v46, 16 }
   0xd   : > { %s570_s13 = smov (!%p136_p3, %s383_s13), 15 }
   0xe   : > { %s384_s14 = sshll.u32 %s570_s13, 3 }
   0xf   : > { %s139_s17 = scalar_lea.vmem %s566_s0, %s384_s14  ;;  %s525_s20 = scalar_lea.vmem %s568_s2, %s384_s14 }
  0x10   : > { %v148_v1 = vld [vmem:[%s139_s17] sm:$0xff]  ;;  %v149_v2 = vld [vmem:[%s139_s17 + $0x8] sm:$0xff]  ;;  %v150_v6 = vld [vmem:[%s139_s17 + $0x10] sm:$0xff] }
  0x11   : > { %v152_v3 = vld [vmem:[%s139_s17 + $0x20] sm:$0xff]  ;;  %v156_v4 = vpack.c.bf16 %v149_v2, %v148_v1  ;;  %v153_v5 = vld [vmem:[%s139_s17 + $0x28] sm:$0xff]  ;;  %v151_v7 = vld [vmem:[%s139_s17 + $0x18] sm:$0xff] }
  0x12   : > { %v158_v8 = vpack.c.bf16 %v153_v5, %v152_v3  ;;  %v157_v9 = vpack.c.bf16 %v151_v7, %v150_v6  ;;  %v154_v10 = vld [vmem:[%s139_s17 + $0x30] sm:$0xff]  ;;  %v155_v11 = vld [vmem:[%s139_s17 + $0x38] sm:$0xff] }
  0x13   : > { %409 = vmatprep.mubr.msk.bf16.mxu0 %vm168_vm0, %v156_v4  ;;  %v159_v12 = vpack.c.bf16 %v155_v11, %v154_v10 }
  0x14   : > { %413 = vmatprep.mubr.msk.bf16.mxu1 %vm168_vm0, %v158_v8  ;;  %410 = vmatmul.mubr.msk.bf16.vlgmr.msra.gmra.mrb[0].mxu0 %vm168_vm0, %v157_v9 }
  0x15   : > { %414 = vmatmul.mubr.msk.bf16.vlgmr.msra.gmra.mrb[0].mxu1 %vm168_vm0, %v159_v12 }
  0xe7   : > { %v411_v13 = vpop.f32.mrb[0].mxu0 }
  0xe8   : > { %v394_v14 = vmul.f32 -1.442695, %v411_v13  ;;  %v415_v15 = vpop.f32.mrb[0].mxu1  ;;  %v502_v16 = vpop.f32.mrb[1].mxu0 }
  0xe9   : > { %v398_v17 = vmul.f32 -1.442695, %v415_v15  ;;  %v392_v18 = vmul.f32 -1.442695, %v502_v16  ;;  %v505_v19 = vpop.f32.mrb[1].mxu1  ;;  %v507_v20 = vpop.f32.mrb[2].mxu0 }
  0xea   : > { %428 = vpow2.f32 %v394_v14  ;;  %v396_v21 = vmul.f32 -1.442695, %v505_v19  ;;  %v395_v22 = vmul.f32 -1.442695, %v507_v20  ;;  %v511_v23 = vpop.f32.mrb[2].mxu1  ;;  %v513_v24 = vpop.f32.mrb[3].mxu0 }
  0xeb   : > { %430 = vpow2.f32 %v398_v17  ;;  %v399_v25 = vmul.f32 -1.442695, %v511_v23  ;;  %v516_v26 = vpop.f32.mrb[3].mxu1  ;;  %v393_v27 = vmul.f32 -1.442695, %v513_v24 }
  0xec   : > { %432 = vpow2.f32 %v392_v18  ;;  %v397_v28 = vmul.f32 -1.442695, %v516_v26 }
  0xed   : > { %434 = vpow2.f32 %v396_v21 }
  0xee   : > { %436 = vpow2.f32 %v395_v22 }
  0xef   : > { %438 = vpow2.f32 %v399_v25 }
  0xf0   : > { %440 = vpow2.f32 %v393_v27 }
  0xf1   : > { %442 = vpow2.f32 %v397_v28 }
  0xf4   : > { %v429_v29 = vpop.eup %428 }
  0xf5   : > { %v431_v30 = vpop.eup %430  ;;  %v275_v31 = vadd.f32 1.0, %v429_v29 }
  0xf6   : > { %v433_v32 = vpop.eup %432  ;;  %v279_v33 = vadd.f32 1.0, %v431_v30 }
  0xf7   : > { %v435_v34 = vpop.eup %434  ;;  %444 = vrcp.f32 %v275_v31  ;;  %v273_v35 = vadd.f32 1.0, %v433_v32 }
  0xf8   : > { %v437_v36 = vpop.eup %436  ;;  %446 = vrcp.f32 %v279_v33  ;;  %v277_v37 = vadd.f32 1.0, %v435_v34 }
  0xf9   : > { %v439_v38 = vpop.eup %438  ;;  %448 = vrcp.f32 %v273_v35  ;;  %v276_v40 = vadd.f32 1.0, %v437_v36 }
  0xfa   : > { %v441_v41 = vpop.eup %440  ;;  %450 = vrcp.f32 %v277_v37  ;;  %v280_v42 = vadd.f32 1.0, %v439_v38 }
  0xfb   : > { %v443_v43 = vpop.eup %442  ;;  %452 = vrcp.f32 %v276_v40  ;;  %v274_v44 = vadd.f32 1.0, %v441_v41 }
  0xfc   : > { %454 = vrcp.f32 %v280_v42  ;;  %v278_v45 = vadd.f32 1.0, %v443_v43 }
  0xfd   : > { %456 = vrcp.f32 %v274_v44 }
  0xfe   : > { %458 = vrcp.f32 %v278_v45 }
 0x101   : > { %v445_v47 = vpop.eup %444 }
 0x102   : > { %v447_v48 = vpop.eup %446  ;;  %v299_v49 = vmul.f32 %v445_v47, %v411_v13 }
 0x103   : > { %v449_v50 = vpop.eup %448  ;;  %v303_v51 = vmul.f32 %v447_v48, %v415_v15 }
 0x104   : > { %v451_v52 = vpop.eup %450  ;;  %v307_v53 = vsel %vm248_vm1, %v299_v49, %v411_v13  ;;  %v297_v54 = vmul.f32 %v449_v50, %v502_v16 }
 0x105   : > { %v453_v55 = vpop.eup %452  ;;  %316 = vst.msk [vmem:[%s525_s20 + $0x10] sm:$0xff] %vm313_vm2, %v307_v53  ;;  %v311_v56 = vsel %vm248_vm1, %v303_v51, %v415_v15  ;;  %v301_v57 = vmul.f32 %v451_v52, %v505_v19 }
 0x106   : > { %v455_v58 = vpop.eup %454  ;;  %320 = vst.msk [vmem:[%s525_s20 + $0x30] sm:$0xff] %vm313_vm2, %v311_v56  ;;  %v305_v59 = vsel %vm248_vm1, %v297_v54, %v502_v16  ;;  %v300_v60 = vmul.f32 %v453_v55, %v507_v20 }
 0x107   : > { %v457_v61 = vpop.eup %456  ;;  %314 = vst.msk [vmem:[%s525_s20] sm:$0xff] %vm313_vm2, %v305_v59  ;;  %v309_v62 = vsel %vm248_vm1, %v301_v57, %v505_v19  ;;  %v304_v63 = vmul.f32 %v455_v58, %v511_v23 }
 0x108   : > { %v459_v0 = vpop.eup %458  ;;  %318 = vst.msk [vmem:[%s525_s20 + $0x20] sm:$0xff] %vm313_vm2, %v309_v62  ;;  %v308_v1 = vsel %vm248_vm1, %v300_v60, %v507_v20  ;;  %v298_v2 = vmul.f32 %v457_v61, %v513_v24 }
 0x109   : > { %317 = vst.msk [vmem:[%s525_s20 + $0x18] sm:$0xff] %vm313_vm2, %v308_v1  ;;  %v312_v3 = vsel %vm248_vm1, %v304_v63, %v511_v23  ;;  %v302_v4 = vmul.f32 %v459_v0, %v516_v26 }
 0x10a   : > { %321 = vst.msk [vmem:[%s525_s20 + $0x38] sm:$0xff] %vm313_vm2, %v312_v3  ;;  %v306_v5 = vsel %vm248_vm1, %v298_v2, %v513_v24 }
 0x10b   : > { %315 = vst.msk [vmem:[%s525_s20 + $0x8] sm:$0xff] %vm313_vm2, %v306_v5  ;;  %v310_v6 = vsel %vm248_vm1, %v302_v4, %v516_v26 }
 0x10c   : > { %319 = vst.msk [vmem:[%s525_s20 + $0x28] sm:$0xff] %vm313_vm2, %v310_v6 }
 0x10d PF: > { %s12_s9 = sadd.s32 1, %s466_s9  }
 0x10e   : > { %p9_p4 = scmp.ge.s32.totalorder %s12_s9, 4  }
 0x110   :  { %11 = sbr.rel (!%p9_p4) target bundleno = 1 (0x1), region = 58 }

// kernel: _forward_impl.4
= control target key start
LH: loop header
LB: loop body
LE: loop exit
PB: predicated region body
PF: predicated region fallthrough
CT: control target
= control target key end

     0   :  { %s1375_s24 = smov 0   ;;  %s1847_s0 = inlined_call_operand.vmem [shape: f32[2,8,128], index: 0, kind: input, shape index: {}]   ;;  %s1848_s1 = inlined_call_operand.vmem [shape: bf16[128,128], index: 1, kind: input, shape index: {}]   ;;  %s1849_s2 = inlined_call_operand.vmem [shape: f32[1,128], index: 2, kind: input, shape index: {}]   ;;  %s1850_s3 = inlined_call_operand.vmem [shape: bf16[128,128], index: 3, kind: input, shape index: {}]   ;;  %s1851_s4 = inlined_call_operand.vmem [shape: f32[1,128], index: 4, kind: input, shape index: {}]   ;;  %s1852_s5 = inlined_call_operand.vmem [shape: f32[25,128], index: 5, kind: input, shape index: {}]   ;;  %s1853_s6 = inlined_call_operand.vmem [shape: f32[1,128], index: 6, kind: input, shape index: {}]   ;;  %s1854_s7 = inlined_call_operand.vmem [shape: f32[2,8,128], index: 7, kind: output, shape index: {}]  }
   0x1 LB: > { %s1199_s25 = sadd.s32 4294967295, %s1327_s24   ;;  %p1203_p0 = scmp.ge.s32.totalorder %s1327_s24, 1  ;;  %s1327_s24 = sphi %s1375_s24, %s17_s24  }
   0x2   : > { %p236_p1 = scmp.lt.s32.totalorder %s1327_s24, 3 }
   0x4   : > { %p237_p2 = pnand %p1203_p0, %p236_p1 }
   0x5   : > { %v1301_v0 = vld [vmem:[%s1848_s1] sm:$0xff] (!%p237_p2)   ;;  %v1329_v1 = vmov (!%p237_p2), 0.0   ;;  %v1302_v2 = vld [vmem:[%s1848_s1 + $0x8] sm:$0xff] (!%p237_p2)   ;;  %vm1330_vm0 = vmmov (!%p237_p2), 0   ;;  %v1303_v3 = vld [vmem:[%s1848_s1 + $0x10] sm:$0xff] (!%p237_p2)   ;;  %p266_p3 = scmp.lt.s32.totalorder (!%p237_p2), %s1199_s25, 1  ;;  %v529_v19 = vlaneseq (!%p237_p2) }
   0x6   : > { %240 = sbr.rel (%p237_p2) target bundleno = 687 (0x2af), region = 48  ;;  %1247 = vmatprep.subr.bf16.mxu0 (!%p237_p2), %v1329_v1  ;;  %1267 = vmatprep.subr.bf16.mxu1 (!%p237_p2), %v1329_v1  ;;  %v1309_v4 = vld [vmem:[%s1850_s3] sm:$0xff] (!%p237_p2)   ;;  %v1304_v5 = vld [vmem:[%s1848_s1 + $0x18] sm:$0xff] (!%p237_p2)   ;;  %v1310_v6 = vld [vmem:[%s1850_s3 + $0x8] sm:$0xff] (!%p237_p2)   ;;  %s1331_s27 = smov (!%p237_p2), 96   ;;  %vm502_vm1 = vcmask (!%p237_p2), 261120  }
   0x7   : > { %1248 = vmatpush3.bf16.msra.mxu0 (!%p237_p2), %v1301_v0  ;;  %1263 = vmatprep.mubr.msk.bf16.mxu0 (!%p237_p2), %vm1330_vm0, %v1329_v1  ;;  %v1305_v7 = vld [vmem:[%s1848_s1 + $0x20] sm:$0xff] (!%p237_p2)   ;;  %v1311_v8 = vld [vmem:[%s1850_s3 + $0x10] sm:$0xff] (!%p237_p2)   ;;  %v1306_v9 = vld [vmem:[%s1848_s1 + $0x28] sm:$0xff] (!%p237_p2)   ;;  %v530_v20 = vshrl.u32 (!%p237_p2), %v529_v19, 7  ;;  %s1332_s28 = smov (!%p237_p2), 112   ;;  %s1333_s29 = smov (!%p237_p2), 16  }
   0x8   : > { %1249 = vmatprep.subr.bf16.mxu0 (!%p237_p2), %v1329_v1  ;;  %1283 = vmatprep.mubr.msk.bf16.mxu1 (!%p237_p2), %vm1330_vm0, %v1329_v1  ;;  %v1312_v10 = vld [vmem:[%s1850_s3 + $0x18] sm:$0xff] (!%p237_p2)   ;;  %v1307_v11 = vld [vmem:[%s1848_s1 + $0x30] sm:$0xff] (!%p237_p2)   ;;  %v1313_v12 = vld [vmem:[%s1850_s3 + $0x20] sm:$0xff] (!%p237_p2)   ;;  %503 = vst.msk [vmem:[#allocation2 + $0x10] sm:$0xff] (!%p237_p2), %vm502_vm1, %v1329_v1  ;;  %vm545_vm2 = vcmask (!%p237_p2), 1041408   ;;  %vm575_vm3 = vcmask (!%p237_p2), 1040384  }
   0x9   : > { %1268 = vmatpush3.bf16.msra.mxu1 (!%p237_p2), %v1309_v4  ;;  %v1308_v13 = vld [vmem:[%s1848_s1 + $0x38] sm:$0xff] (!%p237_p2)   ;;  %v1314_v15 = vld [vmem:[%s1850_s3 + $0x28] sm:$0xff] (!%p237_p2)   ;;  %v1315_v17 = vld [vmem:[%s1850_s3 + $0x30] sm:$0xff] (!%p237_p2)   ;;  %v531_v23 = vsub.s32 (!%p237_p2), 0, %v530_v20  ;;  %v561_v24 = vsub.s32 (!%p237_p2), 5, %v530_v20  ;;  %v1471_v25 = vsub.s32 (!%p237_p2), 7, %v530_v20 }
   0xa   : > { %1269 = vmatprep.subr.bf16.mxu1 (!%p237_p2), %v1329_v1  ;;  %v1316_v18 = vld [vmem:[%s1850_s3 + $0x38] sm:$0xff] (!%p237_p2)   ;;  %v1464_v21 = vld [vmem:[%s1852_s5] sm:$0xff] (!%p237_p2)  ;;  %v1469_v22 = vld [vmem:[%s1852_s5 + $0x8] sm:$0xff] (!%p237_p2)  ;;  %v1473_v26 = vsub.s32 (!%p237_p2), 2, %v530_v20  ;;  %v700_v27 = vsub.s32 (!%p237_p2), 6, %v530_v20  ;;  %v670_v32 = vsub.s32 (!%p237_p2), 1, %v530_v20 }
   0xb   : > { %1250 = vmatpush3.bf16.msra.mxu0 (!%p237_p2), %v1302_v2  ;;  %v532_v28 = vrot.slane (!%p237_p2), %v1464_v21, %v531_v23  ;;  %v611_v29 = vrot.slane (!%p237_p2), %v1469_v22, %v1471_v25  ;;  %v513_v30 = vld [vmem:[%s1852_s5 + $0x10] sm:$0xff] (!%p237_p2)  ;;  %v562_v33 = vrot.slane (!%p237_p2), %v1464_v21, %v561_v24  ;;  %v1486_v34 = vsub.s32 (!%p237_p2), 4, %v530_v20  ;;  %506 = vst.msk [vmem:[#allocation2 + $0x28] sm:$0xff] (!%p237_p2), %vm502_vm1, %v1329_v1  ;;  %v1225_v53 = vld [vmem:[%s1852_s5 + $0x18] ss:$0 sm:$0xff] (!%p237_p2) }
   0xc   : > { %1251 = vmatprep.subr.bf16.mxu0 (!%p237_p2), %v1329_v1  ;;  %v1481_v31 = vrot.slane (!%p237_p2), %v513_v30, %v700_v27  ;;  %v592_v35 = vrot.slane (!%p237_p2), %v1469_v22, %v1473_v26  ;;  %v1490_v36 = vrot.slane (!%p237_p2), %v513_v30, %v670_v32  ;;  %v671_v38 = vrot.slane (!%p237_p2), %v1464_v21, %v670_v32  ;;  %v1206_v54 = vld [vmem:[%s1849_s2] ss:$0 sm:$0xff] (!%p237_p2) }
   0xd   : > { %1270 = vmatpush3.bf16.msra.mxu1 %v1310_v6  ;;  %s1856_s25 = smov (!%p266_p3, %s1199_s25), 1  ;;  %534 = vrot.lane.b32.xlu0 %v532_v28, %s1331_s27  ;;  %v641_v37 = vrot.slane %v513_v30, %v1486_v34  ;;  %v701_v39 = vrot.slane %v1464_v21, %v700_v27  ;;  %v729_v40 = vsub.s32 3, %v530_v20  ;;  %v749_v41 = vrot.slane %v513_v30, %v531_v23 }
   0xe   : > { %1271 = vmatprep.subr.bf16.mxu1 %v1329_v1  ;;  %s1204_s23 = sshll.u32 %s1856_s25, 3  ;;  %613 = vrot.lane.b32.xlu1 %v611_v29, %s1331_s27  ;;  %v778_v43 = vrot.slane %v513_v30, %v561_v24  ;;  %v898_v44 = vrot.slane %v1469_v22, %v531_v23  ;;  %v927_v46 = vrot.slane %v1469_v22, %v561_v24  ;;  %vm624_vm4 = vcmask 1046528  }
   0xf   : > { %1252 = vmatpush3.bf16.msra.mxu0 %v1303_v3  ;;  %s269_s30 = scalar_lea.vmem %s1847_s0, %s1204_s23  ;;  %v730_v42 = vrot.slane %v1469_v22, %v729_v40  ;;  %v868_v45 = vrot.slane %v1464_v21, %v729_v40  ;;  %v946_v47 = vrot.slane %v513_v30, %v1473_v26  ;;  %v1004_v48 = vrot.slane %v1464_v21, %v1486_v34  ;;  %v1608_v24 = vld [vmem:[#allocation2 + $0x10] sm:$0xff]  ;;  %s273_s18 = scalar_lea.vmem %s1854_s7, %s1204_s23 }
  0x10   : > { %1253 = vmatprep.subr.bf16.mxu0 %v1329_v1  ;;  %v275_v14 = vld [vmem:[%s269_s30] sm:$0xff]  ;;  %v975_v49 = vrot.slane %v513_v30, %v1471_v25  ;;  %509 = vst.msk [vmem:[#allocation2 + $0x40] sm:$0xff] %vm502_vm1, %v1329_v1  ;;  %s1334_s30 = smov 32   ;;  %v1082_v50 = vrot.slane %v513_v30, %v729_v40  ;;  %v1034_v51 = vrot.slane %v1469_v22, %v670_v32  ;;  %vm654_vm5 = vcmask 1045504  }
  0x11   : > { %1272 = vmatpush3.bf16.msra.mxu1 %v1311_v8  ;;  %v276_v16 = vpack.c.bf16 %v275_v14, %v275_v14  ;;  %564 = vrot.lane.b32.xlu0 %v562_v33, %s1331_s27  ;;  %v1063_v52 = vrot.slane %v1469_v22, %v700_v27  ;;  %vm694_vm6 = vcmask 130048   ;;  %vm891_vm7 = vcmask 916480  }
  0x12   : > { %1273 = vmatprep.subr.bf16.mxu1 %v1329_v1  ;;  %594 = vrot.lane.b32.xlu1 %v592_v35, %s1331_s27  ;;  %v1610_v27 = vld [vmem:[#allocation2 + $0x28] sm:$0xff]  ;;  %vm1027_vm8 = vcmask 785408  }
  0x13   : > { %1254 = vmatpush3.bf16.msra.mxu0 %v1304_v5 }
  0x14   : > { %1255 = vmatprep.subr.bf16.mxu0 %v1329_v1 }
  0x15   : > { %1274 = vmatpush3.bf16.msra.mxu1 %v1312_v10  ;;  %643 = vrot.lane.b32.xlu0 %v641_v37, %s1331_s27 }
  0x16   : > { %1275 = vmatprep.subr.bf16.mxu1 %v1329_v1  ;;  %673 = vrot.lane.b32.xlu1 %v671_v38, %s1332_s28 }
  0x17   : > { %1256 = vmatpush3.bf16.msra.mxu0 %v1305_v7 }
  0x18   : > { %1257 = vmatprep.subr.bf16.mxu0 %v1329_v1 }
  0x19   : > { %1276 = vmatpush3.bf16.msra.mxu1 %v1313_v12  ;;  %703 = vrot.lane.b32.xlu0 %v701_v39, %s1332_s28 }
  0x1a   : > { %1277 = vmatprep.subr.bf16.mxu1 %v1329_v1  ;;  %751 = vrot.lane.b32.xlu1 %v749_v41, %s1332_s28 }
  0x1b   : > { %1258 = vmatpush3.bf16.msra.mxu0 %v1306_v9 }
  0x1c   : > { %1259 = vmatprep.subr.bf16.mxu0 %v1329_v1 }
  0x1d   : > { %1278 = vmatpush3.bf16.msra.mxu1 %v1314_v15  ;;  %732 = vrot.lane.b32.xlu0 %v730_v42, %s1332_s28 }
  0x1e   : > { %1279 = vmatprep.subr.bf16.mxu1 %v1329_v1  ;;  %780 = vrot.lane.b32.xlu1 %v778_v43, %s1332_s28 }
  0x1f   : > { %1260 = vmatpush3.bf16.msra.mxu0 %v1307_v11 }
  0x20   : > { %1261 = vmatprep.subr.bf16.mxu0 %v1329_v1 }
  0x21   : > { %1280 = vmatpush3.bf16.msra.mxu1 %v1315_v17  ;;  %870 = vrot.lane.b32.xlu0 %v868_v45, %s1333_s29 }
  0x22   : > { %1281 = vmatprep.subr.bf16.mxu1 %v1329_v1  ;;  %900 = vrot.lane.b32.xlu1 %v898_v44, %s1333_s29 }
  0x23   : > { %1262 = vmatpush3.bf16.msra.mxu0 %v1308_v13 }
  0x25   : > { %1282 = vmatpush3.bf16.msra.mxu1 %v1316_v18  ;;  %948 = vrot.lane.b32.xlu0 %v946_v47, %s1333_s29 }
  0x26   : > { %1264 = vmatmul.mubr.bf16.vlgmr.msra.gmra.mrb[0].mxu0 %v276_v16  ;;  %929 = vrot.lane.b32.xlu1 %v927_v46, %s1333_s29 }
  0x29   : > { %977 = vrot.lane.b32.xlu0 %v975_v49, %s1333_s29 }
  0x2a   : > { %1006 = vrot.lane.b32.xlu1 %v1004_v48, %s1334_s30  ;;  %v1215_v48 = vld [vmem:[%s1851_s4] ss:$0 sm:$0xff] }
  0x2d   : > { %1036 = vrot.lane.b32.xlu0 %v1034_v51, %s1334_s30 }
  0x2e   : > { %1084 = vrot.lane.b32.xlu1 %v1082_v50, %s1334_s30 }
  0x31   : > { %1065 = vrot.lane.b32.xlu0 %v1063_v52, %s1334_s30 }
  0x32   : > { %1113 = vrot.lane.b32.xlu1 %v1225_v53, %s1334_s30 }
  0x7f   : > { %v1535_v55 = vpop.permute.xlu0 %534 }
  0x80   : > { %v1537_v56 = vpop.permute.xlu1 %613  ;;  %v1552_v3 = vmul.f32 0.0, %v1535_v55 }
  0x81   : > { %v1565_v9 = vmul.f32 0.0, %v1537_v56 }
  0x82   : > { %v546_v7 = vrot.slane %v1552_v3, 6 }
  0x83   : > { %v1543_v63 = vpop.permute.xlu0 %564  ;;  %v625_v12 = vrot.slane %v1565_v9, 1 }
  0x84   : > { %v1545_v0 = vpop.permute.xlu1 %594  ;;  %v1557_v5 = vmul.f32 0.0, %v1543_v63 }
  0x85   : > { %v597_v1 = vmul.f32 0.0, %v1545_v0 }
  0x86   : > { %v576_v10 = vrot.slane %v1557_v5, 7 }
  0x87   : > { %v1548_v2 = vpop.permute.xlu0 %643  ;;  %601 = vrot.lane.b32.xlu0 %v597_v1, %s1334_s30 }
  0x88   : > { %v1572_v11 = vmul.f32 0.0, %v1548_v2  ;;  %v1578_v13 = vpop.permute.xlu1 %673 }
  0x89   : > { %v1581_v14 = vmul.f32 0.0, %v1578_v13 }
  0x8a   : > { %v655_v15 = vrot.slane %v1572_v11, 2 }
  0x8b   : > { %v1554_v4 = vpop.permute.xlu0 %703  ;;  %v684_v17 = vrot.slane %v1581_v14, 6 }
  0x8c   : > { %v1588_v16 = vmul.f32 0.0, %v1554_v4  ;;  %v1601_v19 = vpop.permute.xlu1 %751 }
  0x8d   : > { %v1604_v20 = vmul.f32 0.0, %v1601_v19 }
  0x8e   : > { %v714_v18 = vrot.slane %v1588_v16, 7  ;;  %v864_v16 = vld [vmem:[#allocation2 + $0x40] sm:$0xff] }
  0x8f   : > { %v1559_v6 = vpop.permute.xlu0 %732  ;;  %v762_v33 = vrot.slane %v1604_v20, 1 }
  0x90   : > { %v735_v8 = vmul.f32 0.0, %v1559_v6  ;;  %v1606_v23 = vpop.permute.xlu1 %780 }
  0x91   : > { %v1613_v29 = vmul.f32 0.0, %v1606_v23 }
  0x92   : > { %739 = vrot.lane.b32.xlu0 %v735_v8, %s1333_s29  ;;  %v820_v8 = vrot.slane %v1464_v21, %v1471_v25 }
  0x93   : > { %v871_v28 = vpop.permute.xlu0 %870  ;;  %v791_v41 = vrot.slane %v1613_v29, 2 }
  0x94   : > { %v874_v30 = vmul.f32 %v871_v28, %v1608_v24  ;;  %v876_v32 = vmul.f32 %v871_v28, %v1610_v27  ;;  %v901_v35 = vpop.permute.xlu1 %900  ;;  %v821_v25 = vmul.f32 0.0, %v820_v8 }
  0x95   : > { %v904_v37 = vmul.f32 %v901_v35, %v1608_v24  ;;  %v906_v38 = vmul.f32 %v901_v35, %v1610_v27 }
  0x96   : > { %552 = vrot.lane.b32.xlu0 %v546_v7, %s1334_s30  ;;  %v884_v39 = vrot.slane %v874_v30, 6  ;;  %v885_v40 = vrot.slane %v876_v32, 6  ;;  %v873_v30 = vmul.f32 0.0, %v871_v28 }
  0x97   : > { %v914_v43 = vrot.slane %v904_v37, 7  ;;  %v915_v44 = vrot.slane %v906_v38, 7  ;;  %v1631_v46 = vpop.permute.xlu0 %948 }
  0x98   : > { %v886_v42 = vsel %vm545_vm2, %v884_v39, %v885_v40  ;;  %v841_v40 = vmul.f32 0.0, %v1490_v36 }
  0x99   : > { %889 = vrot.lane.b32.xlu1 %v886_v42, %s1332_s28  ;;  %v916_v45 = vsel %vm575_vm3, %v914_v43, %v915_v44  ;;  %v903_v42 = vmul.f32 0.0, %v901_v35  ;;  %v953_v43 = vmul.f32 0.0, %v1631_v46 }
  0x9a   : > { %582 = vrot.lane.b32.xlu0 %v576_v10, %s1334_s30 }
  0x9b   : > { %v1633_v47 = vpop.permute.xlu0 %977 }
  0x9d   : > { %919 = vrot.lane.b32.xlu1 %v916_v45, %s1332_s28 }
  0x9e   : > { %631 = vrot.lane.b32.xlu0 %v625_v12, %s1334_s30 }
  0x9f   : > { %v1638_v49 = vpop.permute.xlu0 %1036 }
  0xa2   : > { %661 = vrot.lane.b32.xlu0 %v655_v15, %s1334_s30 }
  0xa6   : > { %690 = vrot.lane.b32.xlu0 %v684_v17, %s1333_s29 }
  0xaa   : > { %720 = vrot.lane.b32.xlu0 %v714_v18, %s1333_s29 }
  0xae   : > { %768 = vrot.lane.b32.xlu0 %v762_v33, %s1333_s29 }
  0xb2   : > { %797 = vrot.lane.b32.xlu0 %v791_v41, %s1333_s29 }
  0xf9   : > { %v382_v57 = vpop.f32.mrb[0].mxu0 }
  0xfa   : > { %v1539_v58 = vadd.f32 %v1206_v54, %v382_v57  ;;  %v1265_v59 = vpop.f32.mrb[1].mxu0  ;;  %v1642_v54 = vpop.permute.xlu1 %929 }
  0xfb   : > { %v385_v60 = vpop.f32.mrb[2].mxu0 }
  0xfc   : > { %v1266_v61 = vpop.f32.mrb[3].mxu0  ;;  %v388_v62 = vpack.c.bf16 %v1539_v58, %v1539_v58 }
  0xfd   : > { %v1648_v61 = vpop.permute.xlu0 %1065 }
  0xfe   : > { %1284 = vmatmul.mubr.bf16.vlgmr.msra.gmra.mrb[0].mxu1 %v388_v62 }
 0x1d1   : > { %v494_v50 = vpop.f32.mrb[0].mxu1 }
 0x1d2   : > { %v1640_v51 = vadd.f32 %v1215_v48, %v494_v50  ;;  %v1285_v52 = vpop.f32.mrb[1].mxu1 }
 0x1d3   : > { %v497_v53 = vpop.f32.mrb[2].mxu1  ;;  %v845_v52 = vrot.slane %v841_v40, 1 }
 0x1d4   : > { %v1286_v57 = vpop.f32.mrb[3].mxu1  ;;  %v932_v59 = vmul.f32 %v1642_v54, %v1640_v51  ;;  %v598_v60 = vmul.f32 %v1545_v0, %v1640_v51  ;;  %v875_v62 = vmul.f32 %v871_v28, %v1640_v51  ;;  %v540_v1 = vmul.f32 %v1535_v55, %v1640_v51 }
 0x1d5   : > { %v1068_v32 = vmul.f32 %v1648_v61, %v1640_v51  ;;  %v736_v0 = vmul.f32 %v1559_v6, %v1640_v51  ;;  %v905_v39 = vmul.f32 %v901_v35, %v1640_v51  ;;  %v570_v55 = vmul.f32 %v1543_v63, %v1640_v51 }
 0x1d6   : > { %936 = vrot.lane.b32.xlu0 %v932_v59, %s1332_s28  ;;  %603 = vrot.lane.b32.xlu1 %v598_v60, %s1334_s30  ;;  %v882_v37 = vrot.slane %v875_v62, 6  ;;  %v550_v38 = vrot.slane %v540_v1, 6  ;;  %v881_v28 = vrot.slane %v873_v30, 6  ;;  %v854_v6 = vmul.f32 0.0, %v1481_v31 }
 0x1d7   : > { %v951_v44 = vmul.f32 %v1631_v46, %v1640_v51  ;;  %v617_v45 = vmul.f32 %v1537_v56, %v1640_v51  ;;  %v912_v48 = vrot.slane %v905_v39, 7  ;;  %v580_v50 = vrot.slane %v570_v55, 7 }
 0x1d8   : > { %v883_v63 = vsel %vm545_vm2, %v881_v28, %v882_v37  ;;  %v551_v35 = vsel %vm545_vm2, %v546_v7, %v550_v38  ;;  %v982_v53 = vmul.f32 0.0, %v1633_v47  ;;  %v911_v57 = vrot.slane %v903_v42, 7 }
 0x1d9   : > { %v960_v59 = vrot.slane %v953_v43, 1  ;;  %v980_v56 = vmul.f32 %v1633_v47, %v1640_v51  ;;  %v822_v60 = vmul.f32 %v820_v8, %v1640_v51  ;;  %v825_v62 = vrot.slane %v821_v25, 7 }
 0x1da   : > { %1072 = vrot.lane.b32.xlu0 %v1068_v32, %s1331_s27  ;;  %741 = vrot.lane.b32.xlu1 %v736_v0, %s1333_s29  ;;  %v858_v3 = vrot.slane %v854_v6, 2  ;;  %v959_v1 = vrot.slane %v951_v44, 1  ;;  %v628_v7 = vrot.slane %v617_v45, 1  ;;  %v647_v30 = vmul.f32 %v1548_v2, %v1640_v51  ;;  %v1687_v0 = vpop.permute.xlu1 %1006 }
 0x1db   : > { %v840_v32 = vmul.f32 %v1490_v36, %v1640_v51  ;;  %v913_v37 = vsel %vm575_vm3, %v911_v57, %v912_v48  ;;  %v581_v38 = vsel %vm575_vm3, %v576_v10, %v580_v50  ;;  %v826_v39 = vrot.slane %v822_v60, 7 }
 0x1dc   : > { %v853_v8 = vmul.f32 %v1481_v31, %v1640_v51  ;;  %v1009_v55 = vmul.f32 0.0, %v1687_v0  ;;  %v989_v36 = vrot.slane %v982_v53, 2  ;;  %v1011_v5 = vmul.f32 %v1687_v0, %v1640_v51 }
 0x1dd   : > { %v844_v2 = vrot.slane %v840_v32, 1  ;;  %v1699_v40 = vsel %vm575_vm3, %v825_v62, %v826_v39  ;;  %v988_v10 = vrot.slane %v980_v56, 2  ;;  %v658_v43 = vrot.slane %v647_v30, 2 }
 0x1de   : > { %887 = vrot.lane.b32.xlu0 %v883_v63, %s1332_s28  ;;  %554 = vrot.lane.b32.xlu1 %v551_v35, %s1334_s30  ;;  %v857_v42 = vrot.slane %v853_v8, 2  ;;  %v961_v31 = vsel %vm624_vm4, %v959_v1, %v960_v59  ;;  %v630_v28 = vsel %vm624_vm4, %v628_v7, %v625_v12  ;;  %v679_v6 = vmul.f32 %v1578_v13, %v1640_v51  ;;  %v1717_v45 = vpop.permute.xlu1 %1084 }
 0x1df   : > { %v1704_v25 = vsel %vm624_vm4, %v844_v2, %v845_v52  ;;  %v1039_v63 = vmul.f32 0.0, %v1638_v49  ;;  %v1041_v35 = vmul.f32 %v1638_v49, %v1640_v51  ;;  %v990_v9 = vsel %vm654_vm5, %v988_v10, %v989_v36 }
 0x1e0   : > { %v1713_v44 = vsel %vm654_vm5, %v857_v42, %v858_v3  ;;  %v1017_v12 = vrot.slane %v1009_v55, 6  ;;  %v660_v13 = vsel %vm654_vm5, %v658_v43, %v655_v15  ;;  %v1018_v48 = vrot.slane %v1011_v5, 6 }
 0x1e1   : > { %v688_v50 = vrot.slane %v679_v6, 6  ;;  %v709_v52 = vmul.f32 %v1554_v4, %v1640_v51  ;;  %v1087_v53 = vmul.f32 %v1717_v45, %v1640_v51  ;;  %v1089_v57 = vmul.f32 0.0, %v1717_v45 }
 0x1e2   : > { %917 = vrot.lane.b32.xlu0 %v913_v37, %s1332_s28  ;;  %584 = vrot.lane.b32.xlu1 %v581_v38, %s1334_s30  ;;  %v1047_v59 = vrot.slane %v1039_v63, 7  ;;  %v1048_v56 = vrot.slane %v1041_v35, 7  ;;  %v1114_v60 = vpop.permute.xlu1 %1113  ;;  %v1019_v11 = vsel %vm545_vm2, %v1017_v12, %v1018_v48  ;;  %v755_v4 = vmul.f32 %v1601_v19, %v1640_v51 }
 0x1e3   : > { %v689_v15 = vsel %vm545_vm2, %v684_v17, %v688_v50  ;;  %v718_v62 = vrot.slane %v709_v52, 7  ;;  %v1116_v3 = vmul.f32 %v1114_v60, %v1640_v51  ;;  %v1118_v1 = vmul.f32 0.0, %v1114_v60 }
 0x1e4   : > { %v1095_v7 = vrot.slane %v1087_v53, 1  ;;  %v1096_v30 = vrot.slane %v1089_v57, 1  ;;  %v1049_v32 = vsel %vm575_vm3, %v1047_v59, %v1048_v56  ;;  %v765_v17 = vrot.slane %v755_v4, 1 }
 0x1e5   : > { %v719_v14 = vsel %vm575_vm3, %v714_v18, %v718_v62  ;;  %v784_v37 = vmul.f32 %v1606_v23, %v1640_v51  ;;  %v1125_v19 = vrot.slane %v1118_v1, 2  ;;  %v1124_v8 = vrot.slane %v1116_v3, 2 }
 0x1e6   : > { %965 = vrot.lane.b32.xlu0 %v961_v31, %s1332_s28  ;;  %633 = vrot.lane.b32.xlu1 %v630_v28, %s1334_s30  ;;  %v1097_v38 = vsel %vm624_vm4, %v1095_v7, %v1096_v30  ;;  %v767_v39 = vsel %vm624_vm4, %v765_v17, %v762_v33  ;;  %v952_v18 = vmul.f32 %v1631_v46, %v1610_v27  ;;  %v890_v1 = vpop.permute.xlu1 %889 }
 0x1e7   : > { %v794_v2 = vrot.slane %v784_v37, 2  ;;  %v954_v23 = vmul.f32 %v1631_v46, %v864_v16  ;;  %v1126_v55 = vsel %vm654_vm5, %v1124_v8, %v1125_v19  ;;  %v933_v33 = vmul.f32 %v1642_v54, %v1610_v27  ;;  %v1224_v19 = vld [vmem:[%s1853_s6] ss:$0 sm:$0xff] }
 0x1e8   : > { %v981_v36 = vmul.f32 %v1633_v47, %v1610_v27  ;;  %v983_v42 = vmul.f32 %v1633_v47, %v864_v16  ;;  %v962_v5 = vrot.slane %v952_v18, 1  ;;  %v1010_v29 = vmul.f32 %v1687_v0, %v1608_v24 }
 0x1e9   : > { %v796_v20 = vsel %vm654_vm5, %v794_v2, %v791_v41  ;;  %v963_v46 = vrot.slane %v954_v23, 1  ;;  %v1012_v41 = vmul.f32 %v1687_v0, %v1610_v27  ;;  %v1040_v47 = vmul.f32 %v1638_v49, %v1608_v24 }
 0x1ea   : > { %994 = vrot.lane.b32.xlu0 %v990_v9, %s1332_s28  ;;  %663 = vrot.lane.b32.xlu1 %v660_v13, %s1334_s30  ;;  %v991_v43 = vrot.slane %v981_v36, 2  ;;  %v992_v31 = vrot.slane %v983_v42, 2  ;;  %v1020_v54 = vrot.slane %v1010_v29, 6  ;;  %v1042_v6 = vmul.f32 %v1638_v49, %v1610_v27 }
 0x1eb   : > { %v964_v10 = vsel %vm624_vm4, %v962_v5, %v963_v46  ;;  %v1021_v28 = vrot.slane %v1012_v41, 6  ;;  %v1050_v35 = vrot.slane %v1040_v47, 7  ;;  %v1088_v12 = vmul.f32 %v1717_v45, %v1610_v27 }
 0x1ec   : > { %v993_v63 = vsel %vm654_vm5, %v991_v43, %v992_v31  ;;  %v1051_v9 = vrot.slane %v1042_v6, 7  ;;  %v1090_v13 = vmul.f32 %v1717_v45, %v864_v16  ;;  %v1117_v49 = vmul.f32 %v1114_v60, %v1610_v27 }
 0x1ed   : > { %v1022_v0 = vsel %vm545_vm2, %v1020_v54, %v1021_v28  ;;  %v1119_v48 = vmul.f32 %v1114_v60, %v864_v16  ;;  %v1098_v50 = vrot.slane %v1088_v12, 1  ;;  %v1069_v53 = vmul.f32 %v1648_v61, %v1610_v27  ;;  %v1798_v61 = vpop.permute.xlu1 %919 }
 0x1ee   : > { %1023 = vrot.lane.b32.xlu0 %v1019_v11, %s1331_s27  ;;  %692 = vrot.lane.b32.xlu1 %v689_v15, %s1333_s29  ;;  %v1052_v24 = vsel %vm575_vm3, %v1050_v35, %v1051_v9  ;;  %v1099_v52 = vrot.slane %v1090_v13, 1  ;;  %v1127_v59 = vrot.slane %v1117_v49, 2  ;;  %v602_v11 = vpop.permute.xlu0 %601  ;;  %v807_v31 = vrot.slane %v1464_v21, %v1473_v26 }
 0x1ef   : > { %v1128_v56 = vrot.slane %v1119_v48, 2 }
 0x1f0   : > { %v1100_v57 = vsel %vm624_vm4, %v1098_v50, %v1099_v52  ;;  %v809_v35 = vmul.f32 %v807_v31, %v1640_v51 }
 0x1f1   : > { %v1129_v45 = vsel %vm654_vm5, %v1127_v59, %v1128_v56 }
 0x1f2   : > { %1053 = vrot.lane.b32.xlu0 %v1049_v32, %s1331_s27  ;;  %722 = vrot.lane.b32.xlu1 %v719_v14, %s1333_s29  ;;  %v740_v15 = vpop.permute.xlu0 %739  ;;  %v813_v48 = vrot.slane %v809_v35, 6 }
 0x1f6   : > { %1101 = vrot.lane.b32.xlu0 %v1097_v38, %s1331_s27  ;;  %770 = vrot.lane.b32.xlu1 %v767_v39, %s1333_s29  ;;  %v553_v60 = vpop.permute.xlu0 %552 }
 0x1fa   : > { %1130 = vrot.lane.b32.xlu0 %v1126_v55, %s1331_s27  ;;  %799 = vrot.lane.b32.xlu1 %v796_v20, %s1333_s29  ;;  %v583_v62 = vpop.permute.xlu0 %582 }
 0x1fe   : > { %938 = vrot.lane.b32.xlu1 %v933_v33, %s1332_s28  ;;  %v632_v4 = vpop.permute.xlu0 %631 }
 0x202   : > { %967 = vrot.lane.b32.xlu1 %v964_v10, %s1332_s28  ;;  %v662_v3 = vpop.permute.xlu0 %661 }
 0x206   : > { %996 = vrot.lane.b32.xlu1 %v993_v63, %s1332_s28  ;;  %v691_v27 = vpop.permute.xlu0 %690 }
 0x20a   : > { %1025 = vrot.lane.b32.xlu1 %v1022_v0, %s1331_s27  ;;  %v721_v7 = vpop.permute.xlu0 %720  ;;  %v808_v0 = vmul.f32 0.0, %v807_v31 }
 0x20c   : > { %v812_v49 = vrot.slane %v808_v0, 6 }
 0x20e   : > { %1055 = vrot.lane.b32.xlu1 %v1052_v24, %s1331_s27  ;;  %v769_v32 = vpop.permute.xlu0 %768  ;;  %v814_v59 = vsel %vm545_vm2, %v812_v49, %v813_v48 }
 0x212   : > { %1074 = vrot.lane.b32.xlu1 %v1069_v53, %s1331_s27  ;;  %v798_v37 = vpop.permute.xlu0 %797  ;;  %v833_v53 = vrot.slane %v1469_v22, %v1486_v34 }
 0x216   : > { %1103 = vrot.lane.b32.xlu1 %v1100_v57, %s1331_s27 }
 0x21a   : > { %1132 = vrot.lane.b32.xlu1 %v1129_v45, %s1331_s27 }
 0x248   : > { %v604_v30 = vpop.permute.xlu1 %603  ;;  %v937_v2 = vpop.permute.xlu0 %936 }
 0x249   : > { %v605_v55 = vsel %vm502_vm1, %v602_v11, %v604_v30  ;;  %v834_v11 = vmul.f32 %v833_v53, %v1640_v51 }
 0x24c   : > { %v742_v14 = vpop.permute.xlu1 %741  ;;  %v1806_v20 = vpop.permute.xlu0 %1072 }
 0x24d   : > { %v743_v63 = vsel %vm694_vm6, %v740_v15, %v742_v14 }
 0x250   : > { %v555_v17 = vpop.permute.xlu1 %554  ;;  %v888_v10 = vpop.permute.xlu0 %887 }
 0x251   : > { %v556_v38 = vsel %vm502_vm1, %v553_v60, %v555_v17  ;;  %v892_v22 = vsel %vm891_vm7, %v888_v10, %v890_v1 }
 0x252   : > { %v558_v16 = vadd.f32 %v1224_v19, %v556_v38 }
 0x254   : > { %v585_v39 = vpop.permute.xlu1 %584  ;;  %v918_v9 = vpop.permute.xlu0 %917 }
 0x255   : > { %v586_v8 = vsel %vm502_vm1, %v583_v62, %v585_v39 }
 0x256   : > { %v588_v18 = vadd.f32 %v586_v8, %v558_v16 }
 0x258   : > { %v634_v23 = vpop.permute.xlu1 %633  ;;  %v607_v33 = vadd.f32 %v605_v55, %v588_v18  ;;  %v966_v26 = vpop.permute.xlu0 %965 }
 0x259   : > { %v635_v42 = vsel %vm502_vm1, %v632_v4, %v634_v23 }
 0x25a   : > { %v637_v46 = vadd.f32 %v635_v42, %v607_v33 }
 0x25c   : > { %v664_v36 = vpop.permute.xlu1 %663  ;;  %v995_v60 = vpop.permute.xlu0 %994 }
 0x25d   : > { %v665_v5 = vsel %vm502_vm1, %v662_v3, %v664_v36 }
 0x25e   : > { %v667_v43 = vadd.f32 %v665_v5, %v637_v46 }
 0x260   : > { %v693_v29 = vpop.permute.xlu1 %692  ;;  %v1024_v34 = vpop.permute.xlu0 %1023 }
 0x261   : > { %v695_v41 = vsel %vm694_vm6, %v691_v27, %v693_v29 }
 0x262   : > { %v697_v54 = vadd.f32 %v695_v41, %v667_v43 }
 0x264   : > { %v723_v28 = vpop.permute.xlu1 %722  ;;  %v1054_v19 = vpop.permute.xlu0 %1053 }
 0x265   : > { %v724_v47 = vsel %vm694_vm6, %v721_v7, %v723_v28 }
 0x266   : > { %v726_v6 = vadd.f32 %v724_v47, %v697_v54 }
 0x268   : > { %v745_v12 = vadd.f32 %v743_v63, %v726_v6  ;;  %v771_v13 = vpop.permute.xlu1 %770  ;;  %v1102_v18 = vpop.permute.xlu0 %1101 }
 0x269   : > { %v772_v24 = vsel %vm694_vm6, %v769_v32, %v771_v13  ;;  %v921_v32 = vsel %vm891_vm7, %v918_v9, %v1798_v61 }
 0x26a   : > { %v774_v50 = vadd.f32 %v772_v24, %v745_v12 }
 0x26c   : > { %v800_v52 = vpop.permute.xlu1 %799  ;;  %v1131_v42 = vpop.permute.xlu0 %1130 }
 0x26d   : > { %v801_v21 = vsel %vm694_vm6, %v798_v37, %v800_v52 }
 0x26e   : > { %v803_v57 = vadd.f32 %v801_v21, %v774_v50 }
 0x270   : > { %v816_v56 = vadd.f32 %v814_v59, %v803_v57  ;;  %v939_v45 = vpop.permute.xlu1 %938 }
 0x272   : > { %v829_v15 = vadd.f32 %v1699_v40, %v816_v56  ;;  %v940_v40 = vsel %vm891_vm7, %v937_v2, %v939_v45 }
 0x274   : > { %v835_v62 = vadd.f32 %v834_v11, %v829_v15  ;;  %v968_v4 = vpop.permute.xlu1 %967 }
 0x275   : > { %v969_v37 = vsel %vm891_vm7, %v966_v26, %v968_v4 }
 0x276   : > { %v848_v3 = vadd.f32 %v1704_v25, %v835_v62 }
 0x278   : > { %v861_v27 = vadd.f32 %v1713_v44, %v848_v3  ;;  %v997_v7 = vpop.permute.xlu1 %996 }
 0x279   : > { %v998_v44 = vsel %vm891_vm7, %v995_v60, %v997_v7 }
 0x27a   : > { %v894_v30 = vadd.f32 %v892_v22, %v861_v27 }
 0x27c   : > { %v923_v14 = vadd.f32 %v921_v32, %v894_v30  ;;  %v1026_v51 = vpop.permute.xlu1 %1025 }
 0x27d   : > { %v1028_v1 = vsel %vm1027_vm8, %v1024_v34, %v1026_v51 }
 0x27e   : > { %v942_v17 = vadd.f32 %v940_v40, %v923_v14 }
 0x280   : > { %v971_v38 = vadd.f32 %v969_v37, %v942_v17  ;;  %v1056_v25 = vpop.permute.xlu1 %1055 }
 0x281   : > { %v1057_v61 = vsel %vm1027_vm8, %v1054_v19, %v1056_v25 }
 0x282   : > { %v1000_v39 = vadd.f32 %v998_v44, %v971_v38 }
 0x284   : > { %v1030_v8 = vadd.f32 %v1028_v1, %v1000_v39  ;;  %v1075_v16 = vpop.permute.xlu1 %1074 }
 0x285   : > { %v1076_v2 = vsel %vm1027_vm8, %v1806_v20, %v1075_v16 }
 0x286   : > { %v1059_v23 = vadd.f32 %v1057_v61, %v1030_v8 }
 0x288   : > { %v1078_v55 = vadd.f32 %v1076_v2, %v1059_v23  ;;  %v1104_v33 = vpop.permute.xlu1 %1103 }
 0x289   : > { %v1105_v36 = vsel %vm1027_vm8, %v1102_v18, %v1104_v33 }
 0x28a   : > { %v1107_v5 = vadd.f32 %v1105_v36, %v1078_v55 }
 0x28c   : > { %v1133_v46 = vpop.permute.xlu1 %1132 }
 0x28d   : > { %v1134_v29 = vsel %vm1027_vm8, %v1131_v42, %v1133_v46 }
 0x28e   : > { %v1136_v41 = vadd.f32 %v1134_v29, %v1107_v5 }
 0x290   : > { %v1226_v10 = vmul.f32 -1.442695, %v1136_v41 }
 0x292   : > { %1317 = vpow2.f32 %v1226_v10 }
 0x29c   : > { %v1318_v43 = vpop.eup %1317 }
 0x29d   : > { %v1140_v31 = vadd.f32 1.0, %v1318_v43 }
 0x29f   : > { %1319 = vrcp.f32 %v1140_v31 }
 0x2a9   : > { %v1320_v54 = vpop.eup %1319 }
 0x2aa   : > { %v1143_v28 = vmul.f32 %v1320_v54, %v1539_v58 }
 0x2ac   : > { %v1144_v20 = vadd.f32 %v1143_v28, %v1539_v58 }
 0x2ae   : > { %1145 = vst [vmem:[%s273_s18] sm:$0xff] %v1144_v20 }
 0x2af PF: > { %s17_s24 = sadd.s32 1, %s1327_s24  }
 0x2b0   : > { %p14_p4 = scmp.ge.s32.totalorder %s17_s24, 4  }
 0x2b2   :  { %16 = sbr.rel (!%p14_p4) target bundleno = 1 (0x1), region = 78 }

// kernel: _forward_impl.5
= control target key start
LH: loop header
LB: loop body
LE: loop exit
PB: predicated region body
PF: predicated region fallthrough
CT: control target
= control target key end

     0   :  { %s3991_s0 = inlined_call_operand.vmem [shape: f32[2,64,48], index: 0, kind: input, shape index: {}]   ;;  %s3992_s1 = inlined_call_operand.vmem [shape: f32[2,64,16], index: 1, kind: input, shape index: {}]   ;;  %s3993_s2 = inlined_call_operand.vmem [shape: f32[4,16], index: 2, kind: input, shape index: {}]   ;;  %s3994_s3 = inlined_call_operand.vmem [shape: f32[1,16], index: 3, kind: input, shape index: {}]   ;;  %s3995_s4 = inlined_call_operand.vmem [shape: bf16[16,128], index: 4, kind: input, shape index: {}]   ;;  %s3996_s5 = inlined_call_operand.vmem [shape: f32[1,128], index: 5, kind: input, shape index: {}]   ;;  %s3997_s6 = inlined_call_operand.vmem [shape: bf16[16,128], index: 6, kind: input, shape index: {}]   ;;  %s3998_s7 = inlined_call_operand.vmem [shape: bf16[16,128], index: 7, kind: input, shape index: {}]   ;;  %s3999_s8 = inlined_call_operand.vmem [shape: f32[1,128], index: 8, kind: input, shape index: {}]   ;;  %s4000_s9 = inlined_call_operand.vmem [shape: bf16[128,16], index: 9, kind: input, shape index: {}]   ;;  %s4001_s10 = inlined_call_operand.vmem [shape: f32[1,16], index: 10, kind: input, shape index: {}]   ;;  %s4002_s11 = inlined_call_operand.vmem [shape: f32[1,16], index: 11, kind: input, shape index: {}]   ;;  %s4003_s12 = inlined_call_operand.vmem [shape: bf16[16,16], index: 12, kind: input, shape index: {}]   ;;  %s4004_s13 = inlined_call_operand.vmem [shape: bf16[16,16], index: 13, kind: input, shape index: {}]   ;;  %s4005_s14 = inlined_call_operand.hbm [shape: f32[2,64,16], index: 14, kind: output, shape index: {}]  }
   0x1   :  { %4018 = sst [smem:[#allocation25_spill]] %s3991_s0 }
   0x2   :  { %4019 = sst [smem:[#allocation26_spill]] %s3992_s1 }
   0x3   :  { %19 = vsyncpa [#allocation5], 0 }
   0x4   :  { %21 = vsyncpa [#allocation5 + $0x1], 0  ;;  %s2843_s29 = smov 0   ;;  %s2845_s30 = smov 0  }
   0x5   :  { %s2847_s15 = smov 0   ;;  %s2849_s16 = smov 0  }
   0x6 LB: > { %s2864_s17 = sadd.s32 4294967295, %s2755_s16   ;;  %s2310_s18 = sadd.s32 4294967294, %s2755_s16   ;;  %s2755_s16 = sphi %s2849_s16, %s4088_s16   ;;  %s2751_s15 = sphi %s2847_s15, %s4087_s15   ;;  %s2747_s30 = sphi %s2845_s30, %s4086_s30   ;;  %s2743_s29 = sphi %s2843_s29, %s4085_s29  }
   0x7   : > { %s2868_s19 = sadd.s32 1, %s2755_s16   ;;  %s338_s20 = sadd.s32 1, %s2751_s15 }
   0x8   : > { %s335_s21 = ssub.s32 %s2755_s16, %s2868_s19  ;;  %p348_p0 = scmp.ne.s32.totalorder %s2751_s15, %s2747_s30 }
   0x9   : > { %p336_p1 = scmp.eq.s32.totalorder %s335_s21, 0  ;;  %p349_p2 = scmp.eq.s32.totalorder %s2864_s17, 1 }
   0xa   : > { %p354_p3 = scmp.ne.s32.totalorder %s2747_s30, %s2743_s29  ;;  %p355_p4 = scmp.eq.s32.totalorder %s2310_s18, 1 }
   0xb   : > { %s2879_s22 = scalar_select %p336_p1, %s2751_s15, %s338_s20  }
   0xc   : > { %p2881_p5 = por %p349_p2, %p348_p0  ;;  %p2885_p6 = por %p355_p4, %p354_p3 }
   0xd   : > { %4020 = sst [smem:[#allocation7_spill]] %s2879_s22  ;;  %p2313_p7 = scmp.ge.s32.totalorder %s2755_s16, 1 }
   0xe   : > { %p425_p8 = scmp.lt.s32.totalorder %s2755_s16, 3 }
  0x10   : > { %p426_p9 = pnand %p2313_p7, %p425_p8 }
  0x12   : > { %429 = sbr.rel (%p426_p9) target bundleno = 1386 (0x56a), region = 76 }
  0x19   : > { %p476_p10 = scmp.lt.s32.totalorder %s2864_s17, 1  ;;  %vm495_vm0 = vcmask 130048   ;;  %v2757_v0 = vmov 0.0   ;;  %s4023_s0 = sld [smem:[#allocation25_spill]]  ;;  %v2543_v9 = vld [vmem:[%s3995_s4] sm:$0xff]   ;;  %v554_v12 = vlaneseq  ;;  %vm1260_vm1 = vcmask 261120  }
  0x1a   : > { %496 = vst.msk [vmem:[#allocation2] sm:$0xff] %vm495_vm0, %v2757_v0  ;;  %s2758_s20 = smov 112   ;;  %2418 = vmatprep.subr.bf16.mxu0 %v2543_v9  ;;  %2492 = vmatprep.subr.bf16.mxu1 %v2543_v9  ;;  %v2950_v10 = vld [vmem:[%s3998_s7] sm:$0xff]   ;;  %s2759_s27 = smov 32   ;;  %vm1269_vm2 = vcmask 392192   ;;  %vm1278_vm3 = vcmask 523264  }
  0x1b   : > { %s2894_s25 = scalar_select %p476_p10, %s2864_s17, 1  ;;  %2419 = vmatpush3.bf16.msra.mxu0 %v2543_v9  ;;  %2493 = vmatpush3.bf16.msra.mxu1 %v2543_v9  ;;  %v2956_v11 = vld [vmem:[%s3997_s6] sm:$0xff]   ;;  %v2959_v13 = vshrl.u32 %v554_v12, 7  ;;  %vm1287_vm4 = vcmask 654336   ;;  %vm1296_vm5 = vcmask 785408   ;;  %vm1305_vm6 = vcmask 916480  }
  0x1c   : > { %2438 = vmatprep.subr.bf16.mxu0 %v2950_v10  ;;  %2428 = vmatprep.subr.bf16.mxu1 %v2956_v11  ;;  %v537_v17 = vld [vmem:[%s3993_s2] sm:$0xf]  ;;  %s2760_s28 = smov 16   ;;  %s2762_s21 = smov 48   ;;  %vm1364_vm13 = vcmask 1040384   ;;  %vm1376_vm15 = vcmask 1041408  }
  0x1d   : > { %s4006_s26 = sshll.u32 %s2894_s25, 6  ;;  %4025 = vst [vmem:[#allocation9_spill] sm:$0xff] %v2959_v13  ;;  %v556_v16 = vsub.s32 0, %v2959_v13  ;;  %v584_v18 = vsub.s32 1, %v2959_v13  ;;  %v640_v19 = vsub.s32 3, %v2959_v13  ;;  %v612_v20 = vsub.s32 2, %v2959_v13 }
  0x1e   : > { %v2981_v26 = vld [vmem:[%s3994_s3] ss:$0 sm:$0xff]  ;;  %s2764_s22 = smov 80   ;;  %s4083_s1 = sld [smem:[#allocation26_spill]] }
  0x1f   : > { %s2902_s18 = scalar_lea.vmem %s4023_s0, %s4006_s26  ;;  %v2970_v23 = vrot.slane %v537_v17, %v556_v16  ;;  %v2974_v24 = vrot.slane %v537_v17, %v584_v18  ;;  %v2976_v25 = vrot.slane %v537_v17, %v640_v19  ;;  %v2983_v27 = vrot.slane %v537_v17, %v612_v20  ;;  %s2761_s26 = smov 64  }
  0x20   : > { %v2905_v1 = vld [vmem:[%s2902_s18 + $0x10] sm:$0xff]  ;;  %v2908_v2 = vld [vmem:[%s2902_s18] sm:$0xff]  ;;  %v2915_v3 = vld [vmem:[%s2902_s18 + $0x18] sm:$0xff]  ;;  %s2763_s0 = smov 96  }
  0x21   : > { %509 = vrot.lane.b32.xlu1 %v2905_v1, %s2758_s20  ;;  %505 = vrot.lane.b32.xlu0 %v2908_v2, %s2758_s20  ;;  %v2918_v4 = vld [vmem:[%s2902_s18 + $0x8] sm:$0xff]  ;;  %v2928_v6 = vld [vmem:[%s2902_s18 + $0x20] sm:$0xff] }
  0x22   : > { %v2921_v5 = vld [vmem:[%s2902_s18 + $0x28] sm:$0xff]  ;;  %v2931_v7 = vld [vmem:[%s2902_s18 + $0x38] sm:$0xff]  ;;  %v2934_v8 = vld [vmem:[%s2902_s18 + $0x30] sm:$0xff] }
  0x23   : > { %4024 = vst [vmem:[#allocation8_spill] sm:$0xff] %v2934_v8 }
  0x25   : > { %511 = vrot.lane.b32.xlu1 %v2915_v3, %s2758_s20  ;;  %507 = vrot.lane.b32.xlu0 %v2918_v4, %s2758_s20 }
  0x29   : > { %515 = vrot.lane.b32.xlu1 %v2921_v5, %s2758_s20  ;;  %513 = vrot.lane.b32.xlu0 %v2928_v6, %s2758_s20 }
  0x2d   : > { %519 = vrot.lane.b32.xlu1 %v2931_v7, %s2758_s20  ;;  %517 = vrot.lane.b32.xlu0 %v2934_v8, %s2758_s20 }
  0x93   : > { %v510_v14 = vpop.permute.xlu1 %509  ;;  %v506_v15 = vpop.permute.xlu0 %505 }
  0x94   : > { %531 = vst.msk [vmem:[#allocation2 + $0x18] sm:$0xff] %vm495_vm0, %v510_v14  ;;  %529 = vst.msk [vmem:[#allocation2 + $0x8] sm:$0xff] %vm495_vm0, %v506_v15 }
  0x97   : > { %v512_v21 = vpop.permute.xlu1 %511  ;;  %v508_v22 = vpop.permute.xlu0 %507 }
  0x98   : > { %532 = vst.msk [vmem:[#allocation2 + $0x20] sm:$0xff] %vm495_vm0, %v512_v21  ;;  %530 = vst.msk [vmem:[#allocation2 + $0x10] sm:$0xff] %vm495_vm0, %v508_v22 }
  0x9b   : > { %v546_v28 = vld [vmem:[#allocation2 + $0x5] sm:$0xff]  ;;  %v516_v30 = vpop.permute.xlu1 %515  ;;  %v514_v31 = vpop.permute.xlu0 %513  ;;  %v632_v32 = vld [vmem:[#allocation2 + $0x18] sm:$0xff] }
  0x9c   : > { %v574_v29 = vld [vmem:[#allocation2 + $0x6] sm:$0xff]  ;;  %v558_v33 = vmul.f32 %v2970_v23, %v546_v28  ;;  %534 = vst.msk [vmem:[#allocation2 + $0x30] sm:$0xff] %vm495_vm0, %v516_v30  ;;  %533 = vst.msk [vmem:[#allocation2 + $0x28] sm:$0xff] %vm495_vm0, %v514_v31  ;;  %v2991_v38 = vmul.f32 %v2976_v25, %v632_v32 }
  0x9d   : > { %v602_v34 = vld [vmem:[#allocation2 + $0x7] sm:$0xff]  ;;  %v586_v37 = vmul.f32 %v2974_v24, %v574_v29 }
  0x9e   : > { %v630_v35 = vld [vmem:[#allocation2 + $0x8] sm:$0xff]  ;;  %v566_v36 = vadd.f32 %v2981_v26, %v558_v33  ;;  %v614_v39 = vmul.f32 %v2983_v27, %v602_v34 }
  0x9f   : > { %v549_v40 = vld [vmem:[#allocation2 + $0x1d] sm:$0xff]  ;;  %v520_v43 = vpop.permute.xlu1 %519  ;;  %v518_v44 = vpop.permute.xlu0 %517  ;;  %v642_v46 = vmul.f32 %v2976_v25, %v630_v35  ;;  %v547_v50 = vld [vmem:[#allocation2 + $0xd] sm:$0xff]  ;;  %v548_v51 = vld [vmem:[#allocation2 + $0x15] sm:$0xff] }
  0xa0   : > { %v577_v41 = vld [vmem:[#allocation2 + $0x1e] sm:$0xff]  ;;  %v594_v45 = vadd.f32 %v586_v37, %v566_v36  ;;  %v561_v47 = vmul.f32 %v2970_v23, %v549_v40  ;;  %536 = vst.msk [vmem:[#allocation2 + $0x40] sm:$0xff] %vm495_vm0, %v520_v43  ;;  %535 = vst.msk [vmem:[#allocation2 + $0x38] sm:$0xff] %vm495_vm0, %v518_v44  ;;  %v559_v54 = vmul.f32 %v2970_v23, %v547_v50  ;;  %v575_v56 = vld [vmem:[#allocation2 + $0xe] sm:$0xff] }
  0xa1   : > { %v605_v42 = vld [vmem:[#allocation2 + $0x1f] sm:$0xff]  ;;  %v589_v48 = vmul.f32 %v2974_v24, %v577_v41  ;;  %v560_v55 = vmul.f32 %v2970_v23, %v548_v51  ;;  %v576_v57 = vld [vmem:[#allocation2 + $0x16] sm:$0xff]  ;;  %v587_v61 = vmul.f32 %v2974_v24, %v575_v56 }
  0xa2   : > { %v633_v49 = vld [vmem:[#allocation2 + $0x20] sm:$0xff]  ;;  %v617_v52 = vmul.f32 %v2983_v27, %v605_v42  ;;  %v603_v58 = vld [vmem:[#allocation2 + $0xf] sm:$0xff]  ;;  %v622_v59 = vadd.f32 %v614_v39, %v594_v45  ;;  %v569_v60 = vadd.f32 %v2981_v26, %v561_v47  ;;  %v588_v62 = vmul.f32 %v2974_v24, %v576_v57  ;;  %v604_v63 = vld [vmem:[#allocation2 + $0x17] sm:$0xff] }
  0xa3   : > { %v645_v53 = vmul.f32 %v2976_v25, %v633_v49  ;;  %v631_v0 = vld [vmem:[#allocation2 + $0x10] sm:$0xff]  ;;  %v567_v9 = vadd.f32 %v2981_v26, %v559_v54  ;;  %v568_v12 = vadd.f32 %v2981_v26, %v560_v55  ;;  %v615_v14 = vmul.f32 %v2983_v27, %v603_v58  ;;  %v550_v17 = vld [vmem:[#allocation2 + $0x25] sm:$0xff] }
  0xa4   : > { %v616_v15 = vmul.f32 %v2983_v27, %v604_v63  ;;  %v635_v16 = vld [vmem:[#allocation2 + $0x30] sm:$0xff]  ;;  %v3010_v19 = vadd.f32 %v642_v46, %v622_v59  ;;  %v597_v20 = vadd.f32 %v589_v48, %v569_v60  ;;  %v643_v21 = vmul.f32 %v2976_v25, %v631_v0  ;;  %v578_v28 = vld [vmem:[#allocation2 + $0x26] sm:$0xff] }
  0xa5   : > { %v551_v18 = vld [vmem:[#allocation2 + $0x2d] sm:$0xff]  ;;  %v647_v22 = vmul.f32 %v2976_v25, %v635_v16  ;;  %v595_v30 = vadd.f32 %v587_v61, %v567_v9  ;;  %v596_v31 = vadd.f32 %v588_v62, %v568_v12  ;;  %v562_v32 = vmul.f32 %v2970_v23, %v550_v17 }
  0xa6   : > { %v579_v29 = vld [vmem:[#allocation2 + $0x2e] sm:$0xff]  ;;  %v563_v33 = vmul.f32 %v2970_v23, %v551_v18  ;;  %v2320_v36 = vmul.f32 -1.442695, %v3010_v19  ;;  %v625_v37 = vadd.f32 %v617_v52, %v597_v20  ;;  %v590_v39 = vmul.f32 %v2974_v24, %v578_v28 }
  0xa7   : > { %v606_v34 = vld [vmem:[#allocation2 + $0x27] sm:$0xff]  ;;  %v607_v35 = vld [vmem:[#allocation2 + $0x2f] sm:$0xff]  ;;  %v591_v40 = vmul.f32 %v2974_v24, %v579_v29  ;;  %v623_v41 = vadd.f32 %v615_v14, %v595_v30  ;;  %v624_v42 = vadd.f32 %v616_v15, %v596_v31  ;;  %v570_v43 = vadd.f32 %v2981_v26, %v562_v32  ;;  %v553_v55 = vld [vmem:[#allocation2 + $0x3d] sm:$0xff] }
  0xa8   : > { %v571_v44 = vadd.f32 %v2981_v26, %v563_v33  ;;  %v634_v45 = vld [vmem:[#allocation2 + $0x28] sm:$0xff]  ;;  %v552_v46 = vld [vmem:[#allocation2 + $0x35] sm:$0xff]  ;;  %2556 = vpow2.f32 %v2320_v36  ;;  %v3021_v47 = vadd.f32 %v645_v53, %v625_v37  ;;  %v618_v48 = vmul.f32 %v2983_v27, %v606_v34  ;;  %v581_v59 = vld [vmem:[#allocation2 + $0x3e] sm:$0xff] }
  0xa9   : > { %v619_v49 = vmul.f32 %v2983_v27, %v607_v35  ;;  %v3025_v50 = vadd.f32 %v643_v21, %v623_v41  ;;  %v3028_v51 = vadd.f32 %v2991_v38, %v624_v42  ;;  %v598_v52 = vadd.f32 %v590_v39, %v570_v43  ;;  %v580_v56 = vld [vmem:[#allocation2 + $0x36] sm:$0xff]  ;;  %v609_v14 = vld [vmem:[#allocation2 + $0x3f] sm:$0xff] }
  0xaa   : > { %v599_v54 = vadd.f32 %v591_v40, %v571_v44  ;;  %v2323_v57 = vmul.f32 -1.442695, %v3021_v47  ;;  %v646_v58 = vmul.f32 %v2976_v25, %v634_v45  ;;  %v564_v53 = vmul.f32 %v2970_v23, %v552_v46  ;;  %v608_v0 = vld [vmem:[#allocation2 + $0x37] sm:$0xff]  ;;  %v637_v18 = vld [vmem:[#allocation2 + $0x40] sm:$0xff] }
  0xab   : > { %v2321_v60 = vmul.f32 -1.442695, %v3025_v50  ;;  %v2322_v61 = vmul.f32 -1.442695, %v3028_v51  ;;  %v626_v62 = vadd.f32 %v618_v48, %v598_v52  ;;  %v565_v38 = vmul.f32 %v2970_v23, %v553_v55  ;;  %v636_v15 = vld [vmem:[#allocation2 + $0x38] sm:$0xff] }
  0xac   : > { %v627_v63 = vadd.f32 %v619_v49, %v599_v54  ;;  %2558 = vpow2.f32 %v2323_v57  ;;  %v572_v9 = vadd.f32 %v2981_v26, %v564_v53  ;;  %v592_v12 = vmul.f32 %v2974_v24, %v580_v56 }
  0xad   : > { %2560 = vpow2.f32 %v2321_v60  ;;  %v3038_v16 = vadd.f32 %v646_v58, %v626_v62  ;;  %v593_v20 = vmul.f32 %v2974_v24, %v581_v59  ;;  %v573_v21 = vadd.f32 %v2981_v26, %v565_v38 }
  0xae   : > { %v3040_v17 = vadd.f32 %v647_v22, %v627_v63  ;;  %2562 = vpow2.f32 %v2322_v61  ;;  %v600_v28 = vadd.f32 %v592_v12, %v572_v9  ;;  %v620_v23 = vmul.f32 %v2983_v27, %v608_v0 }
  0xaf   : > { %v2324_v29 = vmul.f32 -1.442695, %v3038_v16  ;;  %v621_v31 = vmul.f32 %v2983_v27, %v609_v14  ;;  %v648_v32 = vmul.f32 %v2976_v25, %v636_v15  ;;  %v649_v22 = vmul.f32 %v2976_v25, %v637_v18 }
  0xb0   : > { %v2325_v30 = vmul.f32 -1.442695, %v3040_v17  ;;  %v601_v33 = vadd.f32 %v593_v20, %v573_v21  ;;  %v628_v34 = vadd.f32 %v620_v23, %v600_v28 }
  0xb1   : > { %2564 = vpow2.f32 %v2324_v29 }
  0xb2   : > { %v2557_v24 = vpop.eup %2556  ;;  %2566 = vpow2.f32 %v2325_v30  ;;  %v629_v35 = vadd.f32 %v621_v31, %v601_v33  ;;  %v656_v26 = vadd.f32 %v648_v32, %v628_v34 }
  0xb3   : > { %v682_v36 = vadd.f32 1.0, %v2557_v24 }
  0xb4   : > { %v3050_v37 = vadd.f32 %v649_v22, %v629_v35  ;;  %v2326_v39 = vmul.f32 -1.442695, %v656_v26 }
  0xb5   : > { %2568 = vrcp.f32 %v682_v36 }
  0xb6   : > { %v2559_v40 = vpop.eup %2558  ;;  %2570 = vpow2.f32 %v2326_v39  ;;  %v2327_v27 = vmul.f32 -1.442695, %v3050_v37 }
  0xb7   : > { %v2561_v41 = vpop.eup %2560  ;;  %v685_v42 = vadd.f32 1.0, %v2559_v40 }
  0xb8   : > { %v2563_v43 = vpop.eup %2562  ;;  %v683_v25 = vadd.f32 1.0, %v2561_v41  ;;  %2572 = vpow2.f32 %v2327_v27 }
  0xb9   : > { %2574 = vrcp.f32 %v685_v42  ;;  %v684_v44 = vadd.f32 1.0, %v2563_v43 }
  0xba   : > { %2576 = vrcp.f32 %v683_v25 }
  0xbb   : > { %v2565_v45 = vpop.eup %2564  ;;  %2578 = vrcp.f32 %v684_v44 }
  0xbc   : > { %v2567_v46 = vpop.eup %2566  ;;  %v686_v48 = vadd.f32 1.0, %v2565_v45 }
  0xbd   : > { %v687_v49 = vadd.f32 1.0, %v2567_v46 }
  0xbe   : > { %2580 = vrcp.f32 %v686_v48 }
  0xbf   : > { %v2569_v52 = vpop.eup %2568  ;;  %2582 = vrcp.f32 %v687_v49 }
  0xc0   : > { %v2571_v54 = vpop.eup %2570  ;;  %v3054_v55 = vmul.f32 %v2569_v52, %v3010_v19 }
  0xc1   : > { %v688_v56 = vadd.f32 1.0, %v2571_v54 }
  0xc2   : > { %4026 = vst [vmem:[#allocation10_spill] sm:$0xff] %v3054_v55  ;;  %v2573_v57 = vpop.eup %2572  ;;  %1108 = vrot.lane.b32.xlu1 %v3054_v55, %s2759_s27  ;;  %1084 = vrot.lane.b32.xlu0 %v3054_v55, %s2760_s28 }
  0xc3   : > { %v2575_v58 = vpop.eup %2574  ;;  %v689_v53 = vadd.f32 1.0, %v2573_v57  ;;  %2584 = vrcp.f32 %v688_v56 }
  0xc4   : > { %v2577_v59 = vpop.eup %2576  ;;  %v3061_v60 = vmul.f32 %v2575_v58, %v3021_v47  ;;  %v2546_v58 = vld [vmem:[%s4000_s9] sm:$0xff]  }
  0xc5   : > { %v2579_v61 = vpop.eup %2578  ;;  %v3064_v19 = vmul.f32 %v2577_v59, %v3025_v50  ;;  %2586 = vrcp.f32 %v689_v53 }
  0xc6   : > { %4027 = vst [vmem:[#allocation11_spill] sm:$0xff] %v3061_v60  ;;  %v3067_v62 = vmul.f32 %v2579_v61, %v3028_v51  ;;  %1156 = vrot.lane.b32.xlu1 %v3054_v55, %s2761_s26  ;;  %1132 = vrot.lane.b32.xlu0 %v3054_v55, %s2762_s21  ;;  %v2547_v61 = vld [vmem:[%s4000_s9 + $0x8] sm:$0xff]  }
  0xc7   : > { %4028 = vst [vmem:[#allocation12_spill] sm:$0xff] %v3064_v19  ;;  %v714_v47 = vpack.c.bf16 %v3064_v19, %v3054_v55 }
  0xc8   : > { %v2581_v63 = vpop.eup %2580  ;;  %v715_v50 = vpack.c.bf16 %v3061_v60, %v3067_v62 }
  0xc9   : > { %v2583_v0 = vpop.eup %2582  ;;  %v3078_v38 = vmul.f32 %v2581_v63, %v3038_v16  ;;  %2420 = vmatprep.mubr.msk.bf16.mxu0 %vm495_vm0, %v714_v47 }
  0xca   : > { %v3082_v51 = vmul.f32 %v2583_v0, %v3040_v17  ;;  %2421 = vmatmul.mubr.msk.bf16.vlgmr.msra.gmra.mrb[0].mxu0 %vm495_vm0, %v715_v50  ;;  %1204 = vrot.lane.b32.xlu1 %v3054_v55, %s2763_s0  ;;  %v2355_v0 = vmul.f32 -1.442695, %v2918_v4 }
  0xcb   : > { %4029 = vst [vmem:[#allocation13_spill] sm:$0xff] %v3078_v38  ;;  %1180 = vrot.lane.b32.xlu0 %v3054_v55, %s2764_s22  ;;  %2440 = vmatprep.mubr.msk.bf16.mxu0 %vm495_vm0, %v714_v47 }
  0xcc   : > { %4030 = vst [vmem:[#allocation14_spill] sm:$0xff] %v3082_v51  ;;  %v716_v9 = vpack.c.bf16 %v3082_v51, %v3078_v38  ;;  %2439 = vmatpush3.bf16.msra.mxu0 %v2950_v10 }
  0xcd   : > { %v2585_v12 = vpop.eup %2584 }
  0xce   : > { %v3093_v14 = vmul.f32 %v2585_v12, %v656_v26  ;;  %2424 = vmatprep.mubr.msk.bf16.mxu1 %vm495_vm0, %v716_v9  ;;  %1228 = vrot.lane.b32.xlu1 %v3054_v55, %s2758_s20  ;;  %v2356_v12 = vmul.f32 -1.442695, %v2905_v1 }
  0xcf   : > { %v2587_v15 = vpop.eup %2586  ;;  %1086 = vrot.lane.b32.xlu0 %v3064_v19, %s2760_s28 }
  0xd0   : > { %4031 = vst [vmem:[#allocation15_spill] sm:$0xff] %v3093_v14  ;;  %v3101_v16 = vmul.f32 %v2587_v15, %v3050_v37  ;;  %v2357_v15 = vmul.f32 -1.442695, %v2915_v3 }
  0xd2   : > { %4032 = vst [vmem:[#allocation16_spill] sm:$0xff] %v3101_v16  ;;  %v717_v17 = vpack.c.bf16 %v3101_v16, %v3093_v14  ;;  %2441 = vmatmul.mubr.msk.bf16.vlgmr.msra.gmra.mrb[4].mxu0 %vm495_vm0, %v715_v50  ;;  %1134 = vrot.lane.b32.xlu1 %v3064_v19, %s2762_s21 }
  0xd3   : > { %1110 = vrot.lane.b32.xlu0 %v3064_v19, %s2759_s27  ;;  %2444 = vmatprep.mubr.msk.bf16.mxu0 %vm495_vm0, %v716_v9 }
  0xd4   : > { %2425 = vmatmul.mubr.msk.bf16.vlgmr.msra.gmra.mrb[0].mxu1 %vm495_vm0, %v717_v17 }
  0xd5   : > { %2430 = vmatprep.mubr.msk.bf16.mxu1 %vm495_vm0, %v714_v47  ;;  %2429 = vmatpush3.bf16.msra.mxu1 %v2956_v11  ;;  %v2354_v47 = vmul.f32 -1.442695, %v2908_v2 }
  0xd6   : > { %1182 = vrot.lane.b32.xlu1 %v3064_v19, %s2764_s22  ;;  %2448 = vmatprep.subr.bf16.mxu1 %v2546_v58 }
  0xd7   : > { %1158 = vrot.lane.b32.xlu0 %v3064_v19, %s2761_s26  ;;  %2588 = vpow2.f32 %v2354_v47  ;;  %v2550_v47 = vld [vmem:[%s4000_s9 + $0x20] sm:$0xff]  }
  0xd8   : > { %2590 = vpow2.f32 %v2355_v0  ;;  %v2551_v0 = vld [vmem:[%s4000_s9 + $0x28] sm:$0xff]  }
  0xd9   : > { %2592 = vpow2.f32 %v2356_v12  ;;  %v2552_v12 = vld [vmem:[%s4000_s9 + $0x30] sm:$0xff]  }
  0xda   : > { %2445 = vmatmul.mubr.msk.bf16.gmra.mrb[8].mxu0 %vm495_vm0, %v717_v17  ;;  %1088 = vrot.lane.b32.xlu1 %v3067_v62, %s2760_s28  ;;  %2594 = vpow2.f32 %v2357_v15 }
  0xdb   : > { %1206 = vrot.lane.b32.xlu0 %v3064_v19, %s2763_s0 }
  0xdc   : > { %2431 = vmatmul.mubr.msk.bf16.vlgmr.msra.gmra.mrb[4].mxu1 %vm495_vm0, %v715_v50  ;;  %v2548_v50 = vld [vmem:[%s4000_s9 + $0x10] sm:$0xff]  }
  0xdd   : > { %2434 = vmatprep.mubr.msk.bf16.mxu1 %vm495_vm0, %v716_v9  ;;  %2449 = vmatpush3.bf16.msra.mxu1 %v2546_v58  ;;  %v2549_v58 = vld [vmem:[%s4000_s9 + $0x18] sm:$0xff]  }
  0xde   : > { %1112 = vrot.lane.b32.xlu1 %v3067_v62, %s2759_s27  ;;  %2450 = vmatprep.subr.bf16.mxu1 %v2547_v61 }
  0xdf   : > { %1230 = vrot.lane.b32.xlu0 %v3064_v19, %s2758_s20 }
  0xe1   : > { %2451 = vmatpush3.bf16.msra.mxu1 %v2547_v61  ;;  %v2358_v61 = vmul.f32 -1.442695, %v2928_v6 }
  0xe2   : > { %1160 = vrot.lane.b32.xlu1 %v3067_v62, %s2761_s26  ;;  %2452 = vmatprep.subr.bf16.mxu1 %v2548_v50 }
  0xe3   : > { %1136 = vrot.lane.b32.xlu0 %v3067_v62, %s2762_s21 }
  0xe4   : > { %2435 = vmatmul.mubr.msk.bf16.gmra.mrb[8].mxu1 %vm495_vm0, %v717_v17  ;;  %v2359_v17 = vmul.f32 -1.442695, %v2921_v5 }
  0xe5   : > { %2453 = vmatpush3.bf16.msra.mxu1 %v2548_v50  ;;  %v2360_v50 = vmul.f32 -1.442695, %v2934_v8 }
  0xe6   : > { %1208 = vrot.lane.b32.xlu1 %v3067_v62, %s2763_s0  ;;  %2454 = vmatprep.subr.bf16.mxu1 %v2549_v58  ;;  %2596 = vpow2.f32 %v2359_v17  ;;  %v2589_v17 = vpop.eup %2588 }
  0xe7   : > { %1184 = vrot.lane.b32.xlu0 %v3067_v62, %s2764_s22  ;;  %2598 = vpow2.f32 %v2358_v61 }
  0xe9   : > { %2455 = vmatpush3.bf16.msra.mxu1 %v2549_v58  ;;  %v2591_v58 = vpop.eup %2590 }
  0xea   : > { %1232 = vrot.lane.b32.xlu1 %v3067_v62, %s2758_s20  ;;  %2456 = vmatprep.subr.bf16.mxu1 %v2550_v47 }
  0xeb   : > { %1090 = vrot.lane.b32.xlu0 %v3061_v60, %s2760_s28 }
  0xed   : > { %2457 = vmatpush3.bf16.msra.mxu1 %v2550_v47  ;;  %v1868_v47 = vadd.f32 1.0, %v2589_v17 }
  0xee   : > { %1138 = vrot.lane.b32.xlu1 %v3061_v60, %s2762_s21  ;;  %2458 = vmatprep.subr.bf16.mxu1 %v2551_v0 }
  0xef   : > { %1114 = vrot.lane.b32.xlu0 %v3061_v60, %s2759_s27 }
  0xf1   : > { %2459 = vmatpush3.bf16.msra.mxu1 %v2551_v0 }
  0xf2   : > { %1186 = vrot.lane.b32.xlu1 %v3061_v60, %s2764_s22  ;;  %2460 = vmatprep.subr.bf16.mxu1 %v2552_v12 }
  0xf3   : > { %1162 = vrot.lane.b32.xlu0 %v3061_v60, %s2761_s26 }
  0xf5   : > { %2461 = vmatpush3.bf16.msra.mxu1 %v2552_v12 }
  0xf6   : > { %1092 = vrot.lane.b32.xlu1 %v3078_v38, %s2760_s28 }
  0xf7   : > { %1210 = vrot.lane.b32.xlu0 %v3061_v60, %s2763_s0 }
  0xfa   : > { %1116 = vrot.lane.b32.xlu1 %v3078_v38, %s2759_s27 }
  0xfb   : > { %1234 = vrot.lane.b32.xlu0 %v3061_v60, %s2758_s20 }
  0xfe   : > { %1164 = vrot.lane.b32.xlu1 %v3078_v38, %s2761_s26 }
  0xff   : > { %1140 = vrot.lane.b32.xlu0 %v3078_v38, %s2762_s21 }
 0x102   : > { %1212 = vrot.lane.b32.xlu1 %v3078_v38, %s2763_s0 }
 0x103   : > { %1188 = vrot.lane.b32.xlu0 %v3078_v38, %s2764_s22 }
 0x106   : > { %1236 = vrot.lane.b32.xlu1 %v3078_v38, %s2758_s20 }
 0x107   : > { %1094 = vrot.lane.b32.xlu0 %v3082_v51, %s2760_s28 }
 0x10a   : > { %1142 = vrot.lane.b32.xlu1 %v3082_v51, %s2762_s21 }
 0x10b   : > { %1118 = vrot.lane.b32.xlu0 %v3082_v51, %s2759_s27 }
 0x10e   : > { %1190 = vrot.lane.b32.xlu1 %v3082_v51, %s2764_s22 }
 0x10f   : > { %1166 = vrot.lane.b32.xlu0 %v3082_v51, %s2761_s26 }
 0x112   : > { %1096 = vrot.lane.b32.xlu1 %v3093_v14, %s2760_s28 }
 0x113   : > { %1214 = vrot.lane.b32.xlu0 %v3082_v51, %s2763_s0 }
 0x116   : > { %1120 = vrot.lane.b32.xlu1 %v3093_v14, %s2759_s27 }
 0x117   : > { %1238 = vrot.lane.b32.xlu0 %v3082_v51, %s2758_s20 }
 0x11a   : > { %1168 = vrot.lane.b32.xlu1 %v3093_v14, %s2761_s26 }
 0x11b   : > { %1144 = vrot.lane.b32.xlu0 %v3093_v14, %s2762_s21 }
 0x11e   : > { %1216 = vrot.lane.b32.xlu1 %v3093_v14, %s2763_s0 }
 0x11f   : > { %1192 = vrot.lane.b32.xlu0 %v3093_v14, %s2764_s22 }
 0x122   : > { %1240 = vrot.lane.b32.xlu1 %v3093_v14, %s2758_s20 }
 0x123   : > { %1098 = vrot.lane.b32.xlu0 %v3101_v16, %s2760_s28  ;;  %s4082_s28 = sshll.u32 %s2894_s25, 6  ;;  %s473_s25 = sand.u32 1, %s2747_s30  }
 0x126   : > { %1146 = vrot.lane.b32.xlu1 %v3101_v16, %s2762_s21 }
 0x127   : > { %1122 = vrot.lane.b32.xlu0 %v3101_v16, %s2759_s27 }
 0x12a   : > { %1194 = vrot.lane.b32.xlu1 %v3101_v16, %s2764_s22  ;;  %s485_s22 = scalar_lea.vmem %s4083_s1, %s4082_s28 }
 0x12b   : > { %1170 = vrot.lane.b32.xlu0 %v3101_v16, %s2761_s26 }
 0x12e   : > { %1242 = vrot.lane.b32.xlu1 %v3101_v16, %s2758_s20 }
 0x12f   : > { %1218 = vrot.lane.b32.xlu0 %v3101_v16, %s2763_s0 }
 0x134   : > { %v3210_v10 = vpop.permute.xlu1 %1108  ;;  %v3212_v11 = vpop.permute.xlu0 %1084 }
 0x138   : > { %v3214_v18 = vpop.permute.xlu1 %1156  ;;  %v3216_v20 = vpop.permute.xlu0 %1132 }
 0x13c   : > { %v3218_v21 = vpop.permute.xlu1 %1204 }
 0x13d   : > { %v3220_v28 = vpop.permute.xlu0 %1180 }
 0x140   : > { %v3222_v23 = vpop.permute.xlu1 %1228 }
 0x141   : > { %v3224_v29 = vpop.permute.xlu0 %1086 }
 0x144   : > { %v3226_v30 = vpop.permute.xlu1 %1134 }
 0x145   : > { %v3228_v31 = vpop.permute.xlu0 %1110 }
 0x148   : > { %v3230_v32 = vpop.permute.xlu1 %1182 }
 0x149   : > { %v3232_v22 = vpop.permute.xlu0 %1158 }
 0x14c   : > { %v3234_v33 = vpop.permute.xlu1 %1088 }
 0x14d   : > { %v3236_v34 = vpop.permute.xlu0 %1206 }
 0x150   : > { %v3238_v24 = vpop.permute.xlu1 %1112 }
 0x151   : > { %v3240_v35 = vpop.permute.xlu0 %1230 }
 0x154   : > { %v3242_v26 = vpop.permute.xlu1 %1160 }
 0x155   : > { %v3244_v36 = vpop.permute.xlu0 %1136 }
 0x158   : > { %v3246_v37 = vpop.permute.xlu1 %1208 }
 0x159   : > { %v3248_v39 = vpop.permute.xlu0 %1184 }
 0x15c   : > { %v3250_v40 = vpop.permute.xlu1 %1232 }
 0x15d   : > { %v3252_v27 = vpop.permute.xlu0 %1090 }
 0x160   : > { %v3254_v41 = vpop.permute.xlu1 %1138 }
 0x161   : > { %v3256_v42 = vpop.permute.xlu0 %1114 }
 0x164   : > { %v3258_v43 = vpop.permute.xlu1 %1186 }
 0x165   : > { %v3260_v25 = vpop.permute.xlu0 %1162 }
 0x168   : > { %v3262_v44 = vpop.permute.xlu1 %1092 }
 0x169   : > { %v3264_v45 = vpop.permute.xlu0 %1210 }
 0x16c   : > { %v3266_v46 = vpop.permute.xlu1 %1116 }
 0x16d   : > { %v3268_v48 = vpop.permute.xlu0 %1234 }
 0x170   : > { %v3270_v49 = vpop.permute.xlu1 %1164 }
 0x171   : > { %v3272_v52 = vpop.permute.xlu0 %1140 }
 0x174   : > { %v3274_v54 = vpop.permute.xlu1 %1212 }
 0x175   : > { %4033 = vst [vmem:[#allocation17_spill] sm:$0xff] %v3274_v54  ;;  %v3276_v56 = vpop.permute.xlu0 %1188 }
 0x178   : > { %v3283_v53 = vpop.permute.xlu1 %1236 }
 0x179   : > { %v3278_v57 = vpop.permute.xlu0 %1094  ;;  %4034 = vst [vmem:[#allocation18_spill] sm:$0xff] %v3283_v53  ;;  %v2361_v53 = vmul.f32 -1.442695, %v2931_v7 }
 0x17b   : > { %2600 = vpow2.f32 %v2361_v53  ;;  %v2553_v53 = vld [vmem:[%s4000_s9 + $0x38] sm:$0xff]  }
 0x17c   : > { %v3291_v63 = vpop.permute.xlu1 %1142  ;;  %2602 = vpow2.f32 %v2360_v50  ;;  %2462 = vmatprep.subr.bf16.mxu1 %v2553_v53 }
 0x17d   : > { %v3285_v59 = vpop.permute.xlu0 %1118  ;;  %4036 = vst [vmem:[#allocation20_spill] sm:$0xff] %v3291_v63  ;;  %2604 = vrcp.f32 %v1868_v47  ;;  %2463 = vmatpush3.bf16.msra.mxu1 %v2553_v53 }
 0x17e   : > { %4035 = vst [vmem:[#allocation19_spill] sm:$0xff] %v3285_v59 }
 0x180   : > { %v3306_v13 = vpop.permute.xlu1 %1190 }
 0x181   : > { %v3297_v9 = vpop.permute.xlu0 %1166  ;;  %4038 = vst [vmem:[#allocation22_spill] sm:$0xff] %v3306_v13  ;;  %v1869_v13 = vadd.f32 1.0, %v2591_v58 }
 0x182   : > { %4037 = vst [vmem:[#allocation21_spill] sm:$0xff] %v3297_v9  ;;  %v1252_v9 = vsel %vm495_vm0, %v3054_v55, %v3212_v11 }
 0x183   : > { %v1261_v58 = vsel %vm1260_vm1, %v1252_v9, %v3210_v10  ;;  %2606 = vrcp.f32 %v1869_v13 }
 0x184   : > { %v3318_v7 = vpop.permute.xlu1 %1096  ;;  %v1270_v11 = vsel %vm1269_vm2, %v1261_v58, %v3216_v20 }
 0x185   : > { %v3309_v54 = vpop.permute.xlu0 %1214  ;;  %v1279_v20 = vsel %vm1278_vm3, %v1270_v11, %v3214_v18 }
 0x186   : > { %4039 = vst [vmem:[#allocation23_spill] sm:$0xff] %v3309_v54  ;;  %v2593_v54 = vpop.eup %2592 }
 0x187   : > { %v2595_v61 = vpop.eup %2594 }
 0x188   : > { %v2597_v50 = vpop.eup %2596  ;;  %v3331_v63 = vpop.permute.xlu1 %1120  ;;  %v1871_v16 = vadd.f32 1.0, %v2595_v61 }
 0x189   : > { %v3323_v15 = vpop.permute.xlu0 %1238  ;;  %v2599_v8 = vpop.eup %2598  ;;  %v1873_v17 = vadd.f32 1.0, %v2597_v50 }
 0x18a   : > { %4040 = vst [vmem:[#allocation24_spill] sm:$0xff] %v3323_v15  ;;  %v1870_v15 = vadd.f32 1.0, %v2593_v54  ;;  %v2601_v59 = vpop.eup %2600  ;;  %v1253_v54 = vsel %vm495_vm0, %v3064_v19, %v3224_v29  ;;  %v1872_v12 = vadd.f32 1.0, %v2599_v8  ;;  %v1288_v29 = vsel %vm1287_vm4, %v1279_v20, %v3220_v28 }
 0x18b   : > { %v2603_v14 = vpop.eup %2602  ;;  %v1262_v61 = vsel %vm1260_vm1, %v1253_v54, %v3228_v31  ;;  %v1875_v47 = vadd.f32 1.0, %v2601_v59  ;;  %v1255_v59 = vsel %vm495_vm0, %v3061_v60, %v3252_v27 }
 0x18c   : > { %2608 = vrcp.f32 %v1870_v15  ;;  %v3344_v10 = vpop.permute.xlu1 %1168  ;;  %v1874_v13 = vadd.f32 1.0, %v2603_v14  ;;  %v1271_v8 = vsel %vm1269_vm2, %v1262_v61, %v3226_v30  ;;  %v3360_v14 = vld [vmem:[%s3996_s5] ss:$0 sm:$0xff]  ;;  %v1264_v53 = vsel %vm1260_vm1, %v1255_v59, %v3256_v42 }
 0x18d   : > { %v3333_v0 = vpop.permute.xlu0 %1144  ;;  %2610 = vrcp.f32 %v1871_v16  ;;  %v1254_v16 = vsel %vm495_vm0, %v3067_v62, %v3234_v33  ;;  %v1280_v18 = vsel %vm1278_vm3, %v1271_v8, %v3232_v22  ;;  %v1297_v33 = vsel %vm1296_vm5, %v1288_v29, %v3218_v21 }
 0x18e   : > { %2612 = vrcp.f32 %v1873_v17  ;;  %v1263_v28 = vsel %vm1260_vm1, %v1254_v16, %v3238_v24  ;;  %v3378_v24 = vsel %vm1305_vm6, %v1297_v33, %v3222_v23  ;;  %v2605_v17 = vpop.eup %2604  ;;  %v1273_v20 = vsel %vm1269_vm2, %v1264_v53, %v3254_v41 }
 0x18f   : > { %2614 = vrcp.f32 %v1872_v12  ;;  %v1272_v30 = vsel %vm1269_vm2, %v1263_v28, %v3244_v36  ;;  %v1289_v36 = vsel %vm1287_vm4, %v1280_v18, %v3230_v32  ;;  %v2607_v12 = vpop.eup %2606  ;;  %v1256_v29 = vsel %vm495_vm0, %v3078_v38, %v3262_v44 }
 0x190   : > { %2616 = vrcp.f32 %v1875_v47  ;;  %v3384_v50 = vpop.permute.xlu1 %1216  ;;  %v1298_v58 = vsel %vm1296_vm5, %v1289_v36, %v3236_v34  ;;  %v1281_v23 = vsel %vm1278_vm3, %v1272_v30, %v3242_v26  ;;  %v1265_v18 = vsel %vm1260_vm1, %v1256_v29, %v3266_v46 }
 0x191   : > { %v3348_v9 = vpop.permute.xlu0 %1192  ;;  %2618 = vrcp.f32 %v1874_v13  ;;  %v3401_v61 = vsel %vm1305_vm6, %v1298_v58, %v3240_v35  ;;  %v1290_v47 = vsel %vm1287_vm4, %v1281_v23, %v3248_v39  ;;  %v1282_v39 = vsel %vm1278_vm3, %v1273_v20, %v3260_v25 }
 0x192   : > { %v1892_v59 = vmul.f32 %v2605_v17, %v2908_v2  ;;  %v1893_v44 = vmul.f32 %v2607_v12, %v2918_v4  ;;  %v1274_v36 = vsel %vm1269_vm2, %v1265_v18, %v3272_v52  ;;  %v1291_v17 = vsel %vm1287_vm4, %v1282_v39, %v3258_v43 }
 0x193   : > { %v1300_v29 = vsel %vm1296_vm5, %v1291_v17, %v3264_v45  ;;  %v2684_v17 = vld [vmem:[%s2902_s18 + $0x38] sm:$0xff] }
 0x194   : > { %v3426_v25 = vpop.permute.xlu1 %1240  ;;  %1908 = vrot.lane.b32.xlu0 %v1892_v59, %s2763_s0  ;;  %1910 = vrot.lane.b32.xlu1 %v1893_v44, %s2763_s0  ;;  %v3455_v43 = vsel %vm1305_vm6, %v1300_v29, %v3268_v48  ;;  %v4042_v44 = vld [vmem:[#allocation19_spill] sm:$0xff] }
 0x195   : > { %v3393_v11 = vpop.permute.xlu0 %1098 }
 0x196   : > { %v2609_v13 = vpop.eup %2608 }
 0x197   : > { %v2611_v16 = vpop.eup %2610  ;;  %v1894_v2 = vmul.f32 %v2609_v13, %v2905_v1  ;;  %v1283_v1 = vsel %vm1278_vm3, %v1274_v36, %v3270_v49 }
 0x198   : > { %v1895_v4 = vmul.f32 %v2611_v16, %v2915_v3 }
 0x199   : > { %v1123_v23 = vpop.permute.xlu0 %1122  ;;  %1912 = vrot.lane.b32.xlu0 %v1894_v2, %s2763_s0 }
 0x19a   : > { %1914 = vrot.lane.b32.xlu1 %v1895_v4, %s2763_s0 }
 0x19d   : > { %v2422_v31 = vpop.f32.mrb[0].mxu0 }
 0x19e   : > { %v3374_v15 = vadd.f32 %v2422_v31, %v3360_v14  ;;  %v779_v22 = vpop.f32.mrb[1].mxu0  ;;  %v2613_v31 = vpop.eup %2612 }
 0x19f   : > { %v3387_v21 = vadd.f32 %v3360_v14, %v779_v22  ;;  %v2423_v27 = vpop.f32.mrb[2].mxu0  ;;  %v1299_v22 = vsel %vm1296_vm5, %v1290_v47, %v3246_v37  ;;  %v2615_v58 = vpop.eup %2614  ;;  %v1897_v18 = vmul.f32 %v2613_v31, %v2921_v5 }
 0x1a0   : > { %v820_v32 = vand.u32 2147483647, %v3374_v15  ;;  %v3397_v54 = vadd.f32 %v2423_v27, %v3360_v14  ;;  %v782_v42 = vpop.f32.mrb[3].mxu0  ;;  %v2617_v37 = vpop.eup %2616  ;;  %v3438_v52 = vsel %vm1305_vm6, %v1299_v22, %v3250_v40  ;;  %v1896_v48 = vmul.f32 %v2615_v58, %v2928_v6 }
 0x1a1   : > { %v818_v34 = vand.u32 2147483647, %v3387_v21  ;;  %v3407_v26 = vadd.f32 %v3360_v14, %v782_v42  ;;  %v2619_v20 = vpop.eup %2618  ;;  %v1171_v58 = vpop.permute.xlu0 %1170  ;;  %1918 = vrot.lane.b32.xlu1 %v1897_v18, %s2763_s0 }
 0x1a2   : > { %v828_v8 = vsub.f32 0.0, %v820_v32  ;;  %v821_v35 = vand.u32 2147483647, %v3397_v54  ;;  %1916 = vrot.lane.b32.xlu0 %v1896_v48, %s2763_s0  ;;  %v4046_v48 = vld [vmem:[#allocation21_spill] sm:$0xff] }
 0x1a3   : > { %v826_v28 = vsub.f32 0.0, %v818_v34  ;;  %v819_v30 = vand.u32 2147483647, %v3407_v26 }
 0x1a4   : > { %v838_v33 = vmul.f32 1.442695, %v828_v8  ;;  %v829_v41 = vsub.f32 0.0, %v821_v35  ;;  %v1292_v8 = vsel %vm1287_vm4, %v1283_v1, %v3276_v56  ;;  %v1257_v56 = vsel %vm495_vm0, %v3082_v51, %v3278_v57 }
 0x1a5   : > { %v834_v53 = vmul.f32 1.442695, %v826_v28  ;;  %v827_v46 = vsub.f32 0.0, %v819_v30  ;;  %v3428_v27 = vpop.f32.mrb[4].mxu0  ;;  %v4041_v28 = vld [vmem:[#allocation15_spill] sm:$0xff]  ;;  %v1266_v22 = vsel %vm1260_vm1, %v1257_v56, %v4042_v44 }
 0x1a6   : > { %2620 = vpow2.f32 %v838_v33  ;;  %v840_v32 = vmul.f32 1.442695, %v829_v41  ;;  %v3430_v42 = vpop.f32.mrb[5].mxu0  ;;  %v1258_v30 = vsel %vm495_vm0, %v4041_v28, %v3318_v7  ;;  %v1147_v33 = vpop.permute.xlu1 %1146  ;;  %v4043_v7 = vld [vmem:[#allocation16_spill] sm:$0xff] }
 0x1a7   : > { %2622 = vpow2.f32 %v834_v53  ;;  %v836_v12 = vmul.f32 1.442695, %v827_v46  ;;  %v2426_v47 = vpop.f32.mrb[0].mxu1  ;;  %v3442_v34 = vpop.f32.mrb[6].mxu0  ;;  %v1267_v5 = vsel %vm1260_vm1, %v1258_v30, %v3331_v63  ;;  %v1259_v36 = vsel %vm495_vm0, %v4043_v7, %v3393_v11  ;;  %v4044_v63 = vld [vmem:[#allocation8_spill] sm:$0xff] }
 0x1a8   : > { %2624 = vpow2.f32 %v840_v32  ;;  %v3449_v3 = vadd.f32 %v2426_v47, %v3360_v14  ;;  %v795_v40 = vpop.f32.mrb[1].mxu1  ;;  %v3451_v13 = vpop.f32.mrb[7].mxu0  ;;  %v1276_v31 = vsel %vm1269_vm2, %v1267_v5, %v3333_v0  ;;  %v1898_v0 = vmul.f32 %v2619_v20, %v4044_v63  ;;  %v4045_v47 = vld [vmem:[#allocation20_spill] sm:$0xff] }
 0x1a9   : > { %2626 = vpow2.f32 %v836_v12  ;;  %v3460_v45 = vadd.f32 %v3360_v14, %v795_v40  ;;  %v2427_v35 = vpop.f32.mrb[2].mxu1  ;;  %v1899_v12 = vmul.f32 %v2684_v17, %v2617_v37  ;;  %v1275_v11 = vsel %vm1269_vm2, %v1266_v22, %v4045_v47 }
 0x1aa   : > { %v824_v49 = vand.u32 2147483647, %v3449_v3  ;;  %v3464_v16 = vadd.f32 %v2427_v35, %v3360_v14  ;;  %v798_v39 = vpop.f32.mrb[3].mxu1  ;;  %v1268_v29 = vsel %vm1260_vm1, %v1259_v36, %v1123_v23  ;;  %v1284_v18 = vsel %vm1278_vm3, %v1275_v11, %v4046_v48  ;;  %v1195_v44 = vpop.permute.xlu1 %1194  ;;  %1920 = vrot.lane.b32.xlu0 %v1898_v0, %s2763_s0  ;;  %v4050_v11 = vld [vmem:[#allocation23_spill] sm:$0xff] }
 0x1ab   : > { %v822_v41 = vand.u32 2147483647, %v3460_v45  ;;  %v3478_v59 = vadd.f32 %v3360_v14, %v798_v39  ;;  %v1285_v20 = vsel %vm1278_vm3, %v1276_v31, %v3344_v10  ;;  %v4047_v10 = vld [vmem:[#allocation17_spill] sm:$0xff]  ;;  %v1277_v36 = vsel %vm1269_vm2, %v1268_v29, %v1147_v33  ;;  %1922 = vrot.lane.b32.xlu1 %v1899_v12, %s2763_s0  ;;  %v4049_v33 = vld [vmem:[#allocation22_spill] sm:$0xff]  ;;  %v1219_v0 = vpop.permute.xlu0 %1218  ;;  %s2314_s0 = sshll.u32 %s473_s25, 6 }
 0x1ac   : > { %v832_v6 = vsub.f32 0.0, %v824_v49  ;;  %v825_v57 = vand.u32 2147483647, %v3464_v16  ;;  %v1301_v31 = vsel %vm1296_vm5, %v1292_v8, %v4047_v10  ;;  %v1286_v63 = vsel %vm1278_vm3, %v1277_v36, %v1171_v58  ;;  %s475_s20 = scalar_lea.vmem [#allocation4], %s2314_s0  ;;  %s2765_s0 = smov [#allocation4]  }
 0x1ad   : > { %v830_v53 = vsub.f32 0.0, %v822_v41  ;;  %v823_v14 = vand.u32 2147483647, %v3478_v59  ;;  %v3491_v46 = vpop.f32.mrb[8].mxu0  ;;  %v1294_v41 = vsel %vm1287_vm4, %v1285_v20, %v3348_v9  ;;  %v1293_v17 = vsel %vm1287_vm4, %v1284_v18, %v4049_v33  ;;  %s2236_s27 = sshll.u32 %s475_s20, 4  ;;  %s3945_s27 = int_to_ptr.vmem [resolvable:$true] %s2236_s27 }
 0x1ae   : > { %v846_v32 = vmul.f32 1.442695, %v832_v6  ;;  %v833_v2 = vsub.f32 0.0, %v825_v57  ;;  %v3493_v4 = vpop.f32.mrb[9].mxu0  ;;  %v1303_v47 = vsel %vm1296_vm5, %v1294_v41, %v3384_v50  ;;  %v3548_v29 = vsel %vm1296_vm5, %v1293_v17, %v4050_v11 }
 0x1af   : > { %v842_v1 = vmul.f32 1.442695, %v830_v53  ;;  %v831_v40 = vsub.f32 0.0, %v823_v14  ;;  %v3502_v35 = vpop.f32.mrb[4].mxu1  ;;  %v3504_v49 = vpop.f32.mrb[10].mxu0  ;;  %v3552_v58 = vsel %vm1305_vm6, %v1303_v47, %v3426_v25  ;;  %v1295_v48 = vsel %vm1287_vm4, %v1286_v63, %v1195_v44 }
 0x1b0   : > { %v3506_v39 = vpop.eup %2620  ;;  %2628 = vpow2.f32 %v846_v32  ;;  %v848_v37 = vmul.f32 1.442695, %v833_v2  ;;  %v3512_v56 = vpop.f32.mrb[5].mxu1  ;;  %v4048_v32 = vld [vmem:[#allocation18_spill] sm:$0xff]  ;;  %v810_v18 = vmax.f32 %v3387_v21, 0.0  ;;  %v1304_v41 = vsel %vm1296_vm5, %v1295_v48, %v1219_v0 }
 0x1b1   : > { %v3514_v30 = vpop.f32.mrb[11].mxu0  ;;  %v3516_v23 = vpop.eup %2622  ;;  %2630 = vpow2.f32 %v842_v1  ;;  %v844_v22 = vmul.f32 1.442695, %v831_v40  ;;  %v868_v5 = vadd.f32 1.0, %v3506_v39  ;;  %v3537_v2 = vsel %vm1305_vm6, %v1301_v31, %v4048_v32 }
 0x1b2   : > { %v3521_v6 = vpop.f32.mrb[6].mxu1  ;;  %v3523_v57 = vpop.eup %2624  ;;  %2632 = vpow2.f32 %v848_v37  ;;  %v850_v53 = vadd.f32 1.0, %v3516_v23  ;;  %v871_v12 = vmul.f32 -0.5, %v3506_v39  ;;  %v853_v1 = vmul.f32 -0.5, %v3516_v23 }
 0x1b3   : > { %v3529_v14 = vpop.f32.mrb[7].mxu1  ;;  %v3533_v9 = vpop.eup %2626  ;;  %2634 = vpow2.f32 %v844_v22  ;;  %v877_v8 = vadd.f32 1.0, %v3523_v57  ;;  %v812_v40 = vmax.f32 %v3374_v15, 0.0  ;;  %v874_v25 = vand.u32 2147483647, %v3506_v39 }
 0x1b4   : > { %2636 = vlog2.f32 %v868_v5  ;;  %v859_v50 = vadd.f32 1.0, %v3533_v9  ;;  %v1243_v37 = vpop.permute.xlu1 %1242  ;;  %v872_v5 = vadd.f32 1.0, %v871_v12  ;;  %v856_v10 = vand.u32 2147483647, %v3516_v23 }
 0x1b5   : > { %2638 = vlog2.f32 %v850_v53  ;;  %v880_v15 = vmul.f32 -0.5, %v3523_v57  ;;  %v854_v36 = vadd.f32 1.0, %v853_v1  ;;  %v862_v53 = vmul.f32 -0.5, %v3533_v9 }
 0x1b6   : > { %2640 = vlog2.f32 %v877_v8  ;;  %v883_v33 = vand.u32 2147483647, %v3523_v57  ;;  %v865_v17 = vand.u32 2147483647, %v3533_v9  ;;  %v3579_v47 = vsel %vm1305_vm6, %v1304_v41, %v1243_v37 }
 0x1b7   : > { %v3562_v22 = vpop.f32.mrb[8].mxu1  ;;  %2642 = vlog2.f32 %v859_v50  ;;  %vm3587_vm7 = vcmp.lt.f32.partialorder %v874_v25, 0.0004427343  ;;  %v873_v21 = vmul.f32 %v3506_v39, %v872_v5  ;;  %vm3595_vm8 = vcmp.lt.f32.partialorder %v856_v10, 0.0004427343 }
 0x1b8   : > { %v3566_v44 = vpop.f32.mrb[9].mxu1  ;;  %v881_v41 = vadd.f32 1.0, %v880_v15  ;;  %v855_v25 = vmul.f32 %v3516_v23, %v854_v36  ;;  %v863_v1 = vadd.f32 1.0, %v862_v53  ;;  %vm3604_vm9 = vcmp.lt.f32.partialorder %v883_v33, 0.0004427343 }
 0x1b9   : > { %v3571_v32 = vpop.f32.mrb[10].mxu1  ;;  %vm3608_vm10 = vcmp.lt.f32.partialorder %v865_v17, 0.0004427343  ;;  %vm1388_vm2 = vcmask 1043456  }
 0x1ba   : > { %v3573_v63 = vpop.eup %2628  ;;  %v3581_v0 = vpop.f32.mrb[11].mxu1  ;;  %v882_v33 = vmul.f32 %v3523_v57, %v881_v41  ;;  %v864_v19 = vmul.f32 %v3533_v9, %v863_v1 }
 0x1bb   : > { %v3583_v12 = vpop.eup %2630  ;;  %v904_v50 = vadd.f32 1.0, %v3573_v63  ;;  %v907_v5 = vmul.f32 -0.5, %v3573_v63  ;;  %v910_v23 = vand.u32 2147483647, %v3573_v63 }
 0x1bc   : > { %v3592_v8 = vpop.eup %2632  ;;  %v886_v31 = vadd.f32 1.0, %v3583_v12  ;;  %v889_v36 = vmul.f32 -0.5, %v3583_v12  ;;  %v892_v38 = vand.u32 2147483647, %v3583_v12 }
 0x1bd   : > { %v3600_v11 = vpop.eup %2634  ;;  %2644 = vlog2.f32 %v904_v50  ;;  %v913_v20 = vadd.f32 1.0, %v3592_v8  ;;  %v908_v41 = vadd.f32 1.0, %v907_v5  ;;  %vm3631_vm11 = vcmp.lt.f32.partialorder %v910_v23, 0.0004427343 }
 0x1be   : > { %v2637_v51 = vpop.eup %2636  ;;  %2646 = vlog2.f32 %v886_v31  ;;  %v895_v17 = vadd.f32 1.0, %v3600_v11  ;;  %vm3639_vm12 = vcmp.lt.f32.partialorder %v892_v38, 0.0004427343  ;;  %v919_v7 = vand.u32 2147483647, %v3592_v8 }
 0x1bf   : > { %v2639_v10 = vpop.eup %2638  ;;  %v870_v15 = vmul.f32 0.6931472, %v2637_v51  ;;  %2648 = vlog2.f32 %v913_v20  ;;  %v3623_v51 = vld [vmem:[%s3999_s8] ss:$0 sm:$0xff]  ;;  %v916_v20 = vmul.f32 -0.5, %v3592_v8 }
 0x1c0   : > { %v2641_v53 = vpop.eup %2640  ;;  %v852_v50 = vmul.f32 0.6931472, %v2639_v10  ;;  %2650 = vlog2.f32 %v895_v17  ;;  %vm3667_vm14 = vcmp.lt.f32.partialorder %v919_v7, 0.0004427343 }
 0x1c1   : > { %v876_v28 = vsel %vm3587_vm7, %v873_v21, %v870_v15  ;;  %v879_v31 = vmul.f32 0.6931472, %v2641_v53  ;;  %v2643_v10 = vpop.eup %2642  ;;  %v890_v53 = vadd.f32 1.0, %v889_v36  ;;  %v917_v23 = vadd.f32 1.0, %v916_v20 }
 0x1c2   : > { %v924_v60 = vadd.f32 %v876_v28, %v812_v40  ;;  %v858_v57 = vsel %vm3595_vm8, %v855_v25, %v852_v50  ;;  %v861_v48 = vmul.f32 0.6931472, %v2643_v10  ;;  %v4061_v28 = vmax.f32 %v3397_v54, 0.0 }
 0x1c3   : > { %v922_v55 = vadd.f32 %v858_v57, %v810_v18  ;;  %v885_v21 = vsel %vm3604_vm9, %v882_v33, %v879_v31  ;;  %v909_v31 = vmul.f32 %v3573_v63, %v908_v41  ;;  %v891_v10 = vmul.f32 %v3583_v12, %v890_v53 }
 0x1c4   : > { %v1323_v9 = vmul.f32 %v3623_v51, %v924_v60  ;;  %v1347_v1 = vmul.f32 %v3438_v52, %v924_v60  ;;  %v925_v40 = vadd.f32 %v885_v21, %v4061_v28  ;;  %v867_v5 = vsel %vm3608_vm10, %v864_v19, %v861_v48 }
 0x1c5   : > { %v1321_v18 = vmul.f32 %v3623_v51, %v922_v55  ;;  %v1345_v25 = vmul.f32 %v3378_v24, %v922_v55  ;;  %v4064_v55 = vmax.f32 %v3407_v26, 0.0  ;;  %v898_v19 = vmul.f32 -0.5, %v3600_v11 }
 0x1c6   : > { %v1333_v36 = vmul.f32 1.442695, %v1323_v9  ;;  %v3649_v60 = vmul.f32 %v3502_v35, %v1347_v1  ;;  %v1324_v38 = vmul.f32 %v3623_v51, %v925_v40  ;;  %v1348_v54 = vmul.f32 %v3455_v43, %v925_v40 }
 0x1c7   : > { %v2645_v52 = vpop.eup %2644  ;;  %v1329_v50 = vmul.f32 1.442695, %v1321_v18  ;;  %v3654_v33 = vmul.f32 %v1345_v25, %v3512_v56  ;;  %v923_v24 = vadd.f32 %v867_v5, %v4064_v55  ;;  %v918_v57 = vmul.f32 %v3592_v8, %v917_v23 }
 0x1c8   : > { %v2647_v39 = vpop.eup %2646  ;;  %2652 = vpow2.f32 %v1333_v36  ;;  %v1335_v17 = vmul.f32 1.442695, %v1324_v38  ;;  %v3660_v35 = vmul.f32 %v3521_v6, %v1348_v54  ;;  %v906_v26 = vmul.f32 0.6931472, %v2645_v52 }
 0x1c9   : > { %v2649_v20 = vpop.eup %2648  ;;  %2654 = vpow2.f32 %v1329_v50  ;;  %v1322_v43 = vmul.f32 %v3623_v51, %v923_v24  ;;  %v1346_v56 = vmul.f32 %v3401_v61, %v923_v24  ;;  %v888_v63 = vmul.f32 0.6931472, %v2647_v39 }
 0x1ca   : > { %2656 = vpow2.f32 %v1335_v17  ;;  %v899_v41 = vadd.f32 1.0, %v898_v19  ;;  %v2651_v9 = vpop.eup %2650  ;;  %v1445_v1 = vrot.slane %v3649_v60, 7  ;;  %v912_v61 = vsel %vm3631_vm11, %v909_v31, %v906_v26 }
 0x1cb   : > { %v1331_v6 = vmul.f32 1.442695, %v1322_v43  ;;  %v3672_v48 = vmul.f32 %v1346_v56, %v3529_v14  ;;  %v915_v12 = vmul.f32 0.6931472, %v2649_v20  ;;  %v901_v53 = vand.u32 2147483647, %v3600_v11 }
 0x1cc   : > { %v1367_v8 = vrot.slane %v3654_v33, 7  ;;  %v4067_v28 = vmax.f32 %v3449_v3, 0.0  ;;  %v894_v14 = vsel %vm3639_vm12, %v891_v10, %v888_v63  ;;  %v1485_v7 = vrot.slane %v3660_v35, 7 }
 0x1cd   : > { %2658 = vpow2.f32 %v1331_v6  ;;  %v1405_v18 = vrot.slane %v3672_v48, 7  ;;  %v4068_v15 = vmax.f32 %v3460_v45, 0.0  ;;  %v921_v5 = vsel %vm3667_vm14, %v918_v57, %v915_v12 }
 0x1ce   : > { %v928_v40 = vadd.f32 %v912_v61, %v4067_v28  ;;  %v3691_v3 = vmul.f32 0.6931472, %v2651_v9  ;;  %v3694_v37 = vmul.f32 %v3600_v11, %v899_v41  ;;  %v4069_v52 = vmax.f32 %v3464_v16, 0.0 }
 0x1cf   : > { %v926_v25 = vadd.f32 %v894_v14, %v4068_v15  ;;  %vm3702_vm1 = vcmp.lt.f32.partialorder %v901_v53, 0.0004427343  ;;  %v1447_v55 = vsel %vm1364_vm13, 0.0, %v1445_v1  ;;  %v1487_v39 = vsel %vm1364_vm13, 0.0, %v1485_v7 }
 0x1d0   : > { %v1327_v23 = vmul.f32 %v3623_v51, %v928_v40  ;;  %v1351_v36 = vmul.f32 %v3552_v58, %v928_v40  ;;  %v3700_v45 = vadd.f32 %v921_v5, %v4069_v52  ;;  %v1369_v58 = vsel %vm1364_vm13, 0.0, %v1367_v8 }
 0x1d1   : > { %v1325_v38 = vmul.f32 %v3623_v51, %v926_v25  ;;  %v1349_v54 = vmul.f32 %v3537_v2, %v926_v25  ;;  %v1407_v2 = vsel %vm1364_vm13, 0.0, %v1405_v18  ;;  %v903_v56 = vsel %vm3702_vm1, %v3694_v37, %v3691_v3 }
 0x1d2   : > { %v1341_v24 = vmul.f32 1.442695, %v1327_v23  ;;  %v3709_v11 = vmul.f32 %v3562_v22, %v1351_v36  ;;  %v2653_v19 = vpop.eup %2652  ;;  %v3723_v21 = vmul.f32 %v3623_v51, %v3700_v45 }
 0x1d3   : > { %v1337_v16 = vmul.f32 1.442695, %v1325_v38  ;;  %v3714_v17 = vmul.f32 %v1349_v54, %v3566_v44  ;;  %v2655_v31 = vpop.eup %2654  ;;  %v1441_v20 = vrot.slane %v2653_v19, 7  ;;  %v1448_v43 = vmul.f32 %v2653_v19, %v1447_v55 }
 0x1d4   : > { %2660 = vpow2.f32 %v1341_v24  ;;  %v2657_v22 = vpop.eup %2656  ;;  %v1362_v10 = vrot.slane %v2655_v31, 7  ;;  %v1370_v26 = vmul.f32 %v2655_v31, %v1369_v58  ;;  %v1605_v57 = vrot.slane %v3709_v11, 7 }
 0x1d5   : > { %v1443_v44 = vsel %vm1364_vm13, 1.0, %v1441_v20  ;;  %v1449_v6 = vadd.f32 %v1448_v43, %v3649_v60  ;;  %v1481_v63 = vrot.slane %v2657_v22, 7  ;;  %v1488_v41 = vmul.f32 %v2657_v22, %v1487_v39 }
 0x1d6   : > { %v1450_v9 = vmul.f32 %v2653_v19, %v1443_v44  ;;  %v1365_v1 = vsel %vm1364_vm13, 1.0, %v1362_v10  ;;  %v1371_v61 = vadd.f32 %v1370_v26, %v3654_v33  ;;  %2662 = vpow2.f32 %v1337_v16 }
 0x1d7   : > { %v2659_v12 = vpop.eup %2658  ;;  %v1456_v53 = vrot.slane %v1449_v6, 6  ;;  %v1372_v8 = vmul.f32 %v2655_v31, %v1365_v1  ;;  %v1483_v28 = vsel %vm1364_vm13, 1.0, %v1481_v63  ;;  %v1489_v40 = vadd.f32 %v1488_v41, %v3660_v35 }
 0x1d8   : > { %v1452_v14 = vrot.slane %v1450_v9, 6  ;;  %v1379_v7 = vrot.slane %v1371_v61, 6  ;;  %v1490_v18 = vmul.f32 %v2657_v22, %v1483_v28  ;;  %v1401_v15 = vrot.slane %v2659_v12, 7 }
 0x1d9   : > { %v1458_v60 = vsel %vm1376_vm15, 0.0, %v1456_v53  ;;  %v1374_v25 = vrot.slane %v1372_v8, 6  ;;  %v1496_v5 = vrot.slane %v1489_v40, 6  ;;  %v1408_v23 = vmul.f32 %v2659_v12, %v1407_v2 }
 0x1da   : > { %v1454_v36 = vsel %vm1376_vm15, 1.0, %v1452_v14  ;;  %v1459_v33 = vmul.f32 %v1458_v60, %v1450_v9  ;;  %v1381_v38 = vsel %vm1376_vm15, 0.0, %v1379_v7  ;;  %v1492_v54 = vrot.slane %v1490_v18, 6 }
 0x1db   : > { %v1382_v52 = vmul.f32 %v1381_v38, %v1372_v8  ;;  %v1498_v55 = vsel %vm1376_vm15, 0.0, %v1496_v5  ;;  %v1607_v35 = vsel %vm1364_vm13, 0.0, %v1605_v57  ;;  %v1525_v58 = vrot.slane %v3714_v17, 7 }
 0x1dc   : > { %v1460_v24 = vadd.f32 %v1459_v33, %v1449_v6  ;;  %v3737_v19 = vmul.f32 %v1454_v36, %v1450_v9  ;;  %v1377_v39 = vsel %vm1376_vm15, 1.0, %v1374_v25  ;;  %v1499_v16 = vmul.f32 %v1498_v55, %v1490_v18 }
 0x1dd   : > { %v1383_v31 = vadd.f32 %v1382_v52, %v1371_v61  ;;  %v1494_v20 = vsel %vm1376_vm15, 1.0, %v1492_v54  ;;  %v1403_v43 = vsel %vm1364_vm13, 1.0, %v1401_v15  ;;  %v1409_v22 = vadd.f32 %v1408_v23, %v3672_v48 }
 0x1de   : > { %v2661_v2 = vpop.eup %2660  ;;  %v1467_v10 = vrot.slane %v1460_v24, 4  ;;  %v1500_v26 = vadd.f32 %v1499_v16, %v1489_v40  ;;  %v1410_v44 = vmul.f32 %v2659_v12, %v1403_v43  ;;  %v3743_v63 = vmul.f32 %v1377_v39, %v1372_v8 }
 0x1df   : > { %v1601_v57 = vrot.slane %v2661_v2, 7  ;;  %v1391_v6 = vrot.slane %v1383_v31, 4  ;;  %v1416_v41 = vrot.slane %v1409_v22, 6  ;;  %v1608_v9 = vmul.f32 %v2661_v2, %v1607_v35 }
 0x1e0   : > { %v2663_v1 = vpop.eup %2662  ;;  %v1469_v53 = vsel %vm1388_vm2, 0.0, %v1467_v10  ;;  %v3746_v28 = vmul.f32 %v1494_v20, %v1490_v18  ;;  %v1507_v61 = vrot.slane %v1500_v26, 4  ;;  %v1412_v14 = vrot.slane %v1410_v44, 6 }
 0x1e1   : > { %v1470_v7 = vmul.f32 %v1469_v53, %v3737_v19  ;;  %v1393_v48 = vsel %vm1388_vm2, 0.0, %v1391_v6  ;;  %v1418_v40 = vsel %vm1376_vm15, 0.0, %v1416_v41  ;;  %v1603_v12 = vsel %vm1364_vm13, 1.0, %v1601_v57 }
 0x1e2   : > { %v1394_v8 = vmul.f32 %v1393_v48, %v3743_v63  ;;  %v1509_v15 = vsel %vm1388_vm2, 0.0, %v1507_v61  ;;  %v1352_v60 = vmul.f32 %v3579_v47, %v3700_v45  ;;  %v4072_v18 = vmax.f32 %v3478_v59, 0.0 }
 0x1e3   : > { %v3763_v5 = vadd.f32 %v1470_v7, %v1460_v24  ;;  %v1510_v23 = vmul.f32 %v1509_v15, %v3746_v28  ;;  %v1414_v36 = vsel %vm1376_vm15, 1.0, %v1412_v14  ;;  %v1419_v33 = vmul.f32 %v1418_v40, %v1410_v44 }
 0x1e4   : > { %v927_v25 = vadd.f32 %v903_v56, %v4072_v18  ;;  %v1395_v38 = vadd.f32 %v1394_v8, %v1383_v31  ;;  %v1609_v54 = vadd.f32 %v1608_v9, %v3709_v11  ;;  %v1610_v52 = vmul.f32 %v2661_v2, %v1603_v12  ;;  %v4074_v18 = vld [vmem:[#allocation9_spill] sm:$0xff] }
 0x1e5   : > { %v1521_v47 = vrot.slane %v2663_v1, 7  ;;  %v3768_v45 = vadd.f32 %v1510_v23, %v1500_v26  ;;  %v1420_v59 = vadd.f32 %v1419_v33, %v1409_v22  ;;  %v1527_v50 = vsel %vm1364_vm13, 0.0, %v1525_v58  ;;  %v4073_v58 = vld [vmem:[#allocation24_spill] sm:$0xff] }
 0x1e6   : > { %v1343_v3 = vmul.f32 1.442695, %v3723_v21  ;;  %v1612_v37 = vrot.slane %v1610_v52, 6  ;;  %v1616_v56 = vrot.slane %v1609_v54, 6  ;;  %v1528_v35 = vmul.f32 %v2663_v1, %v1527_v50 }
 0x1e7   : > { %v1523_v55 = vsel %vm1364_vm13, 1.0, %v1521_v47  ;;  %v1427_v24 = vrot.slane %v1420_v59, 4  ;;  %v1360_v16 = vmul.f32 %v3571_v32, %v1352_v60  ;;  %v1421_v11 = vmul.f32 %v1414_v36, %v1410_v44 }
 0x1e8   : > { %v1530_v39 = vmul.f32 %v2663_v1, %v1523_v55  ;;  %2664 = vpow2.f32 %v1343_v3  ;;  %v1618_v2 = vsel %vm1376_vm15, 0.0, %v1616_v56  ;;  %v1529_v31 = vadd.f32 %v1528_v35, %v3714_v17 }
 0x1e9   : > { %v1326_v20 = vmul.f32 %v3623_v51, %v927_v25  ;;  %v1311_v21 = vsel %vm1305_vm6, %v3548_v29, %v4073_v58  ;;  %v1429_v43 = vsel %vm1388_vm2, 0.0, %v1427_v24  ;;  %v1619_v22 = vmul.f32 %v1618_v2, %v1610_v52 }
 0x1ea   : > { %v1430_v10 = vmul.f32 %v1429_v43, %v1421_v11  ;;  %v1532_v26 = vrot.slane %v1530_v39, 6  ;;  %v1536_v57 = vrot.slane %v1529_v31, 6  ;;  %v1614_v32 = vsel %vm1376_vm15, 1.0, %v1612_v37 }
 0x1eb   : > { %v1339_v6 = vmul.f32 1.442695, %v1326_v20  ;;  %v1620_v44 = vadd.f32 %v1619_v22, %v1609_v54  ;;  %v1350_v41 = vmul.f32 %v1311_v21, %v927_v25  ;;  %v1386_v9 = vrot.slane %v3743_v63, 4 }
 0x1ec   : > { %v1431_v17 = vadd.f32 %v1430_v10, %v1420_v59  ;;  %v1538_v51 = vsel %vm1376_vm15, 0.0, %v1536_v57  ;;  %v1645_v1 = vrot.slane %v1360_v16, 7  ;;  %v3785_v14 = vmul.f32 %v1614_v32, %v1610_v52 }
 0x1ed   : > { %v1627_v53 = vrot.slane %v1620_v44, 4  ;;  %v1539_v61 = vmul.f32 %v1538_v51, %v1530_v39  ;;  %2666 = vpow2.f32 %v1339_v6  ;;  %v1358_v29 = vmul.f32 %v1350_v41, %v3581_v0 }
 0x1ee   : > { %v1534_v7 = vsel %vm1376_vm15, 1.0, %v1532_v26  ;;  %v1389_v48 = vsel %vm1388_vm2, 1.0, %v1386_v9  ;;  %v1423_v40 = vrot.slane %v1421_v11, 4  ;;  %v3793_v25 = vsub.s32 7, %v4074_v18 }
 0x1ef   : > { %v1629_v12 = vsel %vm1388_vm2, 0.0, %v1627_v53  ;;  %v1540_v8 = vadd.f32 %v1539_v61, %v1529_v31  ;;  %v1396_v15 = vmul.f32 %v1389_v48, %v3743_v63  ;;  %v3795_v36 = vmul.f32 %v1534_v7, %v1530_v39 }
 0x1f0   : > { %v1630_v60 = vmul.f32 %v1629_v12, %v3785_v14  ;;  %v1647_v33 = vsel %vm1364_vm13, 0.0, %v1645_v1  ;;  %v1425_v50 = vsel %vm1388_vm2, 1.0, %v1423_v40  ;;  %v1565_v3 = vrot.slane %v1358_v29, 7 }
 0x1f1   : > { %v1547_v0 = vrot.slane %v1540_v8, 4  ;;  %v1397_v54 = vmul.f32 0.0, %v1396_v15  ;;  %v1463_v56 = vrot.slane %v3737_v19, 4  ;;  %v1432_v2 = vmul.f32 %v1425_v50, %v1421_v11 }
 0x1f2   : > { %v2665_v23 = vpop.eup %2664  ;;  %v3798_v52 = vadd.f32 %v1630_v60, %v1620_v44  ;;  %v1567_v10 = vsel %vm1364_vm13, 0.0, %v1565_v3 }
 0x1f3   : > { %v1641_v47 = vrot.slane %v2665_v23, 7  ;;  %v1648_v59 = vmul.f32 %v2665_v23, %v1647_v33  ;;  %v1549_v63 = vsel %vm1388_vm2, 0.0, %v1547_v0  ;;  %v1398_v37 = vadd.f32 %v1397_v54, %v1395_v38 }
 0x1f4   : > { %v1550_v55 = vmul.f32 %v1549_v63, %v3795_v36  ;;  %v1465_v26 = vsel %vm1388_vm2, 1.0, %v1463_v56 }
 0x1f5   : > { %v1643_v35 = vsel %vm1364_vm13, 1.0, %v1641_v47  ;;  %v1649_v24 = vadd.f32 %v1648_v59, %v1360_v16  ;;  %v1436_v31 = vrot.slane %v1398_v37, %v3793_v25  ;;  %v1688_v20 = vmul.f32 %v1398_v37, %v3430_v42 }
 0x1f6   : > { %v1650_v39 = vmul.f32 %v2665_v23, %v1643_v35  ;;  %v1551_v58 = vadd.f32 %v1550_v55, %v1540_v8  ;;  %v1503_v16 = vrot.slane %v3746_v28, 4  ;;  %v1472_v51 = vmul.f32 %v1465_v26, %v3737_v19 }
 0x1f7   : > { %v1656_v21 = vrot.slane %v1649_v24, 6  ;;  %v2667_v43 = vpop.eup %2666  ;;  %v1437_v38 = vmul.f32 %v1436_v31, %v1432_v2 }
 0x1f8   : > { %v1652_v22 = vrot.slane %v1650_v39, 6  ;;  %v1561_v6 = vrot.slane %v2667_v43, 7  ;;  %v1568_v32 = vmul.f32 %v2667_v43, %v1567_v10  ;;  %v1623_v10 = vrot.slane %v3785_v14, 4 }
 0x1f9   : > { %v1658_v57 = vsel %vm1376_vm15, 0.0, %v1656_v21  ;;  %v1438_v44 = vadd.f32 %v1437_v38, %v1431_v17  ;;  %v1505_v17 = vsel %vm1388_vm2, 1.0, %v1503_v16 }
 0x1fa   : > { %v1659_v11 = vmul.f32 %v1658_v57, %v1650_v39  ;;  %v1654_v41 = vsel %vm1376_vm15, 1.0, %v1652_v22  ;;  %v1563_v42 = vsel %vm1364_vm13, 1.0, %v1561_v6  ;;  %v1569_v9 = vadd.f32 %v1568_v32, %v1358_v29 }
 0x1fb   : > { %v1570_v53 = vmul.f32 %v2667_v43, %v1563_v42  ;;  %v1476_v61 = vrot.slane %v1438_v44, %v3793_v25  ;;  %v1689_v7 = vmul.f32 %v1438_v44, %v3451_v13  ;;  %v1661_v60 = vmul.f32 %v1654_v41, %v1650_v39 }
 0x1fc   : > { %v1660_v1 = vadd.f32 %v1659_v11, %v1649_v24  ;;  %v1576_v48 = vrot.slane %v1569_v9, 6  ;;  %v1543_v13 = vrot.slane %v3795_v36, 4  ;;  %v1512_v54 = vmul.f32 %v1505_v17, %v3746_v28 }
 0x1fd   : > { %v1572_v12 = vrot.slane %v1570_v53, 6  ;;  %v1477_v8 = vmul.f32 %v1476_v61, %v1472_v51  ;;  %v1696_v15 = vpack.c.bf16 %v1689_v7, %v1688_v20  ;;  %v1663_v6 = vrot.slane %v1661_v60, 4 }
 0x1fe   : > { %v1667_v40 = vrot.slane %v1660_v1, 4  ;;  %v1578_v18 = vsel %vm1376_vm15, 0.0, %v1576_v48  ;;  %v1545_v55 = vsel %vm1388_vm2, 1.0, %v1543_v13 }
 0x1ff   : > { %v1574_v19 = vsel %vm1376_vm15, 1.0, %v1572_v12  ;;  %v1579_v23 = vmul.f32 %v1578_v18, %v1570_v53  ;;  %v1478_v0 = vadd.f32 %v1477_v8, %v3763_v5  ;;  %2464 = vmatprep.mubr.bf16.mxu1 %v1696_v15  ;;  %v1552_v28 = vmul.f32 %v1545_v55, %v3795_v36  ;;  %v4075_v12 = vld [vmem:[#allocation10_spill] sm:$0xff] }
 0x200   : > { %v1669_v29 = vsel %vm1388_vm2, 0.0, %v1667_v40  ;;  %v1581_v3 = vmul.f32 %v1574_v19, %v1570_v53  ;;  %v1665_v41 = vsel %vm1388_vm2, 1.0, %v1663_v6 }
 0x201   : > { %v1670_v33 = vmul.f32 %v1669_v29, %v1661_v60  ;;  %v1580_v47 = vadd.f32 %v1579_v23, %v1569_v9  ;;  %v1516_v59 = vrot.slane %v1478_v0, %v3793_v25  ;;  %v1690_v50 = vmul.f32 %v3428_v27, %v1478_v0  ;;  %v4077_v29 = vld [vmem:[#allocation12_spill] sm:$0xff] }
 0x202   : > { %v1583_v39 = vrot.slane %v1581_v3, 4  ;;  %v1672_v9 = vmul.f32 %v1665_v41, %v1661_v60  ;;  %v4076_v60 = vld [vmem:[#allocation11_spill] sm:$0xff] }
 0x203   : > { %v1671_v63 = vadd.f32 %v1670_v33, %v1660_v1  ;;  %v1587_v37 = vrot.slane %v1580_v47, 4  ;;  %v1517_v56 = vmul.f32 %v1516_v59, %v1512_v54 }
 0x204   : > { %v1585_v43 = vsel %vm1388_vm2, 1.0, %v1583_v39 }
 0x205   : > { %v1589_v35 = vsel %vm1388_vm2, 0.0, %v1587_v37  ;;  %v1518_v5 = vadd.f32 %v1517_v56, %v3768_v45  ;;  %v1592_v38 = vmul.f32 %v1585_v43, %v1581_v3 }
 0x206   : > { %v1590_v24 = vmul.f32 %v1589_v35, %v1581_v3  ;;  %v1911_v48 = vpop.permute.xlu1 %1910 }
 0x207   : > { %v1691_v2 = vmul.f32 %v3442_v34, %v1518_v5  ;;  %v1556_v31 = vrot.slane %v1518_v5, %v3793_v25  ;;  %v1625_v34 = vsel %vm1388_vm2, 1.0, %v1623_v10 }
 0x208   : > { %v1591_v20 = vadd.f32 %v1590_v24, %v1580_v47  ;;  %v1632_v11 = vmul.f32 %v1625_v34, %v3785_v14  ;;  %v2345_v14 = vld [vmem:[%s4001_s10] ss:$0 sm:$0xff] }
 0x209   : > { %v1697_v27 = vpack.c.bf16 %v1691_v2, %v1690_v50  ;;  %v1557_v21 = vmul.f32 %v1556_v31, %v1552_v28  ;;  %v1725_v40 = vmul.f32 %v2345_v14, %v3067_v62  ;;  %v1723_v8 = vmul.f32 %v2345_v14, %v4075_v12  ;;  %v4078_v2 = vld [vmem:[#allocation15_spill] sm:$0xff] }
 0x20a   : > { %v1726_v18 = vmul.f32 %v2345_v14, %v4076_v60  ;;  %v1724_v19 = vmul.f32 %v2345_v14, %v4077_v29  ;;  %v1729_v28 = vmul.f32 %v2345_v14, %v4078_v2 }
 0x20b   : > { %2465 = vmatmul.mubr.bf16.vlgmr.msra.gmra.mrb[12].mxu1 %v1697_v27  ;;  %v1558_v22 = vadd.f32 %v1557_v21, %v1551_v58 }
 0x20c   : > { %v1915_v62 = vpop.permute.xlu1 %1914 }
 0x20d   : > { %v1596_v45 = vrot.slane %v1558_v22, %v3793_v25  ;;  %v1692_v26 = vmul.f32 %v1558_v22, %v3493_v4  ;;  %v4080_v22 = vld [vmem:[#allocation16_spill] sm:$0xff] }
 0x20e   : > { %v1730_v10 = vmul.f32 %v2345_v14, %v4080_v22 }
 0x20f   : > { %v1597_v57 = vmul.f32 %v1596_v45, %v1592_v38 }
 0x211   : > { %v1598_v36 = vadd.f32 %v1597_v57, %v1591_v20  ;;  %v4079_v20 = vld [vmem:[#allocation13_spill] sm:$0xff]  ;;  %v4081_v57 = vld [vmem:[#allocation14_spill] sm:$0xff] }
 0x212   : > { %v1727_v27 = vmul.f32 %v2345_v14, %v4079_v20  ;;  %v1728_v34 = vmul.f32 %v2345_v14, %v4081_v57 }
 0x213   : > { %v1636_v32 = vrot.slane %v1598_v36, %v3793_v25  ;;  %v1693_v16 = vmul.f32 %v1598_v36, %v3514_v30  ;;  %v1909_v30 = vpop.permute.xlu0 %1908  ;;  %v1919_v39 = vpop.permute.xlu1 %1918 }
 0x215   : > { %v1698_v44 = vpack.c.bf16 %v1693_v16, %v1692_v26  ;;  %v1637_v58 = vmul.f32 %v1636_v32, %v1632_v11 }
 0x217   : > { %2468 = vmatprep.mubr.bf16.mxu1 %v1698_v44  ;;  %v1638_v42 = vadd.f32 %v1637_v58, %v3798_v52 }
 0x219   : > { %v1676_v4 = vrot.slane %v1638_v42, %v3793_v25  ;;  %v1694_v51 = vmul.f32 %v3491_v46, %v1638_v42  ;;  %v1913_v46 = vpop.permute.xlu0 %1912 }
 0x21b   : > { %v1677_v1 = vmul.f32 %v1676_v4, %v1672_v9 }
 0x21d   : > { %v1678_v53 = vadd.f32 %v1677_v1, %v1671_v63  ;;  %v1917_v24 = vpop.permute.xlu0 %1916  ;;  %v1923_v32 = vpop.permute.xlu1 %1922 }
 0x21f   : > { %v1695_v61 = vmul.f32 %v3504_v49, %v1678_v53 }
 0x221   : > { %v1699_v7 = vpack.c.bf16 %v1695_v61, %v1694_v51  ;;  %v1921_v38 = vpop.permute.xlu0 %1920 }
 0x223   : > { %2469 = vmatmul.mubr.bf16.gmra.mrb[16].mxu1 %v1699_v7 }
 0x2de   : > { %v2466_v52 = vpop.f32.mrb[12].mxu1 }
 0x2df   : > { %v1822_v25 = vadd.f32 %v2466_v52, %v1725_v40  ;;  %v1813_v15 = vpop.f32.mrb[13].mxu1 }
 0x2e0   : > { %v1814_v17 = vadd.f32 %v1813_v15, %v1723_v8  ;;  %v2467_v49 = vpop.f32.mrb[14].mxu1 }
 0x2e1   : > { %v1816_v23 = vpop.f32.mrb[15].mxu1  ;;  %v1825_v33 = vadd.f32 %v2467_v49, %v1726_v18  ;;  %v3853_v13 = vmul.f32 %v1913_v46, %v1822_v25 }
 0x2e2   : > { %v3851_v0 = vmul.f32 %v1909_v30, %v1814_v17  ;;  %v1817_v54 = vadd.f32 %v1816_v23, %v1724_v19  ;;  %v2554_v30 = vld [vmem:[%s4003_s12] sm:$0xff]  }
 0x2e3   : > { %v3859_v50 = vmul.f32 %v1915_v62, %v1825_v33  ;;  %v1942_v37 = vmul.f32 %v3853_v13, %v3853_v13  ;;  %2472 = vmatprep.subr.bf16.mxu0 %v2554_v30  ;;  %v2362_v23 = vld [vmem:[%s4002_s11] ss:$0 sm:$0xff] }
 0x2e4   : > { %v3855_v47 = vmul.f32 %v1911_v48, %v1817_v54  ;;  %v1940_v59 = vmul.f32 %v3851_v0, %v3851_v0  ;;  %2473 = vmatpush3.bf16.msra.mxu0 %v2554_v30  ;;  %v2687_v30 = vld [vmem:[%s2902_s18] sm:$0xff] }
 0x2e5   : > { %v1954_v55 = vsel %vm495_vm0, %v1942_v37, 0.0  ;;  %v1943_v35 = vmul.f32 %v3859_v50, %v3859_v50 }
 0x2e6   : > { %v1948_v63 = vsel %vm495_vm0, %v1940_v59, 0.0  ;;  %v1941_v3 = vmul.f32 %v3855_v47, %v3855_v47 }
 0x2e7   : > { %1949 = vadd.xlane.f32.xlu0 %v1948_v63  ;;  %v1957_v5 = vsel %vm495_vm0, %v1943_v35, 0.0 }
 0x2e8   : > { %v1951_v56 = vsel %vm495_vm0, %v1941_v3, 0.0 }
 0x2e9   : > { %1952 = vadd.xlane.f32.xlu1 %v1951_v56 }
 0x2eb   : > { %1955 = vadd.xlane.f32.xlu0 %v1954_v55 }
 0x2ef   : > { %1958 = vadd.xlane.f32.xlu0 %v1957_v5 }
 0x2f6   : > { %v2470_v31 = vpop.f32.mrb[16].mxu1 }
 0x2f7   : > { %v1838_v21 = vadd.f32 %v2470_v31, %v1729_v28  ;;  %v1829_v43 = vpop.f32.mrb[17].mxu1 }
 0x2f8   : > { %v1830_v45 = vadd.f32 %v1829_v43, %v1727_v27  ;;  %v2471_v26 = vpop.f32.mrb[18].mxu1 }
 0x2f9   : > { %v1841_v36 = vadd.f32 %v2471_v26, %v1730_v10  ;;  %v1832_v6 = vpop.f32.mrb[19].mxu1  ;;  %v3877_v11 = vmul.f32 %v1921_v38, %v1838_v21 }
 0x2fa   : > { %v3875_v16 = vmul.f32 %v1917_v24, %v1830_v45  ;;  %v1833_v44 = vadd.f32 %v1832_v6, %v1728_v34 }
 0x2fb   : > { %v3881_v41 = vmul.f32 %v1923_v32, %v1841_v36  ;;  %v1946_v51 = vmul.f32 %v3877_v11, %v3877_v11 }
 0x2fc   : > { %v3879_v58 = vmul.f32 %v1919_v39, %v1833_v44  ;;  %v1944_v42 = vmul.f32 %v3875_v16, %v3875_v16 }
 0x2fd   : > { %v1947_v53 = vmul.f32 %v3881_v41, %v3881_v41  ;;  %v1966_v61 = vsel %vm495_vm0, %v1946_v51, 0.0  ;;  %v2685_v51 = vld [vmem:[%s2902_s18 + $0x10] sm:$0xff] }
 0x2fe   : > { %v1960_v9 = vsel %vm495_vm0, %v1944_v42, 0.0  ;;  %v1945_v4 = vmul.f32 %v3879_v58, %v3879_v58 }
 0x2ff   : > { %1961 = vadd.xlane.f32.xlu1 %v1960_v9  ;;  %v1969_v7 = vsel %vm495_vm0, %v1947_v53, 0.0  ;;  %v2026_v9 = vld [vmem:[%s485_s22] sm:$0xff]  ;;  %v2686_v53 = vld [vmem:[%s2902_s18 + $0x18] sm:$0xff] }
 0x300   : > { %v1963_v1 = vsel %vm495_vm0, %v1945_v4, 0.0  ;;  %v2027_v4 = vld [vmem:[%s485_s22 + $0x8] sm:$0xff] }
 0x301   : > { %1964 = vadd.xlane.f32.xlu0 %v1963_v1 }
 0x303   : > { %1967 = vadd.xlane.f32.xlu1 %v1966_v61 }
 0x305   : > { %1970 = vadd.xlane.f32.xlu0 %v1969_v7 }
 0x374   : > { %v1950_v14 = vpop.xlane.xlu0 %1949 }
 0x375   : > { %v1973_v48 = vmul.f32 0.0625, %v1950_v14  ;;  %v2034_v14 = vmul.f32 %v2687_v30, %v2026_v9 }
 0x376   : > { %v1953_v40 = vpop.xlane.xlu1 %1952 }
 0x377   : > { %v1981_v52 = vadd.f32 1e-05, %v1973_v48  ;;  %v1974_v12 = vmul.f32 0.0625, %v1953_v40  ;;  %v2688_v48 = vld [vmem:[%s2902_s18 + $0x8] sm:$0xff] }
 0x378   : > { %v1956_v8 = vpop.xlane.xlu0 %1955  ;;  %v2035_v40 = vmul.f32 %v2688_v48, %v2027_v4 }
 0x379   : > { %2668 = vrsqrt.f32 %v1981_v52  ;;  %v1982_v25 = vadd.f32 1e-05, %v1974_v12  ;;  %v1975_v15 = vmul.f32 0.0625, %v1956_v8 }
 0x37b   : > { %2670 = vrsqrt.f32 %v1982_v25  ;;  %v1983_v46 = vadd.f32 1e-05, %v1975_v15 }
 0x37c   : > { %v1959_v17 = vpop.xlane.xlu0 %1958 }
 0x37d   : > { %2672 = vrsqrt.f32 %v1983_v46  ;;  %v1976_v60 = vmul.f32 0.0625, %v1959_v17 }
 0x37f   : > { %v1984_v18 = vadd.f32 1e-05, %v1976_v60 }
 0x381   : > { %2674 = vrsqrt.f32 %v1984_v18 }
 0x383   : > { %v2669_v49 = vpop.eup %2668 }
 0x384   : > { %v1997_v29 = vmul.f32 %v2669_v49, %v3851_v0  ;;  %v2032_v49 = vld [vmem:[%s485_s22 + $0x30] sm:$0xff] }
 0x385   : > { %v2671_v19 = vpop.eup %2670 }
 0x386   : > { %v1998_v33 = vmul.f32 %v2671_v19, %v3855_v47  ;;  %v2012_v62 = vmul.f32 %v2362_v23, %v1997_v29  ;;  %v2033_v29 = vld [vmem:[%s485_s22 + $0x38] sm:$0xff]  ;;  %v2030_v19 = vld [vmem:[%s485_s22 + $0x20] sm:$0xff] }
 0x387   : > { %v2673_v54 = vpop.eup %2672 }
 0x388   : > { %v2013_v59 = vmul.f32 %v2362_v23, %v1998_v33  ;;  %v1999_v63 = vmul.f32 %v2673_v54, %v3853_v13  ;;  %v2689_v33 = vld [vmem:[%s2902_s18 + $0x30] sm:$0xff] }
 0x389   : > { %v2040_v54 = vmul.f32 %v2689_v33, %v2032_v49 }
 0x38a   : > { %v2020_v3 = vpack.c.bf16 %v2013_v59, %v2012_v62  ;;  %v2014_v35 = vmul.f32 %v2362_v23, %v1999_v63  ;;  %v2690_v62 = vld [vmem:[%s2902_s18 + $0x38] sm:$0xff] }
 0x38b   : > { %v2675_v37 = vpop.eup %2674  ;;  %v2041_v59 = vmul.f32 %v2690_v62, %v2033_v29 }
 0x38c   : > { %v2000_v56 = vmul.f32 %v2675_v37, %v3859_v50  ;;  %v1962_v55 = vpop.xlane.xlu1 %1961  ;;  %2474 = vmatprep.mubr.msk.bf16.mxu0 %vm495_vm0, %v2020_v3  ;;  %v2691_v3 = vld [vmem:[%s2902_s18 + $0x20] sm:$0xff] }
 0x38d   : > { %v1977_v0 = vmul.f32 0.0625, %v1962_v55  ;;  %v2038_v37 = vmul.f32 %v2691_v3, %v2030_v19 }
 0x38e   : > { %v2015_v5 = vmul.f32 %v2362_v23, %v2000_v56  ;;  %v1965_v24 = vpop.xlane.xlu0 %1964  ;;  %v2692_v56 = vld [vmem:[%s2902_s18 + $0x28] sm:$0xff]  ;;  %s2380_s18 = sshll.u32 %s2864_s17, 10  ;;  %s3950_s17 = scalar_lea.sflag [#allocation5], %s473_s25 }
 0x38f   : > { %v1985_v39 = vadd.f32 1e-05, %v1977_v0  ;;  %v1978_v2 = vmul.f32 0.0625, %v1965_v24  ;;  %s3943_s21 = scalar_lea.hbm %s4005_s14, %s2380_s18  ;;  %s2697_s18 = sshll.u32 %s2765_s0, 4  ;;  %s2698_s18 = int_to_ptr.vmem [resolvable:$false] %s2697_s18 }
 0x390   : > { %v2021_v28 = vpack.c.bf16 %v2015_v5, %v2014_v35  ;;  %v1968_v47 = vpop.xlane.xlu1 %1967  ;;  %s2699_s28 = scalar_lea.vmem %s2698_s18, 2048  ;;  %p2700_p0 = scmp.lt.s32.totalorder %s3945_s27, %s2698_s18 }
 0x391   : > { %2676 = vrsqrt.f32 %v1985_v39  ;;  %v1986_v31 = vadd.f32 1e-05, %v1978_v2  ;;  %v1979_v20 = vmul.f32 0.0625, %v1968_v47 }
 0x392   : > { %2475 = vmatmul.mubr.msk.bf16.vlgmr.msra.gmra.mrb[12].mxu0 %vm495_vm0, %v2021_v28  ;;  %v1971_v13 = vpop.xlane.xlu0 %1970 }
 0x393   : > { %2678 = vrsqrt.f32 %v1986_v31  ;;  %v1987_v27 = vadd.f32 1e-05, %v1979_v20  ;;  %v1980_v50 = vmul.f32 0.0625, %v1971_v13 }
 0x395   : > { %2680 = vrsqrt.f32 %v1987_v27  ;;  %v1988_v21 = vadd.f32 1e-05, %v1980_v50 }
 0x397   : > { %2682 = vrsqrt.f32 %v1988_v21 }
 0x39b   : > { %v2677_v43 = vpop.eup %2676 }
 0x39c   : > { %v2001_v22 = vmul.f32 %v2677_v43, %v3875_v16 }
 0x39d   : > { %v2679_v10 = vpop.eup %2678 }
 0x39e   : > { %v2002_v38 = vmul.f32 %v2679_v10, %v3879_v58  ;;  %v2016_v26 = vmul.f32 %v2362_v23, %v2001_v22  ;;  %v2555_v58 = vld [vmem:[%s4004_s13] sm:$0xff]  }
 0x39f   : > { %v2681_v45 = vpop.eup %2680  ;;  %2482 = vmatprep.subr.bf16.mxu0 %v2555_v58 }
 0x3a0   : > { %v2017_v57 = vmul.f32 %v2362_v23, %v2002_v38  ;;  %v2003_v34 = vmul.f32 %v2681_v45, %v3877_v11  ;;  %2483 = vmatpush3.bf16.msra.mxu0 %v2555_v58  ;;  %v2028_v11 = vld [vmem:[%s485_s22 + $0x10] sm:$0xff] }
 0x3a1   : > { %v2683_v36 = vpop.eup %2682  ;;  %v2036_v1 = vmul.f32 %v2685_v51, %v2028_v11 }
 0x3a2   : > { %v2022_v6 = vpack.c.bf16 %v2017_v57, %v2016_v26  ;;  %v2004_v32 = vmul.f32 %v2683_v36, %v3881_v41  ;;  %v2018_v44 = vmul.f32 %v2362_v23, %v2003_v34  ;;  %v2029_v41 = vld [vmem:[%s485_s22 + $0x18] sm:$0xff] }
 0x3a3   : > { %v2037_v61 = vmul.f32 %v2686_v53, %v2029_v41 }
 0x3a4   : > { %2478 = vmatprep.mubr.msk.bf16.mxu0 %vm495_vm0, %v2022_v6  ;;  %v2019_v42 = vmul.f32 %v2362_v23, %v2004_v32  ;;  %v2031_v23 = vld [vmem:[%s485_s22 + $0x28] sm:$0xff]  ;;  %s2693_s22 = scalar_lea.vmem %s3945_s27, 1024 }
 0x3a5   : > { %v2039_v55 = vmul.f32 %v2692_v56, %v2031_v23  ;;  %p2694_p11 = scmp.ne.s32.totalorder %s3945_s27, %s2693_s22  ;;  %p2701_p1 = scmp.lt.s32.totalorder %s2699_s28, %s2693_s22 }
 0x3a6   : > { %v2023_v16 = vpack.c.bf16 %v2019_v42, %v2018_v44 }
 0x3a7   : > { %p2695_p12 = pnand %p2694_p11, %p2881_p5  ;;  %p2702_p2 = por %p2701_p1, %p2700_p0 }
 0x3a8   : > { %2479 = vmatmul.mubr.msk.bf16.gmra.mrb[16].mxu0 %vm495_vm0, %v2023_v16 }
 0x3a9   : > { %p2696_p13 = pneg %p2695_p12 }
 0x3ab   : > { %p2703_p3 = pnand %p2702_p2, %p2696_p13 }
 0x465   : > { %v2476_v7 = vpop.f32.mrb[12].mxu0 }
 0x466   : > { %v2094_v52 = vpop.f32.mrb[13].mxu0  ;;  %v2103_v8 = vadd.f32 %v2476_v7, %v2036_v1 }
 0x467   : > { %v2477_v12 = vpop.f32.mrb[14].mxu0  ;;  %v2095_v46 = vadd.f32 %v2094_v52, %v2034_v14 }
 0x468   : > { %v2106_v25 = vadd.f32 %v2477_v12, %v2037_v61  ;;  %v2097_v15 = vpop.f32.mrb[15].mxu0 }
 0x469   : > { %v2098_v17 = vadd.f32 %v2097_v15, %v2035_v40 }
 0x46a   : > { %v2126_v60 = vpack.c.bf16 %v2106_v25, %v2103_v8 }
 0x46b   : > { %v2125_v18 = vpack.c.bf16 %v2098_v17, %v2095_v46 }
 0x46d   : > { %2484 = vmatprep.mubr.msk.bf16.mxu0 %vm495_vm0, %v2125_v18 }
 0x46e   : > { %2485 = vmatmul.mubr.msk.bf16.vlgmr.msra.gmra.mrb[20].mxu0 %vm495_vm0, %v2126_v60 }
 0x47b   : > { %v2480_v63 = vpop.f32.mrb[16].mxu0 }
 0x47c   : > { %v2110_v0 = vpop.f32.mrb[17].mxu0  ;;  %v2119_v5 = vadd.f32 %v2480_v63, %v2040_v54 }
 0x47d   : > { %v2481_v35 = vpop.f32.mrb[18].mxu0  ;;  %v2111_v2 = vadd.f32 %v2110_v0, %v2038_v37 }
 0x47e   : > { %v2122_v24 = vadd.f32 %v2481_v35, %v2041_v59  ;;  %v2113_v39 = vpop.f32.mrb[19].mxu0 }
 0x47f   : > { %v2114_v28 = vadd.f32 %v2113_v39, %v2039_v55 }
 0x480   : > { %v2128_v47 = vpack.c.bf16 %v2122_v24, %v2119_v5 }
 0x481   : > { %v2127_v31 = vpack.c.bf16 %v2114_v28, %v2111_v2 }
 0x483   : > { %2488 = vmatprep.mubr.msk.bf16.mxu0 %vm495_vm0, %v2127_v31 }
 0x484   : > { %2489 = vmatmul.mubr.msk.bf16.gmra.mrb[24].mxu0 %vm495_vm0, %v2128_v47 }
 0x541   : > { %v2486_v20 = vpop.f32.mrb[20].mxu0 }
 0x542   : > { %2216 = vst.msk [vmem:[%s475_s20 + $0x10] sm:$0xff] %vm495_vm0, %v2486_v20  ;;  %v2183_v13 = vpop.f32.mrb[21].mxu0 }
 0x543   : > { %2214 = vst.msk [vmem:[%s475_s20] sm:$0xff] %vm495_vm0, %v2183_v13  ;;  %v2487_v27 = vpop.f32.mrb[22].mxu0 }
 0x544   : > { %2217 = vst.msk [vmem:[%s475_s20 + $0x18] sm:$0xff] %vm495_vm0, %v2487_v27  ;;  %v2186_v50 = vpop.f32.mrb[23].mxu0 }
 0x545   : > { %2215 = vst.msk [vmem:[%s475_s20 + $0x8] sm:$0xff] %vm495_vm0, %v2186_v50 }
 0x557   : > { %v2490_v21 = vpop.f32.mrb[24].mxu0 }
 0x558   : > { %2220 = vst.msk [vmem:[%s475_s20 + $0x30] sm:$0xff] %vm495_vm0, %v2490_v21  ;;  %v2199_v43 = vpop.f32.mrb[25].mxu0 }
 0x559   : > { %2218 = vst.msk [vmem:[%s475_s20 + $0x20] sm:$0xff] %vm495_vm0, %v2199_v43  ;;  %v2491_v22 = vpop.f32.mrb[26].mxu0 }
 0x55a   : > { %2221 = vst.msk [vmem:[%s475_s20 + $0x38] sm:$0xff] %vm495_vm0, %v2491_v22  ;;  %v2202_v10 = vpop.f32.mrb[27].mxu0 }
 0x55b   : > { %2219 = vst.msk [vmem:[%s475_s20 + $0x28] sm:$0xff] %vm495_vm0, %v2202_v10 }
 0x55c   : > { %2706 = shalt.err (!%p2703_p3)
}
 0x55d   : > { %s2707_s25 = scalar_lea.hbm %s3943_s21, 1024  ;;  %s2711_s0 = scalar_lea.hbm %s4005_s14, 2048 }
 0x55e   : > { %p2708_p4 = scmp.ne.s32.totalorder %s3943_s21, %s2707_s25  ;;  %p2712_p9 = scmp.lt.u32.totalorder %s3943_s21, %s4005_s14 }
 0x55f   : > { %p2713_p10 = scmp.lt.u32.totalorder %s2711_s0, %s2707_s25  ;;  %p2715_p12 = scmp.lt.u32.totalorder %s2707_s25, %s3943_s21 }
 0x560   : > { %p2709_p7 = pnand %p2708_p4, %p2881_p5 }
 0x561   : > { %p2714_p11 = por %p2713_p10, %p2712_p9 }
 0x562   : > { %p2710_p8 = pneg %p2709_p7 }
 0x563   : > { %p2716_p13 = por %p2715_p12, %p2714_p11 }
 0x565   : > { %p2717_p0 = pnand %p2716_p13, %p2710_p8 }
 0x567   : > { %2720 = shalt.err (!%p2717_p0)
}
 0x568   : > { %s2766_s22 = smov 128   ;;  %s2767_s28 = smov 8  }
 0x569   : > { %2494 = dma.vmem_to_hbm [thread:$0]  (%p2881_p5), %s3945_s27, 1024, %s3943_s21, %s3950_s17, %s2766_s22, %s2766_s22, %s2767_s28  }
 0x56a PF: > { %p2500_p1 = scmp.ge.s32.totalorder %s2755_s16, 2  ;;  %s2251_s1 = sand.u32 1, %s2743_s29  }
 0x56b   : > { %s2252_s25 = scalar_lea.sflag [#allocation5], %s2251_s1 }
 0x56c   : > { %p2497_p2 = pnand %p2500_p1, %p2885_p6 }
 0x56e   : > { %2738 = dma.done.wait (!%p2497_p2), %s2252_s25, 1024  }
 0x56f   : > { %2740 = vsyncadd (!%p2497_p2), %s2252_s25, 4294966272  ;;  %s4084_s20 = sld [smem:[#allocation7_spill]]  ;;  %p24_p3 = scmp.ge.s32.totalorder %s2868_s19, 4  }
 0x570   : > { %s4085_s29 = smov %s2747_s30  ;;  %s4086_s30 = smov %s2751_s15 }
 0x571   : > { %s4088_s16 = smov %s2868_s19  ;;  %26 = sbr.rel (!%p24_p3) target bundleno = 6 (0x6), region = 114 }
 0x575   : > { %s4087_s15 = smov %s4084_s20 }
 0x578   :  { %2257 = vsyncpa [#allocation5], 1 }
 0x579   :  { %2259 = vsyncpa [#allocation5 + $0x1], 1 }

</bundles_post_ra>
